<compile_context>
chip_gen: v6e
topology: v6e:2x2x1
jax: 0.10.0
libtpu: 0.0.40
codegen_flags: <defaults>
</compile_context>

<pallas_src>
import functools
import math

import numpy as np
import jax
import jax.numpy as jnp
from jax.experimental import pallas as pl
from jax.experimental.pallas import tpu as pltpu  # noqa: F401  (TPU backend)

# ----------------------------- tiny T5 config -------------------------------
VOCAB = 128
D_MODEL = 32
N_HEADS = 4
D_KV = 8
HD = N_HEADS * D_KV
D_FF = 64
REL_BUCKETS = 32
REL_MAX_DIST = 128
EPS = 1e-6
NEG_INF = -1e9  # additive mask value (f32 softmax with max-subtraction keeps this safe)

# rows of the packed LayerNorm-weight table
LN_ENC_SA, LN_ENC_FF, LN_ENC_FINAL = 0, 1, 2
LN_DEC_SA, LN_DEC_CA, LN_DEC_FF, LN_DEC_FINAL = 3, 4, 5, 6


# ------------------------------ kernel helpers --------------------------------
def _rms(x, w):
    # T5 LayerNorm: RMS only, no mean subtraction, no bias. f32 math.
    var = jnp.mean(x * x, axis=-1, keepdims=True)
    return x * jax.lax.rsqrt(var + EPS) * w


def _softmax_last(s):
    m = jnp.max(s, axis=-1, keepdims=True)
    p = jnp.exp(s - m)
    return p * pl.reciprocal(jnp.sum(p, axis=-1, keepdims=True), approx=True)


def _mha(q2, k2, v2, mask_add, rel, wo, B, Tq, Tk):
    """Multi-head attention on flattened projections.

    q2:(B*Tq,HD) k2/v2:(B*Tk,HD) f32; mask_add:(B,Tk) additive f32;
    rel:(H,Tq,Tk) f32 or None; wo:(HD,D_MODEL) bf16.
    Returns the O-projected output (B*Tq, D_MODEL) f32.
    Head outputs are folded into Wo (per-head row-slices of Wo accumulated)
    instead of a lane concat; bf16 casts are done once, outside the head loop.
    """
    qb = q2.astype(jnp.bfloat16)
    kb = k2.astype(jnp.bfloat16)
    vb = v2.astype(jnp.bfloat16)
    mask3 = mask_add[:, None, :]                               # (B, 1, Tk)
    out = None
    for h in range(N_HEADS):                                   # static head loop
        sl = slice(h * D_KV, (h + 1) * D_KV)
        qh = qb[:, sl].reshape(B, Tq, D_KV)
        kh = kb[:, sl].reshape(B, Tk, D_KV)
        vh = vb[:, sl].reshape(B, Tk, D_KV)
        # T5 attention has NO 1/sqrt(d_kv) scaling.
        s = jnp.einsum('bqd,bkd->bqk', qh, kh,
                       preferred_element_type=jnp.float32)     # (B, Tq, Tk)
        if rel is not None:
            s = s + rel[h][None]                               # shared over batch
        s = s + mask3
        p = _softmax_last(s)
        oh = jnp.einsum('bqk,bkd->bqd', p.astype(jnp.bfloat16), vh,
                        preferred_element_type=jnp.float32)    # (B, Tq, d_kv)
        contrib = jnp.dot(oh.reshape(B * Tq, D_KV).astype(jnp.bfloat16),
                          wo[sl, :], preferred_element_type=jnp.float32)
        out = contrib if out is None else out + contrib
    return out                                                 # (B*Tq, D_MODEL)


# -------------------- single fused whole-forward kernel -----------------------
def _t5_fused_kernel(enc_emb_ref, dec_emb_ref, enc_mask_ref, dec_mask_ref,
                     enc_rel_ref, dec_rel_ref, labels_ref, ln_ref,
                     e_wqkv_ref, e_wo_ref, e_wi_ref, e_wff_ref,
                     d_sa_wqkv_ref, d_sa_wo_ref,
                     d_ca_wq_ref, d_ca_wkv_ref, d_ca_wo_ref,
                     d_wi_ref, d_wff_ref, lm_w_ref,
                     logits_ref, loss_ref):
    B, Te, D = enc_emb_ref.shape
    Td = dec_emb_ref.shape[1]
    ln = ln_ref[...]                                           # (8, D) f32

    def row(i):
        return ln[i:i + 1, :]                                  # (1, D)

    # ---------------- encoder: RMS -> fused QKV -> MHA -> Wo -> residual ------
    h = enc_emb_ref[...].reshape(B * Te, D)                    # f32 residual stream
    x = _rms(h, row(LN_ENC_SA))
    qkv = jnp.dot(x.astype(jnp.bfloat16), e_wqkv_ref[...],
                  preferred_element_type=jnp.float32)          # (B*Te, 3*HD)
    h = h + _mha(qkv[:, :HD], qkv[:, HD:2 * HD], qkv[:, 2 * HD:],
                 enc_mask_ref[...], enc_rel_ref[...], e_wo_ref[...], B, Te, Te)

    # ---------------- encoder FF (+ fused encoder final LN) -------------------
    x = _rms(h, row(LN_ENC_FF))
    mid = jnp.maximum(jnp.dot(x.astype(jnp.bfloat16), e_wi_ref[...],
                              preferred_element_type=jnp.float32), 0.0)
    h = h + jnp.dot(mid.astype(jnp.bfloat16), e_wff_ref[...],
                    preferred_element_type=jnp.float32)
    enc_out = _rms(h, row(LN_ENC_FINAL))                       # encoder output
    enc_out_bf = enc_out.astype(jnp.bfloat16)

    # ---------------- decoder self-attention (causal folded into dec_rel) -----
    g = dec_emb_ref[...].reshape(B * Td, D)
    x = _rms(g, row(LN_DEC_SA))
    qkv = jnp.dot(x.astype(jnp.bfloat16), d_sa_wqkv_ref[...],
                  preferred_element_type=jnp.float32)
    g = g + _mha(qkv[:, :HD], qkv[:, HD:2 * HD], qkv[:, 2 * HD:],
                 dec_mask_ref[...], dec_rel_ref[...], d_sa_wo_ref[...], B, Td, Td)

    # ---------------- decoder cross-attention (K/V from encoder, no rel bias) -
    x = _rms(g, row(LN_DEC_CA))
    q = jnp.dot(x.astype(jnp.bfloat16), d_ca_wq_ref[...],
                preferred_element_type=jnp.float32)            # (B*Td, HD)
    kv = jnp.dot(enc_out_bf, d_ca_wkv_ref[...],
                 preferred_element_type=jnp.float32)           # (B*Te, 2*HD)
    g = g + _mha(q, kv[:, :HD], kv[:, HD:],
                 enc_mask_ref[...], None, d_ca_wo_ref[...], B, Td, Te)

    # ---------------- decoder FF ----------------------------------------------
    x = _rms(g, row(LN_DEC_FF))
    mid = jnp.maximum(jnp.dot(x.astype(jnp.bfloat16), d_wi_ref[...],
                              preferred_element_type=jnp.float32), 0.0)
    g = g + jnp.dot(mid.astype(jnp.bfloat16), d_wff_ref[...],
                    preferred_element_type=jnp.float32)

    # --------- final LN + tied-embedding rescale + LM head (lane-dense) -------
    x = _rms(g, row(LN_DEC_FINAL)) * (D_MODEL ** -0.5)
    logits = jnp.dot(x.astype(jnp.bfloat16), lm_w_ref[...],
                     preferred_element_type=jnp.float32)       # (B*Td, VOCAB)
    logits3 = logits.reshape(B, Td, VOCAB)
    logits_ref[...] = logits3

    # --------- cross-entropy, ignore_index = -100, mean over valid tokens -----
    lbl = labels_ref[...][:, :, None]                          # (B, Td, 1) int32
    m = jnp.max(logits3, axis=-1, keepdims=True)
    lse = m + jnp.log(jnp.sum(jnp.exp(logits3 - m), axis=-1, keepdims=True))
    vid = jax.lax.broadcasted_iota(jnp.int32, logits3.shape, 2)
    tgt = jnp.sum(jnp.where(vid == lbl, logits3, 0.0), axis=-1, keepdims=True)
    valid = (lbl != -100).astype(jnp.float32)
    per_tok = ((lse - tgt) * valid).reshape(B * Td, 1)
    loss_sum = jnp.sum(per_tok, axis=0, keepdims=True)         # (1, 1)
    cnt = jnp.sum(valid.reshape(B * Td, 1), axis=0, keepdims=True)
    loss_ref[...] = loss_sum / cnt


def t5_fused_call(params, enc_emb, dec_emb, enc_mask_add, dec_mask_add,
                  enc_rel, dec_rel, labels):
    B, Td, _ = dec_emb.shape
    # Single invocation, no grid: every operand is a whole-array VMEM block.
    logits, loss = pl.pallas_call(
        _t5_fused_kernel,
        out_shape=(jax.ShapeDtypeStruct((B, Td, VOCAB), jnp.float32),
                   jax.ShapeDtypeStruct((1, 1), jnp.float32)),
    )(enc_emb, dec_emb, enc_mask_add, dec_mask_add, enc_rel, dec_rel,
      labels, params["ln_pack"],
      params["enc"]["wqkv"], params["enc"]["wo"],
      params["enc"]["wi"], params["enc"]["wff"],
      params["dec"]["self_wqkv"], params["dec"]["self_wo"],
      params["dec"]["cross_wq"], params["dec"]["cross_wkv"],
      params["dec"]["cross_wo"],
      params["dec"]["wi"], params["dec"]["wff"],
      params["lm_head"])
    return logits, loss


# --------------------- relative position bias (hoisted) -----------------------
@functools.lru_cache(maxsize=None)
def _relative_buckets(q_len, k_len, bidirectional,
                      num_buckets=REL_BUCKETS, max_distance=REL_MAX_DIST):
    ctx = np.arange(q_len)[:, None]
    mem = np.arange(k_len)[None, :]
    rel = mem - ctx
    ret = np.zeros_like(rel)
    n = num_buckets
    if bidirectional:
        n //= 2
        ret = ret + (rel > 0).astype(np.int64) * n
        rel = np.abs(rel)
    else:
        rel = -np.minimum(rel, 0)
    max_exact = n // 2
    is_small = rel < max_exact
    rel_large = max_exact + (
        np.log(np.maximum(rel, 1).astype(np.float64) / max_exact)
        / math.log(max_distance / max_exact) * (n - max_exact)
    ).astype(np.int64)
    rel_large = np.minimum(rel_large, n - 1)
    return jnp.asarray(ret + np.where(is_small, rel, rel_large), dtype=jnp.int32)


@functools.lru_cache(maxsize=None)
def _causal_additive(t):
    qi = np.arange(t)[:, None]
    ki = np.arange(t)[None, :]
    return jnp.asarray(np.where(ki <= qi, 0.0, NEG_INF), dtype=jnp.float32)


def position_bias(table, q_len, k_len, bidirectional):
    buckets = _relative_buckets(q_len, k_len, bidirectional)   # trace-time constant
    return jnp.take(table.T, buckets, axis=1)                  # [H, q, k]


# ------------------------------ JAX glue (T5) ---------------------------------
def additive_mask(mask):
    return (1.0 - mask.astype(jnp.float32)) * NEG_INF          # [B, T] additive


def shift_right(labels):
    # decoder_start_token_id == pad_token_id == 0 (T5 default)
    B = labels.shape[0]
    shifted = jnp.concatenate(
        [jnp.zeros((B, 1), labels.dtype), labels[:, :-1]], axis=1)
    return jnp.where(shifted == -100, 0, shifted)


def t5_forward(params, input_ids, attention_mask=None, decoder_input_ids=None,
               decoder_attention_mask=None, labels=None):
    if attention_mask is None:
        attention_mask = jnp.ones_like(input_ids)
    if decoder_input_ids is None and labels is not None:
        decoder_input_ids = shift_right(labels)
    if decoder_attention_mask is None:
        decoder_attention_mask = jnp.ones_like(decoder_input_ids)

    Te = input_ids.shape[1]
    B, Td = decoder_input_ids.shape

    enc_emb = params["shared"][input_ids]                      # embedding gather (XLA)
    dec_emb = params["shared"][decoder_input_ids]

    enc_mask_add = additive_mask(attention_mask)               # (B, Te)
    dec_mask_add = additive_mask(decoder_attention_mask)       # (B, Td)

    enc_rel = position_bias(params["enc"]["rel_table"], Te, Te, True)   # (H,Te,Te)
    dec_rel = position_bias(params["dec"]["rel_table"], Td, Td, False)  # (H,Td,Td)
    dec_rel = dec_rel + _causal_additive(Td)[None]             # fold causal mask

    lbl = (labels if labels is not None
           else jnp.zeros((B, Td), jnp.int32)).astype(jnp.int32)

    logits, loss = t5_fused_call(params, enc_emb, dec_emb, enc_mask_add,
                                 dec_mask_add, enc_rel, dec_rel, lbl)
    loss_scalar = loss[0, 0]
    if labels is None:
        loss_scalar = None
    return loss_scalar, logits


# ------------------------------ parameter init --------------------------------
def init_params(key):
    keys = iter(jax.random.split(key, 24))

    def nrm(shape, scale, dtype=jnp.float32):
        return (jax.random.normal(next(keys), shape, jnp.float32) * scale
                ).astype(dtype)

    shared = nrm((VOCAB, D_MODEL), 1.0)
    return {
        "shared": shared,
        "lm_head": shared.T.astype(jnp.bfloat16),   # tied embeddings, pre-transposed
        # packed RMSNorm weights: rows = [enc_sa, enc_ff, enc_final,
        #                                 dec_sa, dec_ca, dec_ff, dec_final, pad]
        "ln_pack": jnp.ones((8, D_MODEL), jnp.float32),
        "enc": {
            "rel_table": nrm((REL_BUCKETS, N_HEADS), 0.05),
            "wqkv": nrm((D_MODEL, 3 * HD), 0.05, jnp.bfloat16),   # fused Q|K|V
            "wo":   nrm((HD, D_MODEL), 0.05, jnp.bfloat16),
            "wi":   nrm((D_MODEL, D_FF), 0.05, jnp.bfloat16),
            "wff":  nrm((D_FF, D_MODEL), 0.05, jnp.bfloat16),
        },
        "dec": {
            "rel_table": nrm((REL_BUCKETS, N_HEADS), 0.05),
            "self_wqkv": nrm((D_MODEL, 3 * HD), 0.05, jnp.bfloat16),
            "self_wo":   nrm((HD, D_MODEL), 0.05, jnp.bfloat16),
            "cross_wq":  nrm((D_MODEL, HD), 0.05, jnp.bfloat16),
            "cross_wkv": nrm((D_MODEL, 2 * HD), 0.05, jnp.bfloat16),  # fused K|V
            "cross_wo":  nrm((HD, D_MODEL), 0.05, jnp.bfloat16),
            "wi":  nrm((D_MODEL, D_FF), 0.05, jnp.bfloat16),
            "wff": nrm((D_FF, D_MODEL), 0.05, jnp.bfloat16),
        },
    }


# ----------------------------------- main --------------------------------------
if __name__ == "__main__":
    key = jax.random.PRNGKey(0)
    pkey, k1, k2 = jax.random.split(key, 3)
    params = init_params(pkey)

    B, T_ENC, T_DEC = 2, 8, 8
    input_ids = jax.random.randint(k1, (B, T_ENC), 1, VOCAB, dtype=jnp.int32)
    attention_mask = jnp.ones((B, T_ENC), jnp.int32).at[1, 6:].set(0)
    labels = jax.random.randint(k2, (B, T_DEC), 1, VOCAB, dtype=jnp.int32)
    labels = labels.at[1, 6:].set(-100)                 # ignored positions
    decoder_attention_mask = jnp.ones((B, T_DEC), jnp.int32).at[1, 6:].set(0)

    fwd = jax.jit(t5_forward)
    loss, logits = fwd(
        params,
        input_ids,
        attention_mask=attention_mask,
        decoder_attention_mask=decoder_attention_mask,
        labels=labels,
    )
    jax.block_until_ready((loss, logits))
    assert logits.shape == (B, T_DEC, VOCAB)
    assert bool(jnp.isfinite(loss))
    assert bool(jnp.all(jnp.isfinite(logits)))
    print("KERNEL_OK")
</pallas_src>

<mosaic_0001>
module attributes {stable_mosaic.version = 11 : i64} {
  func.func @_t5_fused_kernel(%arg0: memref<2x8x32xf32, #tpu.memory_space<vmem>>, %arg1: memref<2x8x32xf32, #tpu.memory_space<vmem>>, %arg2: memref<2x8xf32, #tpu.memory_space<vmem>>, %arg3: memref<2x8xf32, #tpu.memory_space<vmem>>, %arg4: memref<4x8x8xf32, #tpu.memory_space<vmem>>, %arg5: memref<4x8x8xf32, #tpu.memory_space<vmem>>, %arg6: memref<2x8xi32, #tpu.memory_space<vmem>>, %arg7: memref<8x32xf32, #tpu.memory_space<vmem>>, %arg8: memref<32x96xbf16, #tpu.memory_space<vmem>>, %arg9: memref<32x32xbf16, #tpu.memory_space<vmem>>, %arg10: memref<32x64xbf16, #tpu.memory_space<vmem>>, %arg11: memref<64x32xbf16, #tpu.memory_space<vmem>>, %arg12: memref<32x96xbf16, #tpu.memory_space<vmem>>, %arg13: memref<32x32xbf16, #tpu.memory_space<vmem>>, %arg14: memref<32x32xbf16, #tpu.memory_space<vmem>>, %arg15: memref<32x64xbf16, #tpu.memory_space<vmem>>, %arg16: memref<32x32xbf16, #tpu.memory_space<vmem>>, %arg17: memref<32x64xbf16, #tpu.memory_space<vmem>>, %arg18: memref<64x32xbf16, #tpu.memory_space<vmem>>, %arg19: memref<32x128xbf16, #tpu.memory_space<vmem>>, %arg20: memref<2x8x128xf32, #tpu.memory_space<vmem>>, %arg21: memref<1x1xf32, #tpu.memory_space<vmem>>) attributes {dimension_semantics = [], scalar_prefetch = 0 : i64, scratch_operands = 0 : i64, tpu.core_type = #tpu.core_type<tc>} {
    %c0 = arith.constant 0 : index
    %c0_0 = arith.constant 0 : index
    %0 = vector.load %arg7[%c0, %c0_0] : memref<8x32xf32, #tpu.memory_space<vmem>>, vector<8x32xf32>
    %c0_1 = arith.constant 0 : index
    %c0_2 = arith.constant 0 : index
    %c0_3 = arith.constant 0 : index
    %1 = vector.load %arg0[%c0_1, %c0_2, %c0_3] : memref<2x8x32xf32, #tpu.memory_space<vmem>>, vector<2x8x32xf32>
    %2 = vector.shape_cast %1 : vector<2x8x32xf32> to vector<16x32xf32>
    %3 = vector.extract_strided_slice %0 {offsets = [0, 0], sizes = [1, 32], strides = [1, 1]} : vector<8x32xf32> to vector<1x32xf32>
    %4 = arith.mulf %2, %2 : vector<16x32xf32>
    %cst = arith.constant dense<0.000000e+00> : vector<16xf32>
    %5 = vector.multi_reduction <add>, %4, %cst [1] : vector<16x32xf32> to vector<16xf32>
    %6 = vector.shape_cast %5 : vector<16xf32> to vector<16x1xf32>
    %cst_4 = arith.constant 3.200000e+01 : f32
    %7 = vector.broadcast %cst_4 : f32 to vector<16x1xf32>
    %8 = arith.divf %6, %7 : vector<16x1xf32>
    %cst_5 = arith.constant 9.99999997E-7 : f32
    %9 = vector.broadcast %cst_5 : f32 to vector<16x1xf32>
    %10 = arith.addf %8, %9 : vector<16x1xf32>
    %11 = math.rsqrt %10 : vector<16x1xf32>
    %12 = vector.broadcast %11 : vector<16x1xf32> to vector<16x32xf32>
    %13 = arith.mulf %2, %12 : vector<16x32xf32>
    %14 = vector.broadcast %3 : vector<1x32xf32> to vector<16x32xf32>
    %15 = arith.mulf %13, %14 : vector<16x32xf32>
    %16 = arith.truncf %15 : vector<16x32xf32> to vector<16x32xbf16>
    %c0_6 = arith.constant 0 : index
    %c0_7 = arith.constant 0 : index
    %17 = vector.load %arg8[%c0_6, %c0_7] : memref<32x96xbf16, #tpu.memory_space<vmem>>, vector<32x96xbf16>
    %cst_8 = arith.constant dense<0.000000e+00> : vector<16x96xf32>
    %18 = tpu.matmul %16, %17, %cst_8 {dimension_numbers = #tpu.dot_dimension_numbers<[1], [0], [0], [1], [0, 0, 1, 1], [], []>} : vector<16x32xbf16>, vector<32x96xbf16>, vector<16x96xf32> -> vector<16x96xf32>
    %19 = vector.extract_strided_slice %18 {offsets = [0, 0], sizes = [16, 32], strides = [1, 1]} : vector<16x96xf32> to vector<16x32xf32>
    %20 = vector.extract_strided_slice %18 {offsets = [0, 32], sizes = [16, 32], strides = [1, 1]} : vector<16x96xf32> to vector<16x32xf32>
    %21 = vector.extract_strided_slice %18 {offsets = [0, 64], sizes = [16, 32], strides = [1, 1]} : vector<16x96xf32> to vector<16x32xf32>
    %c0_9 = arith.constant 0 : index
    %c0_10 = arith.constant 0 : index
    %22 = vector.load %arg2[%c0_9, %c0_10] : memref<2x8xf32, #tpu.memory_space<vmem>>, vector<2x8xf32>
    %c0_11 = arith.constant 0 : index
    %c0_12 = arith.constant 0 : index
    %c0_13 = arith.constant 0 : index
    %23 = vector.load %arg4[%c0_11, %c0_12, %c0_13] : memref<4x8x8xf32, #tpu.memory_space<vmem>>, vector<4x8x8xf32>
    %c0_14 = arith.constant 0 : index
    %c0_15 = arith.constant 0 : index
    %24 = vector.load %arg9[%c0_14, %c0_15] : memref<32x32xbf16, #tpu.memory_space<vmem>>, vector<32x32xbf16>
    %25 = arith.truncf %19 : vector<16x32xf32> to vector<16x32xbf16>
    %26 = arith.truncf %20 : vector<16x32xf32> to vector<16x32xbf16>
    %27 = arith.truncf %21 : vector<16x32xf32> to vector<16x32xbf16>
    %28 = vector.shape_cast %22 : vector<2x8xf32> to vector<2x1x8xf32>
    %29 = vector.extract_strided_slice %25 {offsets = [0, 0], sizes = [16, 8], strides = [1, 1]} : vector<16x32xbf16> to vector<16x8xbf16>
    %30 = vector.shape_cast %29 : vector<16x8xbf16> to vector<2x8x8xbf16>
    %31 = vector.extract_strided_slice %26 {offsets = [0, 0], sizes = [16, 8], strides = [1, 1]} : vector<16x32xbf16> to vector<16x8xbf16>
    %32 = vector.shape_cast %31 : vector<16x8xbf16> to vector<2x8x8xbf16>
    %33 = vector.extract_strided_slice %27 {offsets = [0, 0], sizes = [16, 8], strides = [1, 1]} : vector<16x32xbf16> to vector<16x8xbf16>
    %34 = vector.shape_cast %33 : vector<16x8xbf16> to vector<2x8x8xbf16>
    "tpu.trace_start"() <{level = 10 : i32, message = "bqd,bkd->bqk"}> : () -> ()
    %cst_16 = arith.constant dense<0.000000e+00> : vector<2x8x8xf32>
    %35 = tpu.matmul %30, %32, %cst_16 {dimension_numbers = #tpu.dot_dimension_numbers<[2], [2], [1], [1], [0, 0, 0, 1, 1, 1], [0], [0]>} : vector<2x8x8xbf16>, vector<2x8x8xbf16>, vector<2x8x8xf32> -> vector<2x8x8xf32>
    "tpu.trace_stop"() : () -> ()
    %36 = vector.extract_strided_slice %23 {offsets = [0, 0, 0], sizes = [1, 8, 8], strides = [1, 1, 1]} : vector<4x8x8xf32> to vector<1x8x8xf32>
    %37 = vector.shape_cast %36 : vector<1x8x8xf32> to vector<8x8xf32>
    %38 = vector.shape_cast %37 : vector<8x8xf32> to vector<1x8x8xf32>
    %39 = vector.broadcast %38 : vector<1x8x8xf32> to vector<2x8x8xf32>
    %40 = arith.addf %35, %39 : vector<2x8x8xf32>
    %41 = vector.broadcast %28 : vector<2x1x8xf32> to vector<2x8x8xf32>
    %42 = arith.addf %40, %41 : vector<2x8x8xf32>
    %cst_17 = arith.constant dense<0xFF800000> : vector<2x8xf32>
    %43 = vector.multi_reduction <maximumf>, %42, %cst_17 [2] : vector<2x8x8xf32> to vector<2x8xf32>
    %44 = vector.shape_cast %43 : vector<2x8xf32> to vector<2x8x1xf32>
    %45 = vector.broadcast %44 : vector<2x8x1xf32> to vector<2x8x8xf32>
    %46 = arith.subf %42, %45 : vector<2x8x8xf32>
    %47 = math.exp %46 : vector<2x8x8xf32>
    %cst_18 = arith.constant dense<0.000000e+00> : vector<2x8xf32>
    %48 = vector.multi_reduction <add>, %47, %cst_18 [2] : vector<2x8x8xf32> to vector<2x8xf32>
    %49 = vector.shape_cast %48 : vector<2x8xf32> to vector<2x8x1xf32>
    %50 = tpu.reciprocal %49 {approx = true} : vector<2x8x1xf32> -> vector<2x8x1xf32>
    %51 = vector.broadcast %50 : vector<2x8x1xf32> to vector<2x8x8xf32>
    %52 = arith.mulf %47, %51 : vector<2x8x8xf32>
    %53 = arith.truncf %52 : vector<2x8x8xf32> to vector<2x8x8xbf16>
    "tpu.trace_start"() <{level = 10 : i32, message = "bqk,bkd->bqd"}> : () -> ()
    %cst_19 = arith.constant dense<0.000000e+00> : vector<2x8x8xf32>
    %54 = tpu.matmul %53, %34, %cst_19 {dimension_numbers = #tpu.dot_dimension_numbers<[2], [1], [1], [2], [0, 0, 0, 1, 1, 2], [0], [0]>} : vector<2x8x8xbf16>, vector<2x8x8xbf16>, vector<2x8x8xf32> -> vector<2x8x8xf32>
    "tpu.trace_stop"() : () -> ()
    %55 = vector.shape_cast %54 : vector<2x8x8xf32> to vector<16x8xf32>
    %56 = arith.truncf %55 : vector<16x8xf32> to vector<16x8xbf16>
    %57 = vector.extract_strided_slice %24 {offsets = [0, 0], sizes = [8, 32], strides = [1, 1]} : vector<32x32xbf16> to vector<8x32xbf16>
    %cst_20 = arith.constant dense<0.000000e+00> : vector<16x32xf32>
    %58 = tpu.matmul %56, %57, %cst_20 {dimension_numbers = #tpu.dot_dimension_numbers<[1], [0], [0], [1], [0, 0, 1, 1], [], []>} : vector<16x8xbf16>, vector<8x32xbf16>, vector<16x32xf32> -> vector<16x32xf32>
    %59 = vector.extract_strided_slice %25 {offsets = [0, 8], sizes = [16, 8], strides = [1, 1]} : vector<16x32xbf16> to vector<16x8xbf16>
    %60 = vector.shape_cast %59 : vector<16x8xbf16> to vector<2x8x8xbf16>
    %61 = vector.extract_strided_slice %26 {offsets = [0, 8], sizes = [16, 8], strides = [1, 1]} : vector<16x32xbf16> to vector<16x8xbf16>
    %62 = vector.shape_cast %61 : vector<16x8xbf16> to vector<2x8x8xbf16>
    %63 = vector.extract_strided_slice %27 {offsets = [0, 8], sizes = [16, 8], strides = [1, 1]} : vector<16x32xbf16> to vector<16x8xbf16>
    %64 = vector.shape_cast %63 : vector<16x8xbf16> to vector<2x8x8xbf16>
    "tpu.trace_start"() <{level = 10 : i32, message = "bqd,bkd->bqk"}> : () -> ()
    %cst_21 = arith.constant dense<0.000000e+00> : vector<2x8x8xf32>
    %65 = tpu.matmul %60, %62, %cst_21 {dimension_numbers = #tpu.dot_dimension_numbers<[2], [2], [1], [1], [0, 0, 0, 1, 1, 1], [0], [0]>} : vector<2x8x8xbf16>, vector<2x8x8xbf16>, vector<2x8x8xf32> -> vector<2x8x8xf32>
    "tpu.trace_stop"() : () -> ()
    %66 = vector.extract_strided_slice %23 {offsets = [1, 0, 0], sizes = [1, 8, 8], strides = [1, 1, 1]} : vector<4x8x8xf32> to vector<1x8x8xf32>
    %67 = vector.shape_cast %66 : vector<1x8x8xf32> to vector<8x8xf32>
    %68 = vector.shape_cast %67 : vector<8x8xf32> to vector<1x8x8xf32>
    %69 = vector.broadcast %68 : vector<1x8x8xf32> to vector<2x8x8xf32>
    %70 = arith.addf %65, %69 : vector<2x8x8xf32>
    %71 = vector.broadcast %28 : vector<2x1x8xf32> to vector<2x8x8xf32>
    %72 = arith.addf %70, %71 : vector<2x8x8xf32>
    %cst_22 = arith.constant dense<0xFF800000> : vector<2x8xf32>
    %73 = vector.multi_reduction <maximumf>, %72, %cst_22 [2] : vector<2x8x8xf32> to vector<2x8xf32>
    %74 = vector.shape_cast %73 : vector<2x8xf32> to vector<2x8x1xf32>
    %75 = vector.broadcast %74 : vector<2x8x1xf32> to vector<2x8x8xf32>
    %76 = arith.subf %72, %75 : vector<2x8x8xf32>
    %77 = math.exp %76 : vector<2x8x8xf32>
    %cst_23 = arith.constant dense<0.000000e+00> : vector<2x8xf32>
    %78 = vector.multi_reduction <add>, %77, %cst_23 [2] : vector<2x8x8xf32> to vector<2x8xf32>
    %79 = vector.shape_cast %78 : vector<2x8xf32> to vector<2x8x1xf32>
    %80 = tpu.reciprocal %79 {approx = true} : vector<2x8x1xf32> -> vector<2x8x1xf32>
    %81 = vector.broadcast %80 : vector<2x8x1xf32> to vector<2x8x8xf32>
    %82 = arith.mulf %77, %81 : vector<2x8x8xf32>
    %83 = arith.truncf %82 : vector<2x8x8xf32> to vector<2x8x8xbf16>
    "tpu.trace_start"() <{level = 10 : i32, message = "bqk,bkd->bqd"}> : () -> ()
    %cst_24 = arith.constant dense<0.000000e+00> : vector<2x8x8xf32>
    %84 = tpu.matmul %83, %64, %cst_24 {dimension_numbers = #tpu.dot_dimension_numbers<[2], [1], [1], [2], [0, 0, 0, 1, 1, 2], [0], [0]>} : vector<2x8x8xbf16>, vector<2x8x8xbf16>, vector<2x8x8xf32> -> vector<2x8x8xf32>
    "tpu.trace_stop"() : () -> ()
    %85 = vector.shape_cast %84 : vector<2x8x8xf32> to vector<16x8xf32>
    %86 = arith.truncf %85 : vector<16x8xf32> to vector<16x8xbf16>
    %87 = vector.extract_strided_slice %24 {offsets = [8, 0], sizes = [8, 32], strides = [1, 1]} : vector<32x32xbf16> to vector<8x32xbf16>
    %cst_25 = arith.constant dense<0.000000e+00> : vector<16x32xf32>
    %88 = tpu.matmul %86, %87, %cst_25 {dimension_numbers = #tpu.dot_dimension_numbers<[1], [0], [0], [1], [0, 0, 1, 1], [], []>} : vector<16x8xbf16>, vector<8x32xbf16>, vector<16x32xf32> -> vector<16x32xf32>
    %89 = arith.addf %58, %88 : vector<16x32xf32>
    %90 = vector.extract_strided_slice %25 {offsets = [0, 16], sizes = [16, 8], strides = [1, 1]} : vector<16x32xbf16> to vector<16x8xbf16>
    %91 = vector.shape_cast %90 : vector<16x8xbf16> to vector<2x8x8xbf16>
    %92 = vector.extract_strided_slice %26 {offsets = [0, 16], sizes = [16, 8], strides = [1, 1]} : vector<16x32xbf16> to vector<16x8xbf16>
    %93 = vector.shape_cast %92 : vector<16x8xbf16> to vector<2x8x8xbf16>
    %94 = vector.extract_strided_slice %27 {offsets = [0, 16], sizes = [16, 8], strides = [1, 1]} : vector<16x32xbf16> to vector<16x8xbf16>
    %95 = vector.shape_cast %94 : vector<16x8xbf16> to vector<2x8x8xbf16>
    "tpu.trace_start"() <{level = 10 : i32, message = "bqd,bkd->bqk"}> : () -> ()
    %cst_26 = arith.constant dense<0.000000e+00> : vector<2x8x8xf32>
    %96 = tpu.matmul %91, %93, %cst_26 {dimension_numbers = #tpu.dot_dimension_numbers<[2], [2], [1], [1], [0, 0, 0, 1, 1, 1], [0], [0]>} : vector<2x8x8xbf16>, vector<2x8x8xbf16>, vector<2x8x8xf32> -> vector<2x8x8xf32>
    "tpu.trace_stop"() : () -> ()
    %97 = vector.extract_strided_slice %23 {offsets = [2, 0, 0], sizes = [1, 8, 8], strides = [1, 1, 1]} : vector<4x8x8xf32> to vector<1x8x8xf32>
    %98 = vector.shape_cast %97 : vector<1x8x8xf32> to vector<8x8xf32>
    %99 = vector.shape_cast %98 : vector<8x8xf32> to vector<1x8x8xf32>
    %100 = vector.broadcast %99 : vector<1x8x8xf32> to vector<2x8x8xf32>
    %101 = arith.addf %96, %100 : vector<2x8x8xf32>
    %102 = vector.broadcast %28 : vector<2x1x8xf32> to vector<2x8x8xf32>
    %103 = arith.addf %101, %102 : vector<2x8x8xf32>
    %cst_27 = arith.constant dense<0xFF800000> : vector<2x8xf32>
    %104 = vector.multi_reduction <maximumf>, %103, %cst_27 [2] : vector<2x8x8xf32> to vector<2x8xf32>
    %105 = vector.shape_cast %104 : vector<2x8xf32> to vector<2x8x1xf32>
    %106 = vector.broadcast %105 : vector<2x8x1xf32> to vector<2x8x8xf32>
    %107 = arith.subf %103, %106 : vector<2x8x8xf32>
    %108 = math.exp %107 : vector<2x8x8xf32>
    %cst_28 = arith.constant dense<0.000000e+00> : vector<2x8xf32>
    %109 = vector.multi_reduction <add>, %108, %cst_28 [2] : vector<2x8x8xf32> to vector<2x8xf32>
    %110 = vector.shape_cast %109 : vector<2x8xf32> to vector<2x8x1xf32>
    %111 = tpu.reciprocal %110 {approx = true} : vector<2x8x1xf32> -> vector<2x8x1xf32>
    %112 = vector.broadcast %111 : vector<2x8x1xf32> to vector<2x8x8xf32>
    %113 = arith.mulf %108, %112 : vector<2x8x8xf32>
    %114 = arith.truncf %113 : vector<2x8x8xf32> to vector<2x8x8xbf16>
    "tpu.trace_start"() <{level = 10 : i32, message = "bqk,bkd->bqd"}> : () -> ()
    %cst_29 = arith.constant dense<0.000000e+00> : vector<2x8x8xf32>
    %115 = tpu.matmul %114, %95, %cst_29 {dimension_numbers = #tpu.dot_dimension_numbers<[2], [1], [1], [2], [0, 0, 0, 1, 1, 2], [0], [0]>} : vector<2x8x8xbf16>, vector<2x8x8xbf16>, vector<2x8x8xf32> -> vector<2x8x8xf32>
    "tpu.trace_stop"() : () -> ()
    %116 = vector.shape_cast %115 : vector<2x8x8xf32> to vector<16x8xf32>
    %117 = arith.truncf %116 : vector<16x8xf32> to vector<16x8xbf16>
    %118 = vector.extract_strided_slice %24 {offsets = [16, 0], sizes = [8, 32], strides = [1, 1]} : vector<32x32xbf16> to vector<8x32xbf16>
    %cst_30 = arith.constant dense<0.000000e+00> : vector<16x32xf32>
    %119 = tpu.matmul %117, %118, %cst_30 {dimension_numbers = #tpu.dot_dimension_numbers<[1], [0], [0], [1], [0, 0, 1, 1], [], []>} : vector<16x8xbf16>, vector<8x32xbf16>, vector<16x32xf32> -> vector<16x32xf32>
    %120 = arith.addf %89, %119 : vector<16x32xf32>
    %121 = vector.extract_strided_slice %25 {offsets = [0, 24], sizes = [16, 8], strides = [1, 1]} : vector<16x32xbf16> to vector<16x8xbf16>
    %122 = vector.shape_cast %121 : vector<16x8xbf16> to vector<2x8x8xbf16>
    %123 = vector.extract_strided_slice %26 {offsets = [0, 24], sizes = [16, 8], strides = [1, 1]} : vector<16x32xbf16> to vector<16x8xbf16>
    %124 = vector.shape_cast %123 : vector<16x8xbf16> to vector<2x8x8xbf16>
    %125 = vector.extract_strided_slice %27 {offsets = [0, 24], sizes = [16, 8], strides = [1, 1]} : vector<16x32xbf16> to vector<16x8xbf16>
    %126 = vector.shape_cast %125 : vector<16x8xbf16> to vector<2x8x8xbf16>
    "tpu.trace_start"() <{level = 10 : i32, message = "bqd,bkd->bqk"}> : () -> ()
    %cst_31 = arith.constant dense<0.000000e+00> : vector<2x8x8xf32>
    %127 = tpu.matmul %122, %124, %cst_31 {dimension_numbers = #tpu.dot_dimension_numbers<[2], [2], [1], [1], [0, 0, 0, 1, 1, 1], [0], [0]>} : vector<2x8x8xbf16>, vector<2x8x8xbf16>, vector<2x8x8xf32> -> vector<2x8x8xf32>
    "tpu.trace_stop"() : () -> ()
    %128 = vector.extract_strided_slice %23 {offsets = [3, 0, 0], sizes = [1, 8, 8], strides = [1, 1, 1]} : vector<4x8x8xf32> to vector<1x8x8xf32>
    %129 = vector.shape_cast %128 : vector<1x8x8xf32> to vector<8x8xf32>
    %130 = vector.shape_cast %129 : vector<8x8xf32> to vector<1x8x8xf32>
    %131 = vector.broadcast %130 : vector<1x8x8xf32> to vector<2x8x8xf32>
    %132 = arith.addf %127, %131 : vector<2x8x8xf32>
    %133 = vector.broadcast %28 : vector<2x1x8xf32> to vector<2x8x8xf32>
    %134 = arith.addf %132, %133 : vector<2x8x8xf32>
    %cst_32 = arith.constant dense<0xFF800000> : vector<2x8xf32>
    %135 = vector.multi_reduction <maximumf>, %134, %cst_32 [2] : vector<2x8x8xf32> to vector<2x8xf32>
    %136 = vector.shape_cast %135 : vector<2x8xf32> to vector<2x8x1xf32>
    %137 = vector.broadcast %136 : vector<2x8x1xf32> to vector<2x8x8xf32>
    %138 = arith.subf %134, %137 : vector<2x8x8xf32>
    %139 = math.exp %138 : vector<2x8x8xf32>
    %cst_33 = arith.constant dense<0.000000e+00> : vector<2x8xf32>
    %140 = vector.multi_reduction <add>, %139, %cst_33 [2] : vector<2x8x8xf32> to vector<2x8xf32>
    %141 = vector.shape_cast %140 : vector<2x8xf32> to vector<2x8x1xf32>
    %142 = tpu.reciprocal %141 {approx = true} : vector<2x8x1xf32> -> vector<2x8x1xf32>
    %143 = vector.broadcast %142 : vector<2x8x1xf32> to vector<2x8x8xf32>
    %144 = arith.mulf %139, %143 : vector<2x8x8xf32>
    %145 = arith.truncf %144 : vector<2x8x8xf32> to vector<2x8x8xbf16>
    "tpu.trace_start"() <{level = 10 : i32, message = "bqk,bkd->bqd"}> : () -> ()
    %cst_34 = arith.constant dense<0.000000e+00> : vector<2x8x8xf32>
    %146 = tpu.matmul %145, %126, %cst_34 {dimension_numbers = #tpu.dot_dimension_numbers<[2], [1], [1], [2], [0, 0, 0, 1, 1, 2], [0], [0]>} : vector<2x8x8xbf16>, vector<2x8x8xbf16>, vector<2x8x8xf32> -> vector<2x8x8xf32>
    "tpu.trace_stop"() : () -> ()
    %147 = vector.shape_cast %146 : vector<2x8x8xf32> to vector<16x8xf32>
    %148 = arith.truncf %147 : vector<16x8xf32> to vector<16x8xbf16>
    %149 = vector.extract_strided_slice %24 {offsets = [24, 0], sizes = [8, 32], strides = [1, 1]} : vector<32x32xbf16> to vector<8x32xbf16>
    %cst_35 = arith.constant dense<0.000000e+00> : vector<16x32xf32>
    %150 = tpu.matmul %148, %149, %cst_35 {dimension_numbers = #tpu.dot_dimension_numbers<[1], [0], [0], [1], [0, 0, 1, 1], [], []>} : vector<16x8xbf16>, vector<8x32xbf16>, vector<16x32xf32> -> vector<16x32xf32>
    %151 = arith.addf %120, %150 : vector<16x32xf32>
    %152 = arith.addf %2, %151 : vector<16x32xf32>
    %153 = vector.extract_strided_slice %0 {offsets = [1, 0], sizes = [1, 32], strides = [1, 1]} : vector<8x32xf32> to vector<1x32xf32>
    %154 = arith.mulf %152, %152 : vector<16x32xf32>
    %cst_36 = arith.constant dense<0.000000e+00> : vector<16xf32>
    %155 = vector.multi_reduction <add>, %154, %cst_36 [1] : vector<16x32xf32> to vector<16xf32>
    %156 = vector.shape_cast %155 : vector<16xf32> to vector<16x1xf32>
    %cst_37 = arith.constant 3.200000e+01 : f32
    %157 = vector.broadcast %cst_37 : f32 to vector<16x1xf32>
    %158 = arith.divf %156, %157 : vector<16x1xf32>
    %cst_38 = arith.constant 9.99999997E-7 : f32
    %159 = vector.broadcast %cst_38 : f32 to vector<16x1xf32>
    %160 = arith.addf %158, %159 : vector<16x1xf32>
    %161 = math.rsqrt %160 : vector<16x1xf32>
    %162 = vector.broadcast %161 : vector<16x1xf32> to vector<16x32xf32>
    %163 = arith.mulf %152, %162 : vector<16x32xf32>
    %164 = vector.broadcast %153 : vector<1x32xf32> to vector<16x32xf32>
    %165 = arith.mulf %163, %164 : vector<16x32xf32>
    %166 = arith.truncf %165 : vector<16x32xf32> to vector<16x32xbf16>
    %c0_39 = arith.constant 0 : index
    %c0_40 = arith.constant 0 : index
    %167 = vector.load %arg10[%c0_39, %c0_40] : memref<32x64xbf16, #tpu.memory_space<vmem>>, vector<32x64xbf16>
    %cst_41 = arith.constant dense<0.000000e+00> : vector<16x64xf32>
    %168 = tpu.matmul %166, %167, %cst_41 {dimension_numbers = #tpu.dot_dimension_numbers<[1], [0], [0], [1], [0, 0, 1, 1], [], []>} : vector<16x32xbf16>, vector<32x64xbf16>, vector<16x64xf32> -> vector<16x64xf32>
    %cst_42 = arith.constant 0.000000e+00 : f32
    %169 = vector.broadcast %cst_42 : f32 to vector<16x64xf32>
    %170 = arith.maximumf %168, %169 : vector<16x64xf32>
    %171 = arith.truncf %170 : vector<16x64xf32> to vector<16x64xbf16>
    %c0_43 = arith.constant 0 : index
    %c0_44 = arith.constant 0 : index
    %172 = vector.load %arg11[%c0_43, %c0_44] : memref<64x32xbf16, #tpu.memory_space<vmem>>, vector<64x32xbf16>
    %cst_45 = arith.constant dense<0.000000e+00> : vector<16x32xf32>
    %173 = tpu.matmul %171, %172, %cst_45 {dimension_numbers = #tpu.dot_dimension_numbers<[1], [0], [0], [1], [0, 0, 1, 1], [], []>} : vector<16x64xbf16>, vector<64x32xbf16>, vector<16x32xf32> -> vector<16x32xf32>
    %174 = arith.addf %152, %173 : vector<16x32xf32>
    %175 = vector.extract_strided_slice %0 {offsets = [2, 0], sizes = [1, 32], strides = [1, 1]} : vector<8x32xf32> to vector<1x32xf32>
    %176 = arith.mulf %174, %174 : vector<16x32xf32>
    %cst_46 = arith.constant dense<0.000000e+00> : vector<16xf32>
    %177 = vector.multi_reduction <add>, %176, %cst_46 [1] : vector<16x32xf32> to vector<16xf32>
    %178 = vector.shape_cast %177 : vector<16xf32> to vector<16x1xf32>
    %cst_47 = arith.constant 3.200000e+01 : f32
    %179 = vector.broadcast %cst_47 : f32 to vector<16x1xf32>
    %180 = arith.divf %178, %179 : vector<16x1xf32>
    %cst_48 = arith.constant 9.99999997E-7 : f32
    %181 = vector.broadcast %cst_48 : f32 to vector<16x1xf32>
    %182 = arith.addf %180, %181 : vector<16x1xf32>
    %183 = math.rsqrt %182 : vector<16x1xf32>
    %184 = vector.broadcast %183 : vector<16x1xf32> to vector<16x32xf32>
    %185 = arith.mulf %174, %184 : vector<16x32xf32>
    %186 = vector.broadcast %175 : vector<1x32xf32> to vector<16x32xf32>
    %187 = arith.mulf %185, %186 : vector<16x32xf32>
    %188 = arith.truncf %187 : vector<16x32xf32> to vector<16x32xbf16>
    %c0_49 = arith.constant 0 : index
    %c0_50 = arith.constant 0 : index
    %c0_51 = arith.constant 0 : index
    %189 = vector.load %arg1[%c0_49, %c0_50, %c0_51] : memref<2x8x32xf32, #tpu.memory_space<vmem>>, vector<2x8x32xf32>
    %190 = vector.shape_cast %189 : vector<2x8x32xf32> to vector<16x32xf32>
    %191 = vector.extract_strided_slice %0 {offsets = [3, 0], sizes = [1, 32], strides = [1, 1]} : vector<8x32xf32> to vector<1x32xf32>
    %192 = arith.mulf %190, %190 : vector<16x32xf32>
    %cst_52 = arith.constant dense<0.000000e+00> : vector<16xf32>
    %193 = vector.multi_reduction <add>, %192, %cst_52 [1] : vector<16x32xf32> to vector<16xf32>
    %194 = vector.shape_cast %193 : vector<16xf32> to vector<16x1xf32>
    %cst_53 = arith.constant 3.200000e+01 : f32
    %195 = vector.broadcast %cst_53 : f32 to vector<16x1xf32>
    %196 = arith.divf %194, %195 : vector<16x1xf32>
    %cst_54 = arith.constant 9.99999997E-7 : f32
    %197 = vector.broadcast %cst_54 : f32 to vector<16x1xf32>
    %198 = arith.addf %196, %197 : vector<16x1xf32>
    %199 = math.rsqrt %198 : vector<16x1xf32>
    %200 = vector.broadcast %199 : vector<16x1xf32> to vector<16x32xf32>
    %201 = arith.mulf %190, %200 : vector<16x32xf32>
    %202 = vector.broadcast %191 : vector<1x32xf32> to vector<16x32xf32>
    %203 = arith.mulf %201, %202 : vector<16x32xf32>
    %204 = arith.truncf %203 : vector<16x32xf32> to vector<16x32xbf16>
    %c0_55 = arith.constant 0 : index
    %c0_56 = arith.constant 0 : index
    %205 = vector.load %arg12[%c0_55, %c0_56] : memref<32x96xbf16, #tpu.memory_space<vmem>>, vector<32x96xbf16>
    %cst_57 = arith.constant dense<0.000000e+00> : vector<16x96xf32>
    %206 = tpu.matmul %204, %205, %cst_57 {dimension_numbers = #tpu.dot_dimension_numbers<[1], [0], [0], [1], [0, 0, 1, 1], [], []>} : vector<16x32xbf16>, vector<32x96xbf16>, vector<16x96xf32> -> vector<16x96xf32>
    %207 = vector.extract_strided_slice %206 {offsets = [0, 0], sizes = [16, 32], strides = [1, 1]} : vector<16x96xf32> to vector<16x32xf32>
    %208 = vector.extract_strided_slice %206 {offsets = [0, 32], sizes = [16, 32], strides = [1, 1]} : vector<16x96xf32> to vector<16x32xf32>
    %209 = vector.extract_strided_slice %206 {offsets = [0, 64], sizes = [16, 32], strides = [1, 1]} : vector<16x96xf32> to vector<16x32xf32>
    %c0_58 = arith.constant 0 : index
    %c0_59 = arith.constant 0 : index
    %210 = vector.load %arg3[%c0_58, %c0_59] : memref<2x8xf32, #tpu.memory_space<vmem>>, vector<2x8xf32>
    %c0_60 = arith.constant 0 : index
    %c0_61 = arith.constant 0 : index
    %c0_62 = arith.constant 0 : index
    %211 = vector.load %arg5[%c0_60, %c0_61, %c0_62] : memref<4x8x8xf32, #tpu.memory_space<vmem>>, vector<4x8x8xf32>
    %c0_63 = arith.constant 0 : index
    %c0_64 = arith.constant 0 : index
    %212 = vector.load %arg13[%c0_63, %c0_64] : memref<32x32xbf16, #tpu.memory_space<vmem>>, vector<32x32xbf16>
    %213 = arith.truncf %207 : vector<16x32xf32> to vector<16x32xbf16>
    %214 = arith.truncf %208 : vector<16x32xf32> to vector<16x32xbf16>
    %215 = arith.truncf %209 : vector<16x32xf32> to vector<16x32xbf16>
    %216 = vector.shape_cast %210 : vector<2x8xf32> to vector<2x1x8xf32>
    %217 = vector.extract_strided_slice %213 {offsets = [0, 0], sizes = [16, 8], strides = [1, 1]} : vector<16x32xbf16> to vector<16x8xbf16>
    %218 = vector.shape_cast %217 : vector<16x8xbf16> to vector<2x8x8xbf16>
    %219 = vector.extract_strided_slice %214 {offsets = [0, 0], sizes = [16, 8], strides = [1, 1]} : vector<16x32xbf16> to vector<16x8xbf16>
    %220 = vector.shape_cast %219 : vector<16x8xbf16> to vector<2x8x8xbf16>
    %221 = vector.extract_strided_slice %215 {offsets = [0, 0], sizes = [16, 8], strides = [1, 1]} : vector<16x32xbf16> to vector<16x8xbf16>
    %222 = vector.shape_cast %221 : vector<16x8xbf16> to vector<2x8x8xbf16>
    "tpu.trace_start"() <{level = 10 : i32, message = "bqd,bkd->bqk"}> : () -> ()
    %cst_65 = arith.constant dense<0.000000e+00> : vector<2x8x8xf32>
    %223 = tpu.matmul %218, %220, %cst_65 {dimension_numbers = #tpu.dot_dimension_numbers<[2], [2], [1], [1], [0, 0, 0, 1, 1, 1], [0], [0]>} : vector<2x8x8xbf16>, vector<2x8x8xbf16>, vector<2x8x8xf32> -> vector<2x8x8xf32>
    "tpu.trace_stop"() : () -> ()
    %224 = vector.extract_strided_slice %211 {offsets = [0, 0, 0], sizes = [1, 8, 8], strides = [1, 1, 1]} : vector<4x8x8xf32> to vector<1x8x8xf32>
    %225 = vector.shape_cast %224 : vector<1x8x8xf32> to vector<8x8xf32>
    %226 = vector.shape_cast %225 : vector<8x8xf32> to vector<1x8x8xf32>
    %227 = vector.broadcast %226 : vector<1x8x8xf32> to vector<2x8x8xf32>
    %228 = arith.addf %223, %227 : vector<2x8x8xf32>
    %229 = vector.broadcast %216 : vector<2x1x8xf32> to vector<2x8x8xf32>
    %230 = arith.addf %228, %229 : vector<2x8x8xf32>
    %cst_66 = arith.constant dense<0xFF800000> : vector<2x8xf32>
    %231 = vector.multi_reduction <maximumf>, %230, %cst_66 [2] : vector<2x8x8xf32> to vector<2x8xf32>
    %232 = vector.shape_cast %231 : vector<2x8xf32> to vector<2x8x1xf32>
    %233 = vector.broadcast %232 : vector<2x8x1xf32> to vector<2x8x8xf32>
    %234 = arith.subf %230, %233 : vector<2x8x8xf32>
    %235 = math.exp %234 : vector<2x8x8xf32>
    %cst_67 = arith.constant dense<0.000000e+00> : vector<2x8xf32>
    %236 = vector.multi_reduction <add>, %235, %cst_67 [2] : vector<2x8x8xf32> to vector<2x8xf32>
    %237 = vector.shape_cast %236 : vector<2x8xf32> to vector<2x8x1xf32>
    %238 = tpu.reciprocal %237 {approx = true} : vector<2x8x1xf32> -> vector<2x8x1xf32>
    %239 = vector.broadcast %238 : vector<2x8x1xf32> to vector<2x8x8xf32>
    %240 = arith.mulf %235, %239 : vector<2x8x8xf32>
    %241 = arith.truncf %240 : vector<2x8x8xf32> to vector<2x8x8xbf16>
    "tpu.trace_start"() <{level = 10 : i32, message = "bqk,bkd->bqd"}> : () -> ()
    %cst_68 = arith.constant dense<0.000000e+00> : vector<2x8x8xf32>
    %242 = tpu.matmul %241, %222, %cst_68 {dimension_numbers = #tpu.dot_dimension_numbers<[2], [1], [1], [2], [0, 0, 0, 1, 1, 2], [0], [0]>} : vector<2x8x8xbf16>, vector<2x8x8xbf16>, vector<2x8x8xf32> -> vector<2x8x8xf32>
    "tpu.trace_stop"() : () -> ()
    %243 = vector.shape_cast %242 : vector<2x8x8xf32> to vector<16x8xf32>
    %244 = arith.truncf %243 : vector<16x8xf32> to vector<16x8xbf16>
    %245 = vector.extract_strided_slice %212 {offsets = [0, 0], sizes = [8, 32], strides = [1, 1]} : vector<32x32xbf16> to vector<8x32xbf16>
    %cst_69 = arith.constant dense<0.000000e+00> : vector<16x32xf32>
    %246 = tpu.matmul %244, %245, %cst_69 {dimension_numbers = #tpu.dot_dimension_numbers<[1], [0], [0], [1], [0, 0, 1, 1], [], []>} : vector<16x8xbf16>, vector<8x32xbf16>, vector<16x32xf32> -> vector<16x32xf32>
    %247 = vector.extract_strided_slice %213 {offsets = [0, 8], sizes = [16, 8], strides = [1, 1]} : vector<16x32xbf16> to vector<16x8xbf16>
    %248 = vector.shape_cast %247 : vector<16x8xbf16> to vector<2x8x8xbf16>
    %249 = vector.extract_strided_slice %214 {offsets = [0, 8], sizes = [16, 8], strides = [1, 1]} : vector<16x32xbf16> to vector<16x8xbf16>
    %250 = vector.shape_cast %249 : vector<16x8xbf16> to vector<2x8x8xbf16>
    %251 = vector.extract_strided_slice %215 {offsets = [0, 8], sizes = [16, 8], strides = [1, 1]} : vector<16x32xbf16> to vector<16x8xbf16>
    %252 = vector.shape_cast %251 : vector<16x8xbf16> to vector<2x8x8xbf16>
    "tpu.trace_start"() <{level = 10 : i32, message = "bqd,bkd->bqk"}> : () -> ()
    %cst_70 = arith.constant dense<0.000000e+00> : vector<2x8x8xf32>
    %253 = tpu.matmul %248, %250, %cst_70 {dimension_numbers = #tpu.dot_dimension_numbers<[2], [2], [1], [1], [0, 0, 0, 1, 1, 1], [0], [0]>} : vector<2x8x8xbf16>, vector<2x8x8xbf16>, vector<2x8x8xf32> -> vector<2x8x8xf32>
    "tpu.trace_stop"() : () -> ()
    %254 = vector.extract_strided_slice %211 {offsets = [1, 0, 0], sizes = [1, 8, 8], strides = [1, 1, 1]} : vector<4x8x8xf32> to vector<1x8x8xf32>
    %255 = vector.shape_cast %254 : vector<1x8x8xf32> to vector<8x8xf32>
    %256 = vector.shape_cast %255 : vector<8x8xf32> to vector<1x8x8xf32>
    %257 = vector.broadcast %256 : vector<1x8x8xf32> to vector<2x8x8xf32>
    %258 = arith.addf %253, %257 : vector<2x8x8xf32>
    %259 = vector.broadcast %216 : vector<2x1x8xf32> to vector<2x8x8xf32>
    %260 = arith.addf %258, %259 : vector<2x8x8xf32>
    %cst_71 = arith.constant dense<0xFF800000> : vector<2x8xf32>
    %261 = vector.multi_reduction <maximumf>, %260, %cst_71 [2] : vector<2x8x8xf32> to vector<2x8xf32>
    %262 = vector.shape_cast %261 : vector<2x8xf32> to vector<2x8x1xf32>
    %263 = vector.broadcast %262 : vector<2x8x1xf32> to vector<2x8x8xf32>
    %264 = arith.subf %260, %263 : vector<2x8x8xf32>
    %265 = math.exp %264 : vector<2x8x8xf32>
    %cst_72 = arith.constant dense<0.000000e+00> : vector<2x8xf32>
    %266 = vector.multi_reduction <add>, %265, %cst_72 [2] : vector<2x8x8xf32> to vector<2x8xf32>
    %267 = vector.shape_cast %266 : vector<2x8xf32> to vector<2x8x1xf32>
    %268 = tpu.reciprocal %267 {approx = true} : vector<2x8x1xf32> -> vector<2x8x1xf32>
    %269 = vector.broadcast %268 : vector<2x8x1xf32> to vector<2x8x8xf32>
    %270 = arith.mulf %265, %269 : vector<2x8x8xf32>
    %271 = arith.truncf %270 : vector<2x8x8xf32> to vector<2x8x8xbf16>
    "tpu.trace_start"() <{level = 10 : i32, message = "bqk,bkd->bqd"}> : () -> ()
    %cst_73 = arith.constant dense<0.000000e+00> : vector<2x8x8xf32>
    %272 = tpu.matmul %271, %252, %cst_73 {dimension_numbers = #tpu.dot_dimension_numbers<[2], [1], [1], [2], [0, 0, 0, 1, 1, 2], [0], [0]>} : vector<2x8x8xbf16>, vector<2x8x8xbf16>, vector<2x8x8xf32> -> vector<2x8x8xf32>
    "tpu.trace_stop"() : () -> ()
    %273 = vector.shape_cast %272 : vector<2x8x8xf32> to vector<16x8xf32>
    %274 = arith.truncf %273 : vector<16x8xf32> to vector<16x8xbf16>
    %275 = vector.extract_strided_slice %212 {offsets = [8, 0], sizes = [8, 32], strides = [1, 1]} : vector<32x32xbf16> to vector<8x32xbf16>
    %cst_74 = arith.constant dense<0.000000e+00> : vector<16x32xf32>
    %276 = tpu.matmul %274, %275, %cst_74 {dimension_numbers = #tpu.dot_dimension_numbers<[1], [0], [0], [1], [0, 0, 1, 1], [], []>} : vector<16x8xbf16>, vector<8x32xbf16>, vector<16x32xf32> -> vector<16x32xf32>
    %277 = arith.addf %246, %276 : vector<16x32xf32>
    %278 = vector.extract_strided_slice %213 {offsets = [0, 16], sizes = [16, 8], strides = [1, 1]} : vector<16x32xbf16> to vector<16x8xbf16>
    %279 = vector.shape_cast %278 : vector<16x8xbf16> to vector<2x8x8xbf16>
    %280 = vector.extract_strided_slice %214 {offsets = [0, 16], sizes = [16, 8], strides = [1, 1]} : vector<16x32xbf16> to vector<16x8xbf16>
    %281 = vector.shape_cast %280 : vector<16x8xbf16> to vector<2x8x8xbf16>
    %282 = vector.extract_strided_slice %215 {offsets = [0, 16], sizes = [16, 8], strides = [1, 1]} : vector<16x32xbf16> to vector<16x8xbf16>
    %283 = vector.shape_cast %282 : vector<16x8xbf16> to vector<2x8x8xbf16>
    "tpu.trace_start"() <{level = 10 : i32, message = "bqd,bkd->bqk"}> : () -> ()
    %cst_75 = arith.constant dense<0.000000e+00> : vector<2x8x8xf32>
    %284 = tpu.matmul %279, %281, %cst_75 {dimension_numbers = #tpu.dot_dimension_numbers<[2], [2], [1], [1], [0, 0, 0, 1, 1, 1], [0], [0]>} : vector<2x8x8xbf16>, vector<2x8x8xbf16>, vector<2x8x8xf32> -> vector<2x8x8xf32>
    "tpu.trace_stop"() : () -> ()
    %285 = vector.extract_strided_slice %211 {offsets = [2, 0, 0], sizes = [1, 8, 8], strides = [1, 1, 1]} : vector<4x8x8xf32> to vector<1x8x8xf32>
    %286 = vector.shape_cast %285 : vector<1x8x8xf32> to vector<8x8xf32>
    %287 = vector.shape_cast %286 : vector<8x8xf32> to vector<1x8x8xf32>
    %288 = vector.broadcast %287 : vector<1x8x8xf32> to vector<2x8x8xf32>
    %289 = arith.addf %284, %288 : vector<2x8x8xf32>
    %290 = vector.broadcast %216 : vector<2x1x8xf32> to vector<2x8x8xf32>
    %291 = arith.addf %289, %290 : vector<2x8x8xf32>
    %cst_76 = arith.constant dense<0xFF800000> : vector<2x8xf32>
    %292 = vector.multi_reduction <maximumf>, %291, %cst_76 [2] : vector<2x8x8xf32> to vector<2x8xf32>
    %293 = vector.shape_cast %292 : vector<2x8xf32> to vector<2x8x1xf32>
    %294 = vector.broadcast %293 : vector<2x8x1xf32> to vector<2x8x8xf32>
    %295 = arith.subf %291, %294 : vector<2x8x8xf32>
    %296 = math.exp %295 : vector<2x8x8xf32>
    %cst_77 = arith.constant dense<0.000000e+00> : vector<2x8xf32>
    %297 = vector.multi_reduction <add>, %296, %cst_77 [2] : vector<2x8x8xf32> to vector<2x8xf32>
    %298 = vector.shape_cast %297 : vector<2x8xf32> to vector<2x8x1xf32>
    %299 = tpu.reciprocal %298 {approx = true} : vector<2x8x1xf32> -> vector<2x8x1xf32>
    %300 = vector.broadcast %299 : vector<2x8x1xf32> to vector<2x8x8xf32>
    %301 = arith.mulf %296, %300 : vector<2x8x8xf32>
    %302 = arith.truncf %301 : vector<2x8x8xf32> to vector<2x8x8xbf16>
    "tpu.trace_start"() <{level = 10 : i32, message = "bqk,bkd->bqd"}> : () -> ()
    %cst_78 = arith.constant dense<0.000000e+00> : vector<2x8x8xf32>
    %303 = tpu.matmul %302, %283, %cst_78 {dimension_numbers = #tpu.dot_dimension_numbers<[2], [1], [1], [2], [0, 0, 0, 1, 1, 2], [0], [0]>} : vector<2x8x8xbf16>, vector<2x8x8xbf16>, vector<2x8x8xf32> -> vector<2x8x8xf32>
    "tpu.trace_stop"() : () -> ()
    %304 = vector.shape_cast %303 : vector<2x8x8xf32> to vector<16x8xf32>
    %305 = arith.truncf %304 : vector<16x8xf32> to vector<16x8xbf16>
    %306 = vector.extract_strided_slice %212 {offsets = [16, 0], sizes = [8, 32], strides = [1, 1]} : vector<32x32xbf16> to vector<8x32xbf16>
    %cst_79 = arith.constant dense<0.000000e+00> : vector<16x32xf32>
    %307 = tpu.matmul %305, %306, %cst_79 {dimension_numbers = #tpu.dot_dimension_numbers<[1], [0], [0], [1], [0, 0, 1, 1], [], []>} : vector<16x8xbf16>, vector<8x32xbf16>, vector<16x32xf32> -> vector<16x32xf32>
    %308 = arith.addf %277, %307 : vector<16x32xf32>
    %309 = vector.extract_strided_slice %213 {offsets = [0, 24], sizes = [16, 8], strides = [1, 1]} : vector<16x32xbf16> to vector<16x8xbf16>
    %310 = vector.shape_cast %309 : vector<16x8xbf16> to vector<2x8x8xbf16>
    %311 = vector.extract_strided_slice %214 {offsets = [0, 24], sizes = [16, 8], strides = [1, 1]} : vector<16x32xbf16> to vector<16x8xbf16>
    %312 = vector.shape_cast %311 : vector<16x8xbf16> to vector<2x8x8xbf16>
    %313 = vector.extract_strided_slice %215 {offsets = [0, 24], sizes = [16, 8], strides = [1, 1]} : vector<16x32xbf16> to vector<16x8xbf16>
    %314 = vector.shape_cast %313 : vector<16x8xbf16> to vector<2x8x8xbf16>
    "tpu.trace_start"() <{level = 10 : i32, message = "bqd,bkd->bqk"}> : () -> ()
    %cst_80 = arith.constant dense<0.000000e+00> : vector<2x8x8xf32>
    %315 = tpu.matmul %310, %312, %cst_80 {dimension_numbers = #tpu.dot_dimension_numbers<[2], [2], [1], [1], [0, 0, 0, 1, 1, 1], [0], [0]>} : vector<2x8x8xbf16>, vector<2x8x8xbf16>, vector<2x8x8xf32> -> vector<2x8x8xf32>
    "tpu.trace_stop"() : () -> ()
    %316 = vector.extract_strided_slice %211 {offsets = [3, 0, 0], sizes = [1, 8, 8], strides = [1, 1, 1]} : vector<4x8x8xf32> to vector<1x8x8xf32>
    %317 = vector.shape_cast %316 : vector<1x8x8xf32> to vector<8x8xf32>
    %318 = vector.shape_cast %317 : vector<8x8xf32> to vector<1x8x8xf32>
    %319 = vector.broadcast %318 : vector<1x8x8xf32> to vector<2x8x8xf32>
    %320 = arith.addf %315, %319 : vector<2x8x8xf32>
    %321 = vector.broadcast %216 : vector<2x1x8xf32> to vector<2x8x8xf32>
    %322 = arith.addf %320, %321 : vector<2x8x8xf32>
    %cst_81 = arith.constant dense<0xFF800000> : vector<2x8xf32>
    %323 = vector.multi_reduction <maximumf>, %322, %cst_81 [2] : vector<2x8x8xf32> to vector<2x8xf32>
    %324 = vector.shape_cast %323 : vector<2x8xf32> to vector<2x8x1xf32>
    %325 = vector.broadcast %324 : vector<2x8x1xf32> to vector<2x8x8xf32>
    %326 = arith.subf %322, %325 : vector<2x8x8xf32>
    %327 = math.exp %326 : vector<2x8x8xf32>
    %cst_82 = arith.constant dense<0.000000e+00> : vector<2x8xf32>
    %328 = vector.multi_reduction <add>, %327, %cst_82 [2] : vector<2x8x8xf32> to vector<2x8xf32>
    %329 = vector.shape_cast %328 : vector<2x8xf32> to vector<2x8x1xf32>
    %330 = tpu.reciprocal %329 {approx = true} : vector<2x8x1xf32> -> vector<2x8x1xf32>
    %331 = vector.broadcast %330 : vector<2x8x1xf32> to vector<2x8x8xf32>
    %332 = arith.mulf %327, %331 : vector<2x8x8xf32>
    %333 = arith.truncf %332 : vector<2x8x8xf32> to vector<2x8x8xbf16>
    "tpu.trace_start"() <{level = 10 : i32, message = "bqk,bkd->bqd"}> : () -> ()
    %cst_83 = arith.constant dense<0.000000e+00> : vector<2x8x8xf32>
    %334 = tpu.matmul %333, %314, %cst_83 {dimension_numbers = #tpu.dot_dimension_numbers<[2], [1], [1], [2], [0, 0, 0, 1, 1, 2], [0], [0]>} : vector<2x8x8xbf16>, vector<2x8x8xbf16>, vector<2x8x8xf32> -> vector<2x8x8xf32>
    "tpu.trace_stop"() : () -> ()
    %335 = vector.shape_cast %334 : vector<2x8x8xf32> to vector<16x8xf32>
    %336 = arith.truncf %335 : vector<16x8xf32> to vector<16x8xbf16>
    %337 = vector.extract_strided_slice %212 {offsets = [24, 0], sizes = [8, 32], strides = [1, 1]} : vector<32x32xbf16> to vector<8x32xbf16>
    %cst_84 = arith.constant dense<0.000000e+00> : vector<16x32xf32>
    %338 = tpu.matmul %336, %337, %cst_84 {dimension_numbers = #tpu.dot_dimension_numbers<[1], [0], [0], [1], [0, 0, 1, 1], [], []>} : vector<16x8xbf16>, vector<8x32xbf16>, vector<16x32xf32> -> vector<16x32xf32>
    %339 = arith.addf %308, %338 : vector<16x32xf32>
    %340 = arith.addf %190, %339 : vector<16x32xf32>
    %341 = vector.extract_strided_slice %0 {offsets = [4, 0], sizes = [1, 32], strides = [1, 1]} : vector<8x32xf32> to vector<1x32xf32>
    %342 = arith.mulf %340, %340 : vector<16x32xf32>
    %cst_85 = arith.constant dense<0.000000e+00> : vector<16xf32>
    %343 = vector.multi_reduction <add>, %342, %cst_85 [1] : vector<16x32xf32> to vector<16xf32>
    %344 = vector.shape_cast %343 : vector<16xf32> to vector<16x1xf32>
    %cst_86 = arith.constant 3.200000e+01 : f32
    %345 = vector.broadcast %cst_86 : f32 to vector<16x1xf32>
    %346 = arith.divf %344, %345 : vector<16x1xf32>
    %cst_87 = arith.constant 9.99999997E-7 : f32
    %347 = vector.broadcast %cst_87 : f32 to vector<16x1xf32>
    %348 = arith.addf %346, %347 : vector<16x1xf32>
    %349 = math.rsqrt %348 : vector<16x1xf32>
    %350 = vector.broadcast %349 : vector<16x1xf32> to vector<16x32xf32>
    %351 = arith.mulf %340, %350 : vector<16x32xf32>
    %352 = vector.broadcast %341 : vector<1x32xf32> to vector<16x32xf32>
    %353 = arith.mulf %351, %352 : vector<16x32xf32>
    %354 = arith.truncf %353 : vector<16x32xf32> to vector<16x32xbf16>
    %c0_88 = arith.constant 0 : index
    %c0_89 = arith.constant 0 : index
    %355 = vector.load %arg14[%c0_88, %c0_89] : memref<32x32xbf16, #tpu.memory_space<vmem>>, vector<32x32xbf16>
    %cst_90 = arith.constant dense<0.000000e+00> : vector<16x32xf32>
    %356 = tpu.matmul %354, %355, %cst_90 {dimension_numbers = #tpu.dot_dimension_numbers<[1], [0], [0], [1], [0, 0, 1, 1], [], []>} : vector<16x32xbf16>, vector<32x32xbf16>, vector<16x32xf32> -> vector<16x32xf32>
    %c0_91 = arith.constant 0 : index
    %c0_92 = arith.constant 0 : index
    %357 = vector.load %arg15[%c0_91, %c0_92] : memref<32x64xbf16, #tpu.memory_space<vmem>>, vector<32x64xbf16>
    %cst_93 = arith.constant dense<0.000000e+00> : vector<16x64xf32>
    %358 = tpu.matmul %188, %357, %cst_93 {dimension_numbers = #tpu.dot_dimension_numbers<[1], [0], [0], [1], [0, 0, 1, 1], [], []>} : vector<16x32xbf16>, vector<32x64xbf16>, vector<16x64xf32> -> vector<16x64xf32>
    %359 = vector.extract_strided_slice %358 {offsets = [0, 0], sizes = [16, 32], strides = [1, 1]} : vector<16x64xf32> to vector<16x32xf32>
    %360 = vector.extract_strided_slice %358 {offsets = [0, 32], sizes = [16, 32], strides = [1, 1]} : vector<16x64xf32> to vector<16x32xf32>
    %c0_94 = arith.constant 0 : index
    %c0_95 = arith.constant 0 : index
    %361 = vector.load %arg2[%c0_94, %c0_95] : memref<2x8xf32, #tpu.memory_space<vmem>>, vector<2x8xf32>
    %c0_96 = arith.constant 0 : index
    %c0_97 = arith.constant 0 : index
    %362 = vector.load %arg16[%c0_96, %c0_97] : memref<32x32xbf16, #tpu.memory_space<vmem>>, vector<32x32xbf16>
    %363 = arith.truncf %356 : vector<16x32xf32> to vector<16x32xbf16>
    %364 = arith.truncf %359 : vector<16x32xf32> to vector<16x32xbf16>
    %365 = arith.truncf %360 : vector<16x32xf32> to vector<16x32xbf16>
    %366 = vector.shape_cast %361 : vector<2x8xf32> to vector<2x1x8xf32>
    %367 = vector.extract_strided_slice %363 {offsets = [0, 0], sizes = [16, 8], strides = [1, 1]} : vector<16x32xbf16> to vector<16x8xbf16>
    %368 = vector.shape_cast %367 : vector<16x8xbf16> to vector<2x8x8xbf16>
    %369 = vector.extract_strided_slice %364 {offsets = [0, 0], sizes = [16, 8], strides = [1, 1]} : vector<16x32xbf16> to vector<16x8xbf16>
    %370 = vector.shape_cast %369 : vector<16x8xbf16> to vector<2x8x8xbf16>
    %371 = vector.extract_strided_slice %365 {offsets = [0, 0], sizes = [16, 8], strides = [1, 1]} : vector<16x32xbf16> to vector<16x8xbf16>
    %372 = vector.shape_cast %371 : vector<16x8xbf16> to vector<2x8x8xbf16>
    "tpu.trace_start"() <{level = 10 : i32, message = "bqd,bkd->bqk"}> : () -> ()
    %cst_98 = arith.constant dense<0.000000e+00> : vector<2x8x8xf32>
    %373 = tpu.matmul %368, %370, %cst_98 {dimension_numbers = #tpu.dot_dimension_numbers<[2], [2], [1], [1], [0, 0, 0, 1, 1, 1], [0], [0]>} : vector<2x8x8xbf16>, vector<2x8x8xbf16>, vector<2x8x8xf32> -> vector<2x8x8xf32>
    "tpu.trace_stop"() : () -> ()
    %374 = vector.broadcast %366 : vector<2x1x8xf32> to vector<2x8x8xf32>
    %375 = arith.addf %373, %374 : vector<2x8x8xf32>
    %cst_99 = arith.constant dense<0xFF800000> : vector<2x8xf32>
    %376 = vector.multi_reduction <maximumf>, %375, %cst_99 [2] : vector<2x8x8xf32> to vector<2x8xf32>
    %377 = vector.shape_cast %376 : vector<2x8xf32> to vector<2x8x1xf32>
    %378 = vector.broadcast %377 : vector<2x8x1xf32> to vector<2x8x8xf32>
    %379 = arith.subf %375, %378 : vector<2x8x8xf32>
    %380 = math.exp %379 : vector<2x8x8xf32>
    %cst_100 = arith.constant dense<0.000000e+00> : vector<2x8xf32>
    %381 = vector.multi_reduction <add>, %380, %cst_100 [2] : vector<2x8x8xf32> to vector<2x8xf32>
    %382 = vector.shape_cast %381 : vector<2x8xf32> to vector<2x8x1xf32>
    %383 = tpu.reciprocal %382 {approx = true} : vector<2x8x1xf32> -> vector<2x8x1xf32>
    %384 = vector.broadcast %383 : vector<2x8x1xf32> to vector<2x8x8xf32>
    %385 = arith.mulf %380, %384 : vector<2x8x8xf32>
    %386 = arith.truncf %385 : vector<2x8x8xf32> to vector<2x8x8xbf16>
    "tpu.trace_start"() <{level = 10 : i32, message = "bqk,bkd->bqd"}> : () -> ()
    %cst_101 = arith.constant dense<0.000000e+00> : vector<2x8x8xf32>
    %387 = tpu.matmul %386, %372, %cst_101 {dimension_numbers = #tpu.dot_dimension_numbers<[2], [1], [1], [2], [0, 0, 0, 1, 1, 2], [0], [0]>} : vector<2x8x8xbf16>, vector<2x8x8xbf16>, vector<2x8x8xf32> -> vector<2x8x8xf32>
    "tpu.trace_stop"() : () -> ()
    %388 = vector.shape_cast %387 : vector<2x8x8xf32> to vector<16x8xf32>
    %389 = arith.truncf %388 : vector<16x8xf32> to vector<16x8xbf16>
    %390 = vector.extract_strided_slice %362 {offsets = [0, 0], sizes = [8, 32], strides = [1, 1]} : vector<32x32xbf16> to vector<8x32xbf16>
    %cst_102 = arith.constant dense<0.000000e+00> : vector<16x32xf32>
    %391 = tpu.matmul %389, %390, %cst_102 {dimension_numbers = #tpu.dot_dimension_numbers<[1], [0], [0], [1], [0, 0, 1, 1], [], []>} : vector<16x8xbf16>, vector<8x32xbf16>, vector<16x32xf32> -> vector<16x32xf32>
    %392 = vector.extract_strided_slice %363 {offsets = [0, 8], sizes = [16, 8], strides = [1, 1]} : vector<16x32xbf16> to vector<16x8xbf16>
    %393 = vector.shape_cast %392 : vector<16x8xbf16> to vector<2x8x8xbf16>
    %394 = vector.extract_strided_slice %364 {offsets = [0, 8], sizes = [16, 8], strides = [1, 1]} : vector<16x32xbf16> to vector<16x8xbf16>
    %395 = vector.shape_cast %394 : vector<16x8xbf16> to vector<2x8x8xbf16>
    %396 = vector.extract_strided_slice %365 {offsets = [0, 8], sizes = [16, 8], strides = [1, 1]} : vector<16x32xbf16> to vector<16x8xbf16>
    %397 = vector.shape_cast %396 : vector<16x8xbf16> to vector<2x8x8xbf16>
    "tpu.trace_start"() <{level = 10 : i32, message = "bqd,bkd->bqk"}> : () -> ()
    %cst_103 = arith.constant dense<0.000000e+00> : vector<2x8x8xf32>
    %398 = tpu.matmul %393, %395, %cst_103 {dimension_numbers = #tpu.dot_dimension_numbers<[2], [2], [1], [1], [0, 0, 0, 1, 1, 1], [0], [0]>} : vector<2x8x8xbf16>, vector<2x8x8xbf16>, vector<2x8x8xf32> -> vector<2x8x8xf32>
    "tpu.trace_stop"() : () -> ()
    %399 = vector.broadcast %366 : vector<2x1x8xf32> to vector<2x8x8xf32>
    %400 = arith.addf %398, %399 : vector<2x8x8xf32>
    %cst_104 = arith.constant dense<0xFF800000> : vector<2x8xf32>
    %401 = vector.multi_reduction <maximumf>, %400, %cst_104 [2] : vector<2x8x8xf32> to vector<2x8xf32>
    %402 = vector.shape_cast %401 : vector<2x8xf32> to vector<2x8x1xf32>
    %403 = vector.broadcast %402 : vector<2x8x1xf32> to vector<2x8x8xf32>
    %404 = arith.subf %400, %403 : vector<2x8x8xf32>
    %405 = math.exp %404 : vector<2x8x8xf32>
    %cst_105 = arith.constant dense<0.000000e+00> : vector<2x8xf32>
    %406 = vector.multi_reduction <add>, %405, %cst_105 [2] : vector<2x8x8xf32> to vector<2x8xf32>
    %407 = vector.shape_cast %406 : vector<2x8xf32> to vector<2x8x1xf32>
    %408 = tpu.reciprocal %407 {approx = true} : vector<2x8x1xf32> -> vector<2x8x1xf32>
    %409 = vector.broadcast %408 : vector<2x8x1xf32> to vector<2x8x8xf32>
    %410 = arith.mulf %405, %409 : vector<2x8x8xf32>
    %411 = arith.truncf %410 : vector<2x8x8xf32> to vector<2x8x8xbf16>
    "tpu.trace_start"() <{level = 10 : i32, message = "bqk,bkd->bqd"}> : () -> ()
    %cst_106 = arith.constant dense<0.000000e+00> : vector<2x8x8xf32>
    %412 = tpu.matmul %411, %397, %cst_106 {dimension_numbers = #tpu.dot_dimension_numbers<[2], [1], [1], [2], [0, 0, 0, 1, 1, 2], [0], [0]>} : vector<2x8x8xbf16>, vector<2x8x8xbf16>, vector<2x8x8xf32> -> vector<2x8x8xf32>
    "tpu.trace_stop"() : () -> ()
    %413 = vector.shape_cast %412 : vector<2x8x8xf32> to vector<16x8xf32>
    %414 = arith.truncf %413 : vector<16x8xf32> to vector<16x8xbf16>
    %415 = vector.extract_strided_slice %362 {offsets = [8, 0], sizes = [8, 32], strides = [1, 1]} : vector<32x32xbf16> to vector<8x32xbf16>
    %cst_107 = arith.constant dense<0.000000e+00> : vector<16x32xf32>
    %416 = tpu.matmul %414, %415, %cst_107 {dimension_numbers = #tpu.dot_dimension_numbers<[1], [0], [0], [1], [0, 0, 1, 1], [], []>} : vector<16x8xbf16>, vector<8x32xbf16>, vector<16x32xf32> -> vector<16x32xf32>
    %417 = arith.addf %391, %416 : vector<16x32xf32>
    %418 = vector.extract_strided_slice %363 {offsets = [0, 16], sizes = [16, 8], strides = [1, 1]} : vector<16x32xbf16> to vector<16x8xbf16>
    %419 = vector.shape_cast %418 : vector<16x8xbf16> to vector<2x8x8xbf16>
    %420 = vector.extract_strided_slice %364 {offsets = [0, 16], sizes = [16, 8], strides = [1, 1]} : vector<16x32xbf16> to vector<16x8xbf16>
    %421 = vector.shape_cast %420 : vector<16x8xbf16> to vector<2x8x8xbf16>
    %422 = vector.extract_strided_slice %365 {offsets = [0, 16], sizes = [16, 8], strides = [1, 1]} : vector<16x32xbf16> to vector<16x8xbf16>
    %423 = vector.shape_cast %422 : vector<16x8xbf16> to vector<2x8x8xbf16>
    "tpu.trace_start"() <{level = 10 : i32, message = "bqd,bkd->bqk"}> : () -> ()
    %cst_108 = arith.constant dense<0.000000e+00> : vector<2x8x8xf32>
    %424 = tpu.matmul %419, %421, %cst_108 {dimension_numbers = #tpu.dot_dimension_numbers<[2], [2], [1], [1], [0, 0, 0, 1, 1, 1], [0], [0]>} : vector<2x8x8xbf16>, vector<2x8x8xbf16>, vector<2x8x8xf32> -> vector<2x8x8xf32>
    "tpu.trace_stop"() : () -> ()
    %425 = vector.broadcast %366 : vector<2x1x8xf32> to vector<2x8x8xf32>
    %426 = arith.addf %424, %425 : vector<2x8x8xf32>
    %cst_109 = arith.constant dense<0xFF800000> : vector<2x8xf32>
    %427 = vector.multi_reduction <maximumf>, %426, %cst_109 [2] : vector<2x8x8xf32> to vector<2x8xf32>
    %428 = vector.shape_cast %427 : vector<2x8xf32> to vector<2x8x1xf32>
    %429 = vector.broadcast %428 : vector<2x8x1xf32> to vector<2x8x8xf32>
    %430 = arith.subf %426, %429 : vector<2x8x8xf32>
    %431 = math.exp %430 : vector<2x8x8xf32>
    %cst_110 = arith.constant dense<0.000000e+00> : vector<2x8xf32>
    %432 = vector.multi_reduction <add>, %431, %cst_110 [2] : vector<2x8x8xf32> to vector<2x8xf32>
    %433 = vector.shape_cast %432 : vector<2x8xf32> to vector<2x8x1xf32>
    %434 = tpu.reciprocal %433 {approx = true} : vector<2x8x1xf32> -> vector<2x8x1xf32>
    %435 = vector.broadcast %434 : vector<2x8x1xf32> to vector<2x8x8xf32>
    %436 = arith.mulf %431, %435 : vector<2x8x8xf32>
    %437 = arith.truncf %436 : vector<2x8x8xf32> to vector<2x8x8xbf16>
    "tpu.trace_start"() <{level = 10 : i32, message = "bqk,bkd->bqd"}> : () -> ()
    %cst_111 = arith.constant dense<0.000000e+00> : vector<2x8x8xf32>
    %438 = tpu.matmul %437, %423, %cst_111 {dimension_numbers = #tpu.dot_dimension_numbers<[2], [1], [1], [2], [0, 0, 0, 1, 1, 2], [0], [0]>} : vector<2x8x8xbf16>, vector<2x8x8xbf16>, vector<2x8x8xf32> -> vector<2x8x8xf32>
    "tpu.trace_stop"() : () -> ()
    %439 = vector.shape_cast %438 : vector<2x8x8xf32> to vector<16x8xf32>
    %440 = arith.truncf %439 : vector<16x8xf32> to vector<16x8xbf16>
    %441 = vector.extract_strided_slice %362 {offsets = [16, 0], sizes = [8, 32], strides = [1, 1]} : vector<32x32xbf16> to vector<8x32xbf16>
    %cst_112 = arith.constant dense<0.000000e+00> : vector<16x32xf32>
    %442 = tpu.matmul %440, %441, %cst_112 {dimension_numbers = #tpu.dot_dimension_numbers<[1], [0], [0], [1], [0, 0, 1, 1], [], []>} : vector<16x8xbf16>, vector<8x32xbf16>, vector<16x32xf32> -> vector<16x32xf32>
    %443 = arith.addf %417, %442 : vector<16x32xf32>
    %444 = vector.extract_strided_slice %363 {offsets = [0, 24], sizes = [16, 8], strides = [1, 1]} : vector<16x32xbf16> to vector<16x8xbf16>
    %445 = vector.shape_cast %444 : vector<16x8xbf16> to vector<2x8x8xbf16>
    %446 = vector.extract_strided_slice %364 {offsets = [0, 24], sizes = [16, 8], strides = [1, 1]} : vector<16x32xbf16> to vector<16x8xbf16>
    %447 = vector.shape_cast %446 : vector<16x8xbf16> to vector<2x8x8xbf16>
    %448 = vector.extract_strided_slice %365 {offsets = [0, 24], sizes = [16, 8], strides = [1, 1]} : vector<16x32xbf16> to vector<16x8xbf16>
    %449 = vector.shape_cast %448 : vector<16x8xbf16> to vector<2x8x8xbf16>
    "tpu.trace_start"() <{level = 10 : i32, message = "bqd,bkd->bqk"}> : () -> ()
    %cst_113 = arith.constant dense<0.000000e+00> : vector<2x8x8xf32>
    %450 = tpu.matmul %445, %447, %cst_113 {dimension_numbers = #tpu.dot_dimension_numbers<[2], [2], [1], [1], [0, 0, 0, 1, 1, 1], [0], [0]>} : vector<2x8x8xbf16>, vector<2x8x8xbf16>, vector<2x8x8xf32> -> vector<2x8x8xf32>
    "tpu.trace_stop"() : () -> ()
    %451 = vector.broadcast %366 : vector<2x1x8xf32> to vector<2x8x8xf32>
    %452 = arith.addf %450, %451 : vector<2x8x8xf32>
    %cst_114 = arith.constant dense<0xFF800000> : vector<2x8xf32>
    %453 = vector.multi_reduction <maximumf>, %452, %cst_114 [2] : vector<2x8x8xf32> to vector<2x8xf32>
    %454 = vector.shape_cast %453 : vector<2x8xf32> to vector<2x8x1xf32>
    %455 = vector.broadcast %454 : vector<2x8x1xf32> to vector<2x8x8xf32>
    %456 = arith.subf %452, %455 : vector<2x8x8xf32>
    %457 = math.exp %456 : vector<2x8x8xf32>
    %cst_115 = arith.constant dense<0.000000e+00> : vector<2x8xf32>
    %458 = vector.multi_reduction <add>, %457, %cst_115 [2] : vector<2x8x8xf32> to vector<2x8xf32>
    %459 = vector.shape_cast %458 : vector<2x8xf32> to vector<2x8x1xf32>
    %460 = tpu.reciprocal %459 {approx = true} : vector<2x8x1xf32> -> vector<2x8x1xf32>
    %461 = vector.broadcast %460 : vector<2x8x1xf32> to vector<2x8x8xf32>
    %462 = arith.mulf %457, %461 : vector<2x8x8xf32>
    %463 = arith.truncf %462 : vector<2x8x8xf32> to vector<2x8x8xbf16>
    "tpu.trace_start"() <{level = 10 : i32, message = "bqk,bkd->bqd"}> : () -> ()
    %cst_116 = arith.constant dense<0.000000e+00> : vector<2x8x8xf32>
    %464 = tpu.matmul %463, %449, %cst_116 {dimension_numbers = #tpu.dot_dimension_numbers<[2], [1], [1], [2], [0, 0, 0, 1, 1, 2], [0], [0]>} : vector<2x8x8xbf16>, vector<2x8x8xbf16>, vector<2x8x8xf32> -> vector<2x8x8xf32>
    "tpu.trace_stop"() : () -> ()
    %465 = vector.shape_cast %464 : vector<2x8x8xf32> to vector<16x8xf32>
    %466 = arith.truncf %465 : vector<16x8xf32> to vector<16x8xbf16>
    %467 = vector.extract_strided_slice %362 {offsets = [24, 0], sizes = [8, 32], strides = [1, 1]} : vector<32x32xbf16> to vector<8x32xbf16>
    %cst_117 = arith.constant dense<0.000000e+00> : vector<16x32xf32>
    %468 = tpu.matmul %466, %467, %cst_117 {dimension_numbers = #tpu.dot_dimension_numbers<[1], [0], [0], [1], [0, 0, 1, 1], [], []>} : vector<16x8xbf16>, vector<8x32xbf16>, vector<16x32xf32> -> vector<16x32xf32>
    %469 = arith.addf %443, %468 : vector<16x32xf32>
    %470 = arith.addf %340, %469 : vector<16x32xf32>
    %471 = vector.extract_strided_slice %0 {offsets = [5, 0], sizes = [1, 32], strides = [1, 1]} : vector<8x32xf32> to vector<1x32xf32>
    %472 = arith.mulf %470, %470 : vector<16x32xf32>
    %cst_118 = arith.constant dense<0.000000e+00> : vector<16xf32>
    %473 = vector.multi_reduction <add>, %472, %cst_118 [1] : vector<16x32xf32> to vector<16xf32>
    %474 = vector.shape_cast %473 : vector<16xf32> to vector<16x1xf32>
    %cst_119 = arith.constant 3.200000e+01 : f32
    %475 = vector.broadcast %cst_119 : f32 to vector<16x1xf32>
    %476 = arith.divf %474, %475 : vector<16x1xf32>
    %cst_120 = arith.constant 9.99999997E-7 : f32
    %477 = vector.broadcast %cst_120 : f32 to vector<16x1xf32>
    %478 = arith.addf %476, %477 : vector<16x1xf32>
    %479 = math.rsqrt %478 : vector<16x1xf32>
    %480 = vector.broadcast %479 : vector<16x1xf32> to vector<16x32xf32>
    %481 = arith.mulf %470, %480 : vector<16x32xf32>
    %482 = vector.broadcast %471 : vector<1x32xf32> to vector<16x32xf32>
    %483 = arith.mulf %481, %482 : vector<16x32xf32>
    %484 = arith.truncf %483 : vector<16x32xf32> to vector<16x32xbf16>
    %c0_121 = arith.constant 0 : index
    %c0_122 = arith.constant 0 : index
    %485 = vector.load %arg17[%c0_121, %c0_122] : memref<32x64xbf16, #tpu.memory_space<vmem>>, vector<32x64xbf16>
    %cst_123 = arith.constant dense<0.000000e+00> : vector<16x64xf32>
    %486 = tpu.matmul %484, %485, %cst_123 {dimension_numbers = #tpu.dot_dimension_numbers<[1], [0], [0], [1], [0, 0, 1, 1], [], []>} : vector<16x32xbf16>, vector<32x64xbf16>, vector<16x64xf32> -> vector<16x64xf32>
    %cst_124 = arith.constant 0.000000e+00 : f32
    %487 = vector.broadcast %cst_124 : f32 to vector<16x64xf32>
    %488 = arith.maximumf %486, %487 : vector<16x64xf32>
    %489 = arith.truncf %488 : vector<16x64xf32> to vector<16x64xbf16>
    %c0_125 = arith.constant 0 : index
    %c0_126 = arith.constant 0 : index
    %490 = vector.load %arg18[%c0_125, %c0_126] : memref<64x32xbf16, #tpu.memory_space<vmem>>, vector<64x32xbf16>
    %cst_127 = arith.constant dense<0.000000e+00> : vector<16x32xf32>
    %491 = tpu.matmul %489, %490, %cst_127 {dimension_numbers = #tpu.dot_dimension_numbers<[1], [0], [0], [1], [0, 0, 1, 1], [], []>} : vector<16x64xbf16>, vector<64x32xbf16>, vector<16x32xf32> -> vector<16x32xf32>
    %492 = arith.addf %470, %491 : vector<16x32xf32>
    %493 = vector.extract_strided_slice %0 {offsets = [6, 0], sizes = [1, 32], strides = [1, 1]} : vector<8x32xf32> to vector<1x32xf32>
    %494 = arith.mulf %492, %492 : vector<16x32xf32>
    %cst_128 = arith.constant dense<0.000000e+00> : vector<16xf32>
    %495 = vector.multi_reduction <add>, %494, %cst_128 [1] : vector<16x32xf32> to vector<16xf32>
    %496 = vector.shape_cast %495 : vector<16xf32> to vector<16x1xf32>
    %cst_129 = arith.constant 3.200000e+01 : f32
    %497 = vector.broadcast %cst_129 : f32 to vector<16x1xf32>
    %498 = arith.divf %496, %497 : vector<16x1xf32>
    %cst_130 = arith.constant 9.99999997E-7 : f32
    %499 = vector.broadcast %cst_130 : f32 to vector<16x1xf32>
    %500 = arith.addf %498, %499 : vector<16x1xf32>
    %501 = math.rsqrt %500 : vector<16x1xf32>
    %502 = vector.broadcast %501 : vector<16x1xf32> to vector<16x32xf32>
    %503 = arith.mulf %492, %502 : vector<16x32xf32>
    %504 = vector.broadcast %493 : vector<1x32xf32> to vector<16x32xf32>
    %505 = arith.mulf %503, %504 : vector<16x32xf32>
    %cst_131 = arith.constant 0.176776692 : f32
    %506 = vector.broadcast %cst_131 : f32 to vector<16x32xf32>
    %507 = arith.mulf %505, %506 : vector<16x32xf32>
    %508 = arith.truncf %507 : vector<16x32xf32> to vector<16x32xbf16>
    %c0_132 = arith.constant 0 : index
    %c0_133 = arith.constant 0 : index
    %509 = vector.load %arg19[%c0_132, %c0_133] : memref<32x128xbf16, #tpu.memory_space<vmem>>, vector<32x128xbf16>
    %cst_134 = arith.constant dense<0.000000e+00> : vector<16x128xf32>
    %510 = tpu.matmul %508, %509, %cst_134 {dimension_numbers = #tpu.dot_dimension_numbers<[1], [0], [0], [1], [0, 0, 1, 1], [], []>} : vector<16x32xbf16>, vector<32x128xbf16>, vector<16x128xf32> -> vector<16x128xf32>
    %511 = vector.shape_cast %510 : vector<16x128xf32> to vector<2x8x128xf32>
    %c0_135 = arith.constant 0 : index
    %c0_136 = arith.constant 0 : index
    %c0_137 = arith.constant 0 : index
    %512 = vector.load %arg20[%c0_135, %c0_136, %c0_137] : memref<2x8x128xf32, #tpu.memory_space<vmem>>, vector<2x8x128xf32>
    tpu.vector_store %arg20[%c0_135, %c0_136, %c0_137], %511 {strides = array<i32>} : memref<2x8x128xf32, #tpu.memory_space<vmem>>, vector<2x8x128xf32>,
    %c0_138 = arith.constant 0 : index
    %c0_139 = arith.constant 0 : index
    %513 = vector.load %arg6[%c0_138, %c0_139] : memref<2x8xi32, #tpu.memory_space<vmem>>, vector<2x8xi32>
    %514 = vector.shape_cast %513 : vector<2x8xi32> to vector<2x8x1xi32>
    %cst_140 = arith.constant dense<0xFF800000> : vector<2x8xf32>
    %515 = vector.multi_reduction <maximumf>, %511, %cst_140 [2] : vector<2x8x128xf32> to vector<2x8xf32>
    %516 = vector.shape_cast %515 : vector<2x8xf32> to vector<2x8x1xf32>
    %517 = vector.broadcast %516 : vector<2x8x1xf32> to vector<2x8x128xf32>
    %518 = arith.subf %511, %517 : vector<2x8x128xf32>
    %519 = math.exp %518 : vector<2x8x128xf32>
    %cst_141 = arith.constant dense<0.000000e+00> : vector<2x8xf32>
    %520 = vector.multi_reduction <add>, %519, %cst_141 [2] : vector<2x8x128xf32> to vector<2x8xf32>
    %521 = vector.shape_cast %520 : vector<2x8xf32> to vector<2x8x1xf32>
    %522 = math.log %521 : vector<2x8x1xf32>
    %523 = arith.addf %516, %522 : vector<2x8x1xf32>
    %524 = tpu.iota {dimensions = array<i32: 2>} : vector<2x8x128xi32>
    %525 = vector.broadcast %514 : vector<2x8x1xi32> to vector<2x8x128xi32>
    %526 = arith.cmpi eq, %524, %525 : vector<2x8x128xi32>
    %cst_142 = arith.constant 0.000000e+00 : f32
    %527 = vector.broadcast %cst_142 : f32 to vector<2x8x128xf32>
    %528 = arith.select %526, %511, %527 : vector<2x8x128xi1>, vector<2x8x128xf32>
    %cst_143 = arith.constant dense<0.000000e+00> : vector<2x8xf32>
    %529 = vector.multi_reduction <add>, %528, %cst_143 [2] : vector<2x8x128xf32> to vector<2x8xf32>
    %530 = vector.shape_cast %529 : vector<2x8xf32> to vector<2x8x1xf32>
    %c-100_i32 = arith.constant -100 : i32
    %531 = vector.broadcast %c-100_i32 : i32 to vector<2x8x1xi32>
    %532 = arith.cmpi ne, %514, %531 : vector<2x8x1xi32>
    %533 = arith.extui %532 : vector<2x8x1xi1> to vector<2x8x1xi32>
    %534 = arith.sitofp %533 : vector<2x8x1xi32> to vector<2x8x1xf32>
    %535 = arith.subf %523, %530 : vector<2x8x1xf32>
    %536 = arith.mulf %535, %534 : vector<2x8x1xf32>
    %537 = vector.shape_cast %536 : vector<2x8x1xf32> to vector<16x1xf32>
    %cst_144 = arith.constant dense<0.000000e+00> : vector<1xf32>
    %538 = vector.multi_reduction <add>, %537, %cst_144 [0] : vector<16x1xf32> to vector<1xf32>
    %539 = vector.shape_cast %538 : vector<1xf32> to vector<1x1xf32>
    %540 = vector.shape_cast %534 : vector<2x8x1xf32> to vector<16x1xf32>
    %cst_145 = arith.constant dense<0.000000e+00> : vector<1xf32>
    %541 = vector.multi_reduction <add>, %540, %cst_145 [0] : vector<16x1xf32> to vector<1xf32>
    %542 = vector.shape_cast %541 : vector<1xf32> to vector<1x1xf32>
    %543 = arith.divf %539, %542 : vector<1x1xf32>
    %c0_146 = arith.constant 0 : index
    %c0_147 = arith.constant 0 : index
    %544 = vector.load %arg21[%c0_146, %c0_147] : memref<1x1xf32, #tpu.memory_space<vmem>>, vector<1x1xf32>
    tpu.vector_store %arg21[%c0_146, %c0_147], %543 {strides = array<i32>} : memref<1x1xf32, #tpu.memory_space<vmem>>, vector<1x1xf32>,
    return
  }
}

</mosaic_0001>

<bundles_post_ra>
// kernel: t5_forward.1
= control target key start
LH: loop header
LB: loop body
LE: loop exit
PB: predicated region body
PF: predicated region fallthrough
CT: control target
= control target key end

     0   :  { %s6292_s0 = inlined_call_operand.vmem [shape: f32[2,8,32], index: 0, kind: input, shape index: {}]   ;;  %s6293_s1 = inlined_call_operand.vmem [shape: f32[2,8,32], index: 1, kind: input, shape index: {}]   ;;  %s6294_s2 = inlined_call_operand.vmem [shape: f32[2,8], index: 2, kind: input, shape index: {}]   ;;  %s6295_s3 = inlined_call_operand.vmem [shape: f32[2,8], index: 3, kind: input, shape index: {}]   ;;  %s6296_s4 = inlined_call_operand.vmem [shape: f32[4,8,8], index: 4, kind: input, shape index: {}]   ;;  %s6297_s5 = inlined_call_operand.vmem [shape: f32[4,8,8], index: 5, kind: input, shape index: {}]   ;;  %s6298_s6 = inlined_call_operand.vmem [shape: s32[2,8], index: 6, kind: input, shape index: {}]   ;;  %s6299_s7 = inlined_call_operand.vmem [shape: f32[8,32], index: 7, kind: input, shape index: {}]   ;;  %s6300_s8 = inlined_call_operand.vmem [shape: bf16[32,96], index: 8, kind: input, shape index: {}]   ;;  %s6301_s9 = inlined_call_operand.vmem [shape: bf16[32,32], index: 9, kind: input, shape index: {}]   ;;  %s6302_s10 = inlined_call_operand.vmem [shape: bf16[32,64], index: 10, kind: input, shape index: {}]   ;;  %s6303_s11 = inlined_call_operand.vmem [shape: bf16[64,32], index: 11, kind: input, shape index: {}]   ;;  %s6304_s12 = inlined_call_operand.vmem [shape: bf16[32,96], index: 12, kind: input, shape index: {}]   ;;  %s6305_s13 = inlined_call_operand.vmem [shape: bf16[32,32], index: 13, kind: input, shape index: {}]   ;;  %s6306_s14 = inlined_call_operand.vmem [shape: bf16[32,32], index: 14, kind: input, shape index: {}]   ;;  %s6307_s15 = inlined_call_operand.vmem [shape: bf16[32,64], index: 15, kind: input, shape index: {}]   ;;  %s6308_s16 = inlined_call_operand.vmem [shape: bf16[32,32], index: 16, kind: input, shape index: {}]   ;;  %s6309_s17 = inlined_call_operand.vmem [shape: bf16[32,64], index: 17, kind: input, shape index: {}]   ;;  %s6310_s18 = inlined_call_operand.vmem [shape: bf16[64,32], index: 18, kind: input, shape index: {}]   ;;  %s6311_s19 = inlined_call_operand.vmem [shape: bf16[32,128], index: 19, kind: input, shape index: {}]   ;;  %s6312_s20 = inlined_call_operand.hbm [shape: f32[2,8,128], index: 20, kind: output, shape index: {0}]   ;;  %s6313_s21 = inlined_call_operand.hbm [shape: f32[1,1], index: 21, kind: output, shape index: {1}]  }
   0x1   :  { %6327 = sst [smem:[#allocation8_spill]] %s6292_s0 }
   0x2   :  { %6328 = sst [smem:[#allocation9_spill]] %s6293_s1 }
   0x3   :  { %6329 = sst [smem:[#allocation10_spill]] %s6294_s2 }
   0x4   :  { %6330 = sst [smem:[#allocation11_spill]] %s6295_s3 }
   0x5   :  { %6331 = sst [smem:[#allocation12_spill]] %s6296_s4 }
   0x6   :  { %6332 = sst [smem:[#allocation13_spill]] %s6297_s5 }
   0x7   :  { %27 = vsyncpa [#allocation3], 0  ;;  %s6333_s26 = sld [smem:[#allocation8_spill]]  ;;  %vm75_vm0 = vcmask 261120  }
   0xd   :  { %v5364_v0 = vld [vmem:[%s6333_s26] sm:$0xff]  ;;  %v5369_v1 = vld [vmem:[%s6333_s26 + $0x8] sm:$0xff] }
   0xe   :  { %v73_v2 = vmul.f32 %v5364_v0, %v5364_v0  ;;  %v74_v3 = vmul.f32 %v5369_v1, %v5369_v1 }
  0x10   :  { %v76_v4 = vsel %vm75_vm0, %v73_v2, 0.0  ;;  %v79_v5 = vsel %vm75_vm0, %v74_v3, 0.0 }
  0x11   :  { %77 = vadd.xlane.f32.xlu0 %v76_v4 }
  0x15   :  { %80 = vadd.xlane.f32.xlu0 %v79_v5 }
  0x16   :  { %28 = vsyncpa [#allocation5], 0  ;;  %v5031_v6 = vld [vmem:[%s6300_s8 + $0x8] sm:$0xff]   ;;  %v5233_v7 = vmov 0.0   ;;  %vm5234_vm1 = vmmov 0   ;;  %v5032_v8 = vld [vmem:[%s6300_s8] sm:$0xff]   ;;  %v91_v15 = vlaneseq }
  0x17   :  { %4573 = vmatprep.subr.bf16.mxu0 %v5233_v7  ;;  %4577 = vmatprep.mubr.msk.bf16.mxu0 %vm5234_vm1, %v5233_v7  ;;  %v5400_v19 = vld [vmem:[%s6299_s7] sm:$0xff]  ;;  %s5235_s5 = smov 96   ;;  %vm198_vm2 = vcmask 64512   ;;  %v5236_v37 = vmov 1966171168   ;;  %s6334_s1 = sld [smem:[#allocation10_spill]] }
  0x18   :  { %4574 = vmatpush3.bf16.msra.mxu0 %v5031_v6  ;;  %4581 = vmatprep.subr.bf16.mxu1 %v5233_v7  ;;  %v5392_v16 = vshrl.u32 %v91_v15, 7  ;;  %v178_v38 = vunpack.c.l.s4 %v5236_v37  ;;  %s6335_s25 = sld [smem:[#allocation12_spill]]  ;;  %s5237_s26 = smov 88   ;;  %vm334_vm3 = vcmask 1043456   ;;  %vm1408_vm4 = vcmask 523264  }
  0x19   :  { %4575 = vmatprep.subr.bf16.mxu0 %v5233_v7  ;;  %4583 = vmatprep.mubr.msk.bf16.mxu1 %vm5234_vm1, %v5233_v7  ;;  %s5238_s27 = smov 64   ;;  %s5239_s3 = smov 120  }
  0x1a   :  { %v5395_v17 = vsub.s32 0, %v5392_v16  ;;  %v179_v39 = vunpack.c.0.s8 %v178_v38  ;;  %s5240_s0 = smov 56   ;;  %s5241_s4 = smov 80  }
  0x1b   :  { %s5242_s8 = smov 112   ;;  %s6325_s29 = smov 48  }
  0x1c   :  { %4576 = vmatpush3.bf16.msra.mxu0 %v5032_v8  ;;  %v94_v21 = vrot.slane %v5400_v19, %v5395_v17  ;;  %v5430_v40 = vsub.s32 %v179_v39, %v5392_v16  ;;  %s6323_s30 = smov 72   ;;  %s6321_s22 = smov 104  }
  0x1d   :  { %4587 = vmatprep.subr.bf16.mxu0 %v5233_v7  ;;  %v4313_v41 = vld.sshfl [vmem:[%s6334_s1] sm:$0x11 pattern:$0x75316420]  ;;  %s6336_s28 = sld [smem:[#allocation9_spill]]  ;;  %s6339_s23 = smov 48  }
  0x1e   :  { %v183_v42 = vrot.slane %v4313_v41, %v5430_v40  ;;  %v176_v43 = vcombine.high %v4313_v41, %v4313_v41  ;;  %v159_v44 = vld [vmem:[%s6335_s25] sm:$0xff]  ;;  %s6337_s24 = sld [smem:[#allocation11_spill]] }
  0x20   :  { %v5440_v45 = vrot.slane %v183_v42, %v5395_v17  ;;  %v190_v46 = vrot.slane %v176_v43, %v5430_v40  ;;  %v160_v43 = vld [vmem:[%s6335_s25 + $0x8] sm:$0xff] }
  0x22   :  { %v5445_v51 = vrot.slane %v190_v46, %v5395_v17 }
  0x9a   :  { %v78_v9 = vpop.xlane.xlu0 %77 }
  0x9b   :  { %v83_v10 = vmul.f32 0.03125, %v78_v9 }
  0x9d   :  { %v85_v11 = vadd.f32 1e-06, %v83_v10 }
  0x9e   :  { %v81_v12 = vpop.xlane.xlu0 %80 }
  0x9f   :  { %5053 = vrsqrt.f32 %v85_v11  ;;  %v84_v13 = vmul.f32 0.03125, %v81_v12 }
  0xa1   :  { %v86_v14 = vadd.f32 1e-06, %v84_v13 }
  0xa3   :  { %5055 = vrsqrt.f32 %v86_v14 }
  0xac   :  { %v5054_v18 = vpop.eup %5053 }
  0xad   :  { %v89_v20 = vmul.f32 %v5054_v18, %v5364_v0 }
  0xaf   :  { %v95_v24 = vmul.f32 %v94_v21, %v89_v20 }
  0xb0   :  { %v5056_v22 = vpop.eup %5055 }
  0xb1   :  { %v90_v23 = vmul.f32 %v5056_v22, %v5369_v1 }
  0xb3   :  { %v96_v25 = vmul.f32 %v94_v21, %v90_v23 }
  0xb5   :  { %v97_v26 = vpack.c.bf16 %v96_v25, %v95_v24 }
  0xb7   :  { %4578 = vmatmul.mubr.msk.bf16.vlgmr.msra.gmra.mxu0 %vm75_vm0, %v97_v26 }
  0xb8   :  { %4589 = vmatprep.mubr.msk.bf16.mxu0 %vm5234_vm1, %v5233_v7 }
 0x177   :  { %v151_v27 = vpop.f32.mrf.mxu0 }
 0x178   :  { %v5409_v28 = vpack.c.bf16 %v151_v27, %v151_v27 }
 0x179   :  { %v4579_v29 = vpop.f32.mrf.mxu0 }
 0x17a   :  { %196 = vrot.lane.b32.xlu1 %v5409_v28, %s5235_s5 }
 0x17b   :  { %v154_v30 = vpop.f32.mrf.mxu0 }
 0x17c   :  { %v5413_v31 = vpack.c.bf16 %v154_v30, %v154_v30 }
 0x17d   :  { %v4580_v32 = vpop.f32.mrf.mxu0 }
 0x17e   :  { %245 = vrot.lane.b32.xlu1 %v5413_v31, %s5235_s5 }
 0x1ec   :  { %v197_v33 = vpop.permute.xlu1 %196 }
 0x1ed   :  { %v203_v34 = vsel %vm198_vm2, %v197_v33, 0 }
 0x1ee   :  { %4582 = vmatpush3.bf16.xpose.msra.mxu1 %v203_v34 }
 0x1ef   :  { %4593 = vmatprep.subr.bf16.mxu1 %v5233_v7 }
 0x1f0   :  { %v246_v35 = vpop.permute.xlu1 %245 }
 0x1f1   :  { %v251_v36 = vsel %vm198_vm2, %v246_v35, 0 }
 0x1f2   :  { %4588 = vmatpush3.bf16.xpose.msra.mxu0 %v251_v36 }
 0x1f3   :  { %4599 = vmatprep.subr.bf16.mxu0 %v5233_v7 }
 0x1f5   :  { %4584 = vmatmul.mubr.msk.bf16.vlgmr.msra.gmra.mxu1 %vm198_vm2, %v5409_v28 }
 0x1f6   :  { %4595 = vmatprep.mubr.msk.bf16.mxu1 %vm5234_vm1, %v5233_v7 }
 0x1f9   :  { %4590 = vmatmul.mubr.msk.bf16.vlgmr.msra.gmra.mxu0 %vm198_vm2, %v5413_v31 }
 0x1fa   :  { %4601 = vmatprep.mubr.msk.bf16.mxu0 %vm5234_vm1, %v5233_v7 }
 0x2b5   :  { %v239_v47 = vpop.f32.mrf.mxu1 }
 0x2b6   :  { %v240_v48 = vadd.f32 %v239_v47, %v159_v44 }
 0x2b7   :  { %v4585_v49 = vpop.f32.mrf.mxu1 }
 0x2b8   :  { %v303_v50 = vadd.f32 %v5440_v45, %v240_v48 }
 0x2b9   :  { %v242_v52 = vpop.f32.mrf.mxu1  ;;  %v287_v53 = vpop.f32.mrf.mxu0 }
 0x2ba   :  { %v288_v54 = vadd.f32 %v287_v53, %v159_v44  ;;  %v305_v55 = vsel %vm198_vm2, %v303_v50, -inf }
 0x2bb   :  { %306 = vmax.xlane.f32.xlu0 %v305_v55  ;;  %v4586_v56 = vpop.f32.mrf.mxu1  ;;  %v4591_v57 = vpop.f32.mrf.mxu0 }
 0x2bc   :  { %v304_v58 = vadd.f32 %v5445_v51, %v288_v54 }
 0x2bd   :  { %v290_v59 = vpop.f32.mrf.mxu0 }
 0x2be   :  { %v308_v60 = vsel %vm198_vm2, %v304_v58, -inf }
 0x2bf   :  { %309 = vmax.xlane.f32.xlu1 %v308_v60  ;;  %v4592_v61 = vpop.f32.mrf.mxu0 }
 0x2d0   :  { %429 = vrot.lane.b32.xlu1 %v5409_v28, %s5237_s26 }
 0x2d1   :  { %329 = vrot.lane.b32.xlu0 %v5409_v28, %s5238_s27 }
 0x2d5   :  { %378 = vrot.lane.b32.xlu0 %v5413_v31, %s5238_s27 }
 0x344   :  { %v307_v62 = vpop.xlane.xlu0 %306 }
 0x345   :  { %v311_v63 = vsub.f32 %v303_v50, %v307_v62 }
 0x347   :  { %v313_v2 = vmul.f32 1.442695, %v311_v63 }
 0x348   :  { %v330_v3 = vpop.permute.xlu0 %329  ;;  %v310_v4 = vpop.xlane.xlu1 %309 }
 0x349   :  { %5057 = vpow2.f32 %v313_v2  ;;  %v336_v5 = vsel %vm334_vm3, %v330_v3, 0  ;;  %v312_v6 = vsub.f32 %v304_v58, %v310_v4 }
 0x34a   :  { %4594 = vmatpush3.bf16.msra.mxu1 %v336_v5 }
 0x34b   :  { %v315_v8 = vmul.f32 1.442695, %v312_v6  ;;  %4605 = vmatprep.subr.bf16.mxu1 %v5233_v7 }
 0x34c   :  { %v379_v9 = vpop.permute.xlu0 %378  ;;  %v430_v23 = vpop.permute.xlu1 %429 }
 0x34d   :  { %5059 = vpow2.f32 %v315_v8  ;;  %v384_v10 = vsel %vm334_vm3, %v379_v9, 0  ;;  %v435_v27 = vsel %vm198_vm2, %v430_v23, 0 }
 0x34e   :  { %4600 = vmatpush3.bf16.msra.mxu0 %v384_v10 }
 0x34f   :  { %4611 = vmatprep.subr.bf16.mxu0 %v5233_v7 }
 0x356   :  { %v5058_v11 = vpop.eup %5057 }
 0x357   :  { %v317_v12 = vsel %vm198_vm2, %v5058_v11, 0.0 }
 0x358   :  { %318 = vadd.xlane.f32.xlu0 %v317_v12 }
 0x35a   :  { %v5060_v13 = vpop.eup %5059 }
 0x35b   :  { %v320_v14 = vsel %vm198_vm2, %v5060_v13, 0.0 }
 0x35c   :  { %321 = vadd.xlane.f32.xlu0 %v320_v14 }
 0x372   :  { %479 = vrot.lane.b32.xlu0 %v5413_v31, %s5237_s26 }
 0x376   :  { %427 = vrot.lane.b32.xlu0 %v5409_v28, %s5239_s3 }
 0x37a   :  { %477 = vrot.lane.b32.xlu0 %v5413_v31, %s5239_s3 }
 0x3e1   :  { %v319_v18 = vpop.xlane.xlu0 %318 }
 0x3e2   :  { %5061 = vrcp.f32 %v319_v18 }
 0x3e5   :  { %v322_v20 = vpop.xlane.xlu0 %321 }
 0x3e6   :  { %5063 = vrcp.f32 %v322_v20 }
 0x3e9   :  { %v480_v26 = vpop.permute.xlu0 %479 }
 0x3ea   :  { %v485_v32 = vsel %vm198_vm2, %v480_v26, 0 }
 0x3ed   :  { %v428_v33 = vpop.permute.xlu0 %427 }
 0x3ef   :  { %v5062_v21 = vpop.eup %5061 }
 0x3f0   :  { %v325_v22 = vmul.f32 %v5062_v21, %v5058_v11 }
 0x3f1   :  { %v478_v34 = vpop.permute.xlu0 %477 }
 0x3f2   :  { %v327_v24 = vpack.c.bf16 %v325_v22, %v325_v22 }
 0x3f3   :  { %v5064_v25 = vpop.eup %5063 }
 0x3f4   :  { %4596 = vmatmul.mubr.msk.bf16.vlgmr.msra.gmra.mxu1 %vm198_vm2, %v327_v24  ;;  %v326_v29 = vmul.f32 %v5064_v25, %v5060_v13  ;;  %v163_v25 = vld [vmem:[%s6301_s9] sm:$0xf] }
 0x3f5   :  { %4606 = vmatpush3.bf16.xpose.msra.mxu1 %v435_v27  ;;  %4607 = vmatprep.mubr.msk.bf16.mxu1 %vm5234_vm1, %v5233_v7 }
 0x3f6   :  { %v328_v30 = vpack.c.bf16 %v326_v29, %v326_v29  ;;  %4617 = vmatprep.subr.bf16.mxu1 %v5233_v7  ;;  %v701_v29 = vsel %vm334_vm3, %v163_v25, 0 }
 0x3f8   :  { %4602 = vmatmul.mubr.msk.bf16.vlgmr.msra.gmra.mxu0 %vm198_vm2, %v328_v30 }
 0x3f9   :  { %4612 = vmatpush3.bf16.xpose.msra.mxu0 %v485_v32  ;;  %4613 = vmatprep.mubr.msk.bf16.mxu0 %vm5234_vm1, %v5233_v7 }
 0x3fa   :  { %4623 = vmatprep.subr.bf16.mxu0 %v5233_v7 }
 0x3fc   :  { %4608 = vmatmul.mubr.msk.bf16.vlgmr.msra.gmra.mxu1 %vm198_vm2, %v428_v33 }
 0x3fd   :  { %4619 = vmatprep.mubr.msk.bf16.mxu1 %vm5234_vm1, %v5233_v7 }
 0x400   :  { %4614 = vmatmul.mubr.msk.bf16.vlgmr.msra.gmra.mxu0 %vm198_vm2, %v478_v34 }
 0x401   :  { %4625 = vmatprep.mubr.msk.bf16.mxu0 %vm5234_vm1, %v5233_v7 }
 0x4b4   :  { %v5484_v35 = vpop.f32.mrf.mxu1 }
 0x4b6   :  { %v4597_v36 = vpop.f32.mrf.mxu1 }
 0x4b7   :  { %v164_v36 = vld [vmem:[%s6301_s9 + $0x4] sm:$0xf] }
 0x4b8   :  { %v375_v37 = vpop.f32.mrf.mxu1  ;;  %v5486_v38 = vpop.f32.mrf.mxu0 }
 0x4b9   :  { %v426_v39 = vpack.c.bf16 %v5486_v38, %v5484_v35  ;;  %v654_v35 = vsel %vm334_vm3, %v164_v36, 0 }
 0x4ba   :  { %v4598_v41 = vpop.f32.mrf.mxu1  ;;  %v4603_v42 = vpop.f32.mrf.mxu0 }
 0x4bc   :  { %v423_v44 = vpop.f32.mrf.mxu0  ;;  %v471_v46 = vpop.f32.mrf.mxu1 }
 0x4bd   :  { %v472_v47 = vadd.f32 %v471_v46, %v160_v43 }
 0x4be   :  { %v4604_v48 = vpop.f32.mrf.mxu0  ;;  %v4609_v49 = vpop.f32.mrf.mxu1 }
 0x4bf   :  { %v527_v50 = vadd.f32 %v472_v47, %v5440_v45 }
 0x4c0   :  { %v474_v52 = vpop.f32.mrf.mxu1  ;;  %v521_v53 = vpop.f32.mrf.mxu0 }
 0x4c1   :  { %v522_v54 = vadd.f32 %v521_v53, %v160_v43  ;;  %v529_v55 = vsel %vm198_vm2, %v527_v50, -inf }
 0x4c2   :  { %530 = vmax.xlane.f32.xlu0 %v529_v55  ;;  %v4610_v56 = vpop.f32.mrf.mxu1  ;;  %v4615_v57 = vpop.f32.mrf.mxu0  ;;  %v161_v55 = vld [vmem:[%s6335_s25 + $0x10] sm:$0xff] }
 0x4c3   :  { %v528_v58 = vadd.f32 %v522_v54, %v5445_v51 }
 0x4c4   :  { %v524_v59 = vpop.f32.mrf.mxu0 }
 0x4c5   :  { %v532_v60 = vsel %vm198_vm2, %v528_v58, -inf }
 0x4c6   :  { %533 = vmax.xlane.f32.xlu1 %v532_v60  ;;  %v4616_v61 = vpop.f32.mrf.mxu0 }
 0x4d7   :  { %601 = vrot.lane.b32.xlu1 %v5413_v31, %s5240_s0 }
 0x4db   :  { %746 = vrot.lane.b32.xlu1 %v5409_v28, %s5241_s4 }
 0x4df   :  { %796 = vrot.lane.b32.xlu1 %v5413_v31, %s5241_s4 }
 0x4e3   :  { %794 = vrot.lane.b32.xlu1 %v5413_v31, %s5242_s8 }
 0x54b   :  { %v531_v62 = vpop.xlane.xlu0 %530 }
 0x54c   :  { %v535_v63 = vsub.f32 %v527_v50, %v531_v62 }
 0x54e   :  { %v537_v2 = vmul.f32 1.442695, %v535_v63 }
 0x54f   :  { %v534_v3 = vpop.xlane.xlu1 %533 }
 0x550   :  { %5065 = vpow2.f32 %v537_v2  ;;  %v536_v4 = vsub.f32 %v528_v58, %v534_v3 }
 0x552   :  { %v539_v5 = vmul.f32 1.442695, %v536_v4 }
 0x553   :  { %v602_v6 = vpop.permute.xlu1 %601 }
 0x554   :  { %5067 = vpow2.f32 %v539_v5  ;;  %v607_v8 = vsel %vm334_vm3, %v602_v6, 0 }
 0x555   :  { %4624 = vmatpush3.bf16.msra.mxu0 %v607_v8 }
 0x556   :  { %4635 = vmatprep.subr.bf16.mxu0 %v5233_v7 }
 0x557   :  { %v747_v30 = vpop.permute.xlu1 %746 }
 0x558   :  { %v752_v46 = vsel %vm198_vm2, %v747_v30, 0 }
 0x55b   :  { %v797_v32 = vpop.permute.xlu1 %796 }
 0x55c   :  { %v802_v33 = vsel %vm198_vm2, %v797_v32, 0 }
 0x55d   :  { %v5066_v9 = vpop.eup %5065 }
 0x55e   :  { %v541_v10 = vsel %vm198_vm2, %v5066_v9, 0.0 }
 0x55f   :  { %542 = vadd.xlane.f32.xlu0 %v541_v10  ;;  %v795_v34 = vpop.permute.xlu1 %794 }
 0x561   :  { %v5068_v11 = vpop.eup %5067 }
 0x562   :  { %v544_v12 = vsel %vm198_vm2, %v5068_v11, 0.0 }
 0x563   :  { %545 = vadd.xlane.f32.xlu0 %v544_v12 }
 0x579   :  { %553 = vrot.lane.b32.xlu0 %v5409_v28, %s5240_s0 }
 0x57d   :  { %744 = vrot.lane.b32.xlu0 %v5409_v28, %s5242_s8 }
 0x5e8   :  { %v543_v13 = vpop.xlane.xlu0 %542 }
 0x5e9   :  { %5069 = vrcp.f32 %v543_v13 }
 0x5ec   :  { %v546_v14 = vpop.xlane.xlu0 %545 }
 0x5ed   :  { %5071 = vrcp.f32 %v546_v14 }
 0x5f0   :  { %v554_v18 = vpop.permute.xlu0 %553 }
 0x5f1   :  { %v559_v20 = vsel %vm334_vm3, %v554_v18, 0 }
 0x5f2   :  { %4618 = vmatpush3.bf16.msra.mxu1 %v559_v20 }
 0x5f3   :  { %4629 = vmatprep.subr.bf16.mxu1 %v5233_v7 }
 0x5f4   :  { %v745_v50 = vpop.permute.xlu0 %744 }
 0x5f6   :  { %v5070_v21 = vpop.eup %5069 }
 0x5f7   :  { %v549_v22 = vmul.f32 %v5070_v21, %v5066_v9 }
 0x5f9   :  { %v551_v23 = vpack.c.bf16 %v549_v22, %v549_v22 }
 0x5fa   :  { %v5072_v24 = vpop.eup %5071 }
 0x5fb   :  { %4620 = vmatmul.mubr.msk.bf16.vlgmr.msra.gmra.mxu1 %vm198_vm2, %v551_v23  ;;  %v550_v26 = vmul.f32 %v5072_v24, %v5068_v11 }
 0x5fc   :  { %4631 = vmatprep.mubr.msk.bf16.mxu1 %vm5234_vm1, %v5233_v7  ;;  %4630 = vmatpush3.bf16.msra.mxu1 %v654_v35 }
 0x5fd   :  { %v552_v27 = vpack.c.bf16 %v550_v26, %v550_v26  ;;  %4641 = vmatprep.subr.bf16.mxu1 %v5233_v7 }
 0x5ff   :  { %4626 = vmatmul.mubr.msk.bf16.vlgmr.msra.gmra.mxu0 %vm198_vm2, %v552_v27 }
 0x600   :  { %4636 = vmatpush3.bf16.msra.mxu0 %v701_v29  ;;  %4637 = vmatprep.mubr.msk.bf16.mxu0 %vm5234_vm1, %v5233_v7 }
 0x601   :  { %4647 = vmatprep.subr.bf16.mxu0 %v5233_v7 }
 0x607   :  { %4638 = vmatmul.mubr.msk.bf16.vlgmr.msra.gmra.mxu0 %vm198_vm2, %v426_v39 }
 0x608   :  { %4648 = vmatpush3.bf16.xpose.msra.mxu0 %v802_v33  ;;  %4649 = vmatprep.mubr.msk.bf16.mxu0 %vm5234_vm1, %v5233_v7 }
 0x609   :  { %4659 = vmatprep.subr.bf16.mxu0 %v5233_v7 }
 0x60f   :  { %4650 = vmatmul.mubr.msk.bf16.vlgmr.msra.gmra.mxu0 %vm198_vm2, %v795_v34 }
 0x610   :  { %4661 = vmatprep.mubr.msk.bf16.mxu0 %vm5234_vm1, %v5233_v7 }
 0x6bb   :  { %v595_v37 = vpop.f32.mrf.mxu1 }
 0x6bd   :  { %v4621_v38 = vpop.f32.mrf.mxu1 }
 0x6bf   :  { %v598_v39 = vpop.f32.mrf.mxu1  ;;  %v643_v41 = vpop.f32.mrf.mxu0 }
 0x6c0   :  { %v649_v42 = vpack.c.bf16 %v643_v41, %v595_v37 }
 0x6c1   :  { %v4622_v43 = vpop.f32.mrf.mxu1  ;;  %v4627_v44 = vpop.f32.mrf.mxu0 }
 0x6c2   :  { %4632 = vmatmul.mubr.msk.bf16.vlgmr.msra.gmra.mxu1 %vm198_vm2, %v649_v42 }
 0x6c3   :  { %4642 = vmatpush3.bf16.xpose.msra.mxu1 %v752_v46  ;;  %v646_v47 = vpop.f32.mrf.mxu0  ;;  %4643 = vmatprep.mubr.msk.bf16.mxu1 %vm5234_vm1, %v5233_v7 }
 0x6c4   :  { %4653 = vmatprep.subr.bf16.mxu1 %v5233_v7 }
 0x6c5   :  { %v4628_v48 = vpop.f32.mrf.mxu0 }
 0x6c7   :  { %v5547_v49 = vpop.f32.mrf.mxu0 }
 0x6c9   :  { %v4639_v52 = vpop.f32.mrf.mxu0 }
 0x6ca   :  { %4644 = vmatmul.mubr.msk.bf16.vlgmr.msra.gmra.mxu1 %vm198_vm2, %v745_v50  ;;  %v165_v52 = vld [vmem:[%s6301_s9 + $0x8] sm:$0xf] }
 0x6cb   :  { %v5550_v53 = vpop.f32.mrf.mxu0  ;;  %4655 = vmatprep.mubr.msk.bf16.mxu1 %vm5234_vm1, %v5233_v7 }
 0x6cd   :  { %v4640_v54 = vpop.f32.mrf.mxu0 }
 0x6ce   :  { %v971_v54 = vsel %vm334_vm3, %v165_v52, 0 }
 0x6cf   :  { %v838_v56 = vpop.f32.mrf.mxu0 }
 0x6d0   :  { %v839_v57 = vadd.f32 %v838_v56, %v161_v55 }
 0x6d1   :  { %v4651_v58 = vpop.f32.mrf.mxu0 }
 0x6d2   :  { %v845_v59 = vadd.f32 %v839_v57, %v5445_v51 }
 0x6d3   :  { %v841_v60 = vpop.f32.mrf.mxu0 }
 0x6d4   :  { %v849_v61 = vsel %vm198_vm2, %v845_v59, -inf }
 0x6d5   :  { %850 = vmax.xlane.f32.xlu1 %v849_v61  ;;  %v4652_v62 = vpop.f32.mrf.mxu0 }
 0x6e6   :  { %918 = vrot.lane.b32.xlu1 %v5413_v31, %s6325_s29 }
 0x6ea   :  { %1018 = vrot.lane.b32.xlu1 %v5409_v28, %s6323_s30 }
 0x6ee   :  { %1068 = vrot.lane.b32.xlu1 %v5413_v31, %s6323_s30  ;;  %s6338_s30 = sld [smem:[#allocation13_spill]] }
 0x6f2   :  { %1066 = vrot.lane.b32.xlu1 %v5413_v31, %s6321_s22 }
 0x75e   :  { %v851_v63 = vpop.xlane.xlu1 %850 }
 0x75f   :  { %v853_v4 = vsub.f32 %v845_v59, %v851_v63 }
 0x761   :  { %v856_v5 = vmul.f32 1.442695, %v853_v4 }
 0x762   :  { %v919_v2 = vpop.permute.xlu1 %918 }
 0x763   :  { %v924_v3 = vsel %vm334_vm3, %v919_v2, 0  ;;  %5073 = vpow2.f32 %v856_v5 }
 0x764   :  { %4660 = vmatpush3.bf16.msra.mxu0 %v924_v3 }
 0x765   :  { %4671 = vmatprep.subr.bf16.mxu0 %v5233_v7 }
 0x766   :  { %v1019_v34 = vpop.permute.xlu1 %1018 }
 0x767   :  { %v1024_v35 = vsel %vm198_vm2, %v1019_v34, 0 }
 0x76a   :  { %v1069_v63 = vpop.permute.xlu1 %1068 }
 0x76b   :  { %v1074_v5 = vsel %vm198_vm2, %v1069_v63, 0 }
 0x770   :  { %v5074_v21 = vpop.eup %5073 }
 0x771   :  { %v861_v23 = vsel %vm198_vm2, %v5074_v21, 0.0 }
 0x782   :  { %v5569_v6 = vpop.f32.mrf.mxu1 }
 0x784   :  { %v4633_v8 = vpop.f32.mrf.mxu1 }
 0x786   :  { %v5571_v9 = vpop.f32.mrf.mxu1 }
 0x788   :  { %v4634_v10 = vpop.f32.mrf.mxu1 }
 0x789   :  { %v1067_v10 = vpop.permute.xlu1 %1066 }
 0x78a   :  { %v788_v11 = vpop.f32.mrf.mxu1 }
 0x78b   :  { %v789_v12 = vadd.f32 %v788_v11, %v161_v55  ;;  %v162_v55 = vld [vmem:[%s6335_s25 + $0x18] sm:$0xff]  ;;  %s6319_s25 = smov 40  }
 0x78c   :  { %v4645_v13 = vpop.f32.mrf.mxu1 }
 0x78d   :  { %v844_v14 = vadd.f32 %v789_v12, %v5440_v45 }
 0x78e   :  { %v791_v18 = vpop.f32.mrf.mxu1 }
 0x78f   :  { %v846_v20 = vsel %vm198_vm2, %v844_v14, -inf }
 0x790   :  { %847 = vmax.xlane.f32.xlu0 %v846_v20  ;;  %v4646_v22 = vpop.f32.mrf.mxu1  ;;  %v738_v20 = vadd.f32 %v5547_v49, %v5569_v6 }
 0x794   :  { %862 = vadd.xlane.f32.xlu0 %v861_v23 }
 0x819   :  { %v848_v24 = vpop.xlane.xlu0 %847 }
 0x81a   :  { %v852_v25 = vsub.f32 %v844_v14, %v848_v24  ;;  %v741_v24 = vadd.f32 %v5550_v53, %v5571_v9 }
 0x81c   :  { %v854_v26 = vmul.f32 1.442695, %v852_v25 }
 0x81d   :  { %v863_v27 = vpop.xlane.xlu0 %862 }
 0x81e   :  { %5075 = vpow2.f32 %v854_v26 }
 0x81f   :  { %5077 = vrcp.f32 %v863_v27 }
 0x82b   :  { %v5076_v29 = vpop.eup %5075 }
 0x82c   :  { %v5078_v30 = vpop.eup %5077  ;;  %v858_v32 = vsel %vm198_vm2, %v5076_v29, 0.0 }
 0x82d   :  { %859 = vadd.xlane.f32.xlu0 %v858_v32  ;;  %v867_v33 = vmul.f32 %v5078_v30, %v5074_v21 }
 0x82f   :  { %v869_v36 = vpack.c.bf16 %v867_v33, %v867_v33 }
 0x831   :  { %4662 = vmatmul.mubr.msk.bf16.vlgmr.msra.gmra.mxu0 %vm198_vm2, %v869_v36 }
 0x832   :  { %4672 = vmatpush3.bf16.xpose.msra.mxu0 %v1024_v35  ;;  %4673 = vmatprep.mubr.msk.bf16.mxu0 %vm5234_vm1, %v5233_v7 }
 0x833   :  { %4683 = vmatprep.subr.bf16.mxu0 %v5233_v7 }
 0x843   :  { %870 = vrot.lane.b32.xlu0 %v5409_v28, %s6325_s29 }
 0x847   :  { %1016 = vrot.lane.b32.xlu0 %v5409_v28, %s6321_s22 }
 0x8b6   :  { %v860_v37 = vpop.xlane.xlu0 %859 }
 0x8b7   :  { %5079 = vrcp.f32 %v860_v37 }
 0x8ba   :  { %v871_v38 = vpop.permute.xlu0 %870 }
 0x8bb   :  { %v876_v39 = vsel %vm334_vm3, %v871_v38, 0 }
 0x8bc   :  { %4654 = vmatpush3.bf16.msra.mxu1 %v876_v39 }
 0x8bd   :  { %4665 = vmatprep.subr.bf16.mxu1 %v5233_v7 }
 0x8be   :  { %v1017_v41 = vpop.permute.xlu0 %1016 }
 0x8bf   :  { %4674 = vmatmul.mubr.msk.bf16.vlgmr.msra.gmra.mxu0 %vm198_vm2, %v1017_v41 }
 0x8c0   :  { %4685 = vmatprep.mubr.msk.bf16.mxu0 %vm5234_vm1, %v5233_v7 }
 0x8c4   :  { %v5080_v42 = vpop.eup %5079 }
 0x8c5   :  { %v866_v43 = vmul.f32 %v5080_v42, %v5076_v29 }
 0x8c7   :  { %v868_v44 = vpack.c.bf16 %v866_v43, %v866_v43 }
 0x8c9   :  { %4656 = vmatmul.mubr.msk.bf16.vlgmr.msra.gmra.mxu1 %vm198_vm2, %v868_v44 }
 0x8ca   :  { %4667 = vmatprep.mubr.msk.bf16.mxu1 %vm5234_vm1, %v5233_v7  ;;  %4666 = vmatpush3.bf16.msra.mxu1 %v971_v54 }
 0x8cb   :  { %4677 = vmatprep.subr.bf16.mxu1 %v5233_v7 }
 0x8f1   :  { %v960_v46 = vpop.f32.mrf.mxu0 }
 0x8f3   :  { %v4663_v47 = vpop.f32.mrf.mxu0 }
 0x8f5   :  { %v963_v48 = vpop.f32.mrf.mxu0 }
 0x8f7   :  { %v4664_v50 = vpop.f32.mrf.mxu0 }
 0x8f8   :  { %v166_v50 = vld [vmem:[%s6301_s9 + $0xc] sm:$0xf] }
 0x8f9   :  { %v1243_v52 = vsel %vm334_vm3, %v166_v50, 0  ;;  %v5035_v50 = vld [vmem:[%s6304_s12 + $0x8] sm:$0xff]  }
 0x97f   :  { %v1060_v56 = vpop.f32.mrf.mxu0 }
 0x980   :  { %v1061_v57 = vadd.f32 %v1060_v56, %v162_v55 }
 0x981   :  { %v4675_v58 = vpop.f32.mrf.mxu0 }
 0x982   :  { %v1116_v59 = vadd.f32 %v1061_v57, %v5440_v45 }
 0x983   :  { %v1063_v60 = vpop.f32.mrf.mxu0 }
 0x984   :  { %v1118_v61 = vsel %vm198_vm2, %v1116_v59, -inf }
 0x985   :  { %1119 = vmax.xlane.f32.xlu0 %v1118_v61  ;;  %v4676_v62 = vpop.f32.mrf.mxu0 }
 0x989   :  { %v912_v2 = vpop.f32.mrf.mxu1 }
 0x98a   :  { %v966_v3 = vpack.c.bf16 %v960_v46, %v912_v2 }
 0x98b   :  { %v4657_v4 = vpop.f32.mrf.mxu1 }
 0x98c   :  { %4668 = vmatmul.mubr.msk.bf16.vlgmr.msra.gmra.mxu1 %vm198_vm2, %v966_v3  ;;  %v1479_v4 = vld [vmem:[%s6336_s28 + $0x8] sm:$0xff] }
 0x98d   :  { %4678 = vmatpush3.bf16.xpose.msra.mxu1 %v1074_v5  ;;  %v915_v8 = vpop.f32.mrf.mxu1  ;;  %4679 = vmatprep.mubr.msk.bf16.mxu1 %vm5234_vm1, %v5233_v7 }
 0x98e   :  { %4689 = vmatprep.subr.bf16.mxu1 %v5233_v7 }
 0x98f   :  { %v4658_v45 = vpop.f32.mrf.mxu1 }
 0x994   :  { %4680 = vmatmul.mubr.msk.bf16.vlgmr.msra.gmra.mxu1 %vm198_vm2, %v1067_v10 }
 0x995   :  { %4691 = vmatprep.mubr.msk.bf16.mxu1 %vm5234_vm1, %v5233_v7 }
 0xa0e   :  { %v1120_v11 = vpop.xlane.xlu0 %1119 }
 0xa0f   :  { %v1124_v12 = vsub.f32 %v1116_v59, %v1120_v11  ;;  %v1481_v11 = vmul.f32 %v1479_v4, %v1479_v4 }
 0xa11   :  { %v1126_v13 = vmul.f32 1.442695, %v1124_v12 }
 0xa13   :  { %5081 = vpow2.f32 %v1126_v13  ;;  %v5656_v13 = vld [vmem:[%s6336_s28] sm:$0xff] }
 0xa20   :  { %v5082_v14 = vpop.eup %5081 }
 0xa21   :  { %v1130_v18 = vsel %vm198_vm2, %v5082_v14, 0.0 }
 0xa22   :  { %1131 = vadd.xlane.f32.xlu0 %v1130_v18 }
 0xa4c   :  { %v1007_v21 = vpop.f32.mrf.mxu1 }
 0xa4d   :  { %v1014_v22 = vadd.f32 %v1007_v21, %v738_v20  ;;  %v1485_v20 = vsel %vm75_vm0, %v1481_v11, 0.0  ;;  %v1480_v21 = vmul.f32 %v5656_v13, %v5656_v13 }
 0xa4e   :  { %v4669_v23 = vpop.f32.mrf.mxu1 }
 0xa4f   :  { %v1482_v23 = vsel %vm75_vm0, %v1480_v21, 0.0 }
 0xa50   :  { %v1010_v25 = vpop.f32.mrf.mxu1 }
 0xa51   :  { %v5617_v26 = vadd.f32 %v1010_v25, %v741_v24  ;;  %v5034_v24 = vld [vmem:[%s6302_s10] sm:$0xff]   ;;  %v5037_v25 = vld [vmem:[%s6303_s11 + $0x18] sm:$0xff]  }
 0xa52   :  { %v4670_v27 = vpop.f32.mrf.mxu1 }
 0xa54   :  { %v1110_v29 = vpop.f32.mrf.mxu1 }
 0xa55   :  { %v1111_v30 = vadd.f32 %v1110_v29, %v162_v55 }
 0xa56   :  { %v4681_v32 = vpop.f32.mrf.mxu1 }
 0xa57   :  { %v1117_v33 = vadd.f32 %v1111_v30, %v5445_v51 }
 0xa58   :  { %v1113_v34 = vpop.f32.mrf.mxu1 }
 0xa59   :  { %v1121_v36 = vsel %vm198_vm2, %v1117_v33, -inf }
 0xa5a   :  { %1122 = vmax.xlane.f32.xlu1 %v1121_v36  ;;  %v4682_v49 = vpop.f32.mrf.mxu1 }
 0xa6b   :  { %1190 = vrot.lane.b32.xlu1 %v5413_v31, %s6319_s25 }
 0xaab   :  { %v1132_v39 = vpop.xlane.xlu0 %1131 }
 0xae3   :  { %v1123_v6 = vpop.xlane.xlu1 %1122 }
 0xae4   :  { %v1125_v53 = vsub.f32 %v1117_v33, %v1123_v6 }
 0xae6   :  { %v1128_v9 = vmul.f32 1.442695, %v1125_v53 }
 0xae7   :  { %v1191_v35 = vpop.permute.xlu1 %1190 }
 0xae8   :  { %5083 = vpow2.f32 %v1128_v9  ;;  %v1196_v37 = vsel %vm334_vm3, %v1191_v35, 0 }
 0xae9   :  { %4690 = vmatpush3.bf16.msra.mxu1 %v1196_v37  ;;  %5085 = vrcp.f32 %v1132_v39  ;;  %v1308_v37 = vsub.s32 1, %v5392_v16 }
 0xaea   :  { %4701 = vmatprep.subr.bf16.mxu1 %v5233_v7 }
 0xaeb   :  { %v1309_v39 = vrot.slane %v5400_v19, %v1308_v37 }
 0xaf5   :  { %v5084_v51 = vpop.eup %5083 }
 0xaf6   :  { %v1133_v38 = vsel %vm198_vm2, %v5084_v51, 0.0  ;;  %v5086_v31 = vpop.eup %5085 }
 0xaf7   :  { %1134 = vadd.xlane.f32.xlu0 %v1133_v38  ;;  %v1138_v42 = vmul.f32 %v5086_v31, %v5082_v14  ;;  %v1498_v31 = vsub.s32 3, %v5392_v16 }
 0xaf9   :  { %v1140_v46 = vpack.c.bf16 %v1138_v42, %v1138_v42 }
 0xb0d   :  { %1142 = vrot.lane.b32.xlu0 %v5409_v28, %s6319_s25 }
 0xb80   :  { %v1135_v41 = vpop.xlane.xlu0 %1134 }
 0xb81   :  { %5087 = vrcp.f32 %v1135_v41 }
 0xb84   :  { %v1143_v43 = vpop.permute.xlu0 %1142 }
 0xb85   :  { %v1148_v44 = vsel %vm334_vm3, %v1143_v43, 0 }
 0xb86   :  { %4684 = vmatpush3.bf16.msra.mxu0 %v1148_v44 }
 0xb87   :  { %4695 = vmatprep.subr.bf16.mxu0 %v5233_v7 }
 0xb89   :  { %4686 = vmatmul.mubr.msk.bf16.vlgmr.msra.gmra.mxu0 %vm198_vm2, %v1140_v46 }
 0xb8a   :  { %4697 = vmatprep.mubr.msk.bf16.mxu0 %vm5234_vm1, %v5233_v7  ;;  %4696 = vmatpush3.bf16.msra.mxu0 %v1243_v52 }
 0xb8b   :  { %4709 = vmatprep.subr.bf16.mxu0 %v5233_v7 }
 0xb8e   :  { %v5088_v47 = vpop.eup %5087 }
 0xb8f   :  { %v1139_v28 = vmul.f32 %v5088_v47, %v5084_v51 }
 0xb91   :  { %v1141_v48 = vpack.c.bf16 %v1139_v28, %v1139_v28  ;;  %v1499_v28 = vrot.slane %v5400_v19, %v1498_v31 }
 0xb93   :  { %4692 = vmatmul.mubr.msk.bf16.vlgmr.msra.gmra.mxu1 %vm198_vm2, %v1141_v48 }
 0xb94   :  { %4705 = vmatprep.mubr.msk.bf16.mxu1 %vm5234_vm1, %v5233_v7 }
 0xc49   :  { %v1184_v54 = vpop.f32.mrf.mxu0 }
 0xc4b   :  { %v4687_v55 = vpop.f32.mrf.mxu0 }
 0xc4d   :  { %v1187_v56 = vpop.f32.mrf.mxu0 }
 0xc4f   :  { %v4688_v57 = vpop.f32.mrf.mxu0 }
 0xc50   :  { %v5036_v57 = vld [vmem:[%s6304_s12] sm:$0xff]  }
 0xc53   :  { %v1232_v58 = vpop.f32.mrf.mxu1 }
 0xc54   :  { %v1238_v59 = vpack.c.bf16 %v1232_v58, %v1184_v54  ;;  %v5039_v58 = vld [vmem:[%s6303_s11 + $0x8] sm:$0xff]  }
 0xc55   :  { %v4693_v60 = vpop.f32.mrf.mxu1 }
 0xc56   :  { %4698 = vmatmul.mubr.msk.bf16.vlgmr.msra.gmra.mxu0 %vm198_vm2, %v1238_v59  ;;  %v5040_v59 = vld [vmem:[%s6303_s11] sm:$0xff]  }
 0xc57   :  { %v1235_v61 = vpop.f32.mrf.mxu1  ;;  %4717 = vmatprep.mubr.msk.bf16.mxu0 %vm5234_vm1, %v5233_v7  ;;  %4710 = vmatpush3.bf16.msra.mxu0 %v5037_v25 }
 0xc58   :  { %4711 = vmatprep.subr.bf16.mxu0 %v5233_v7 }
 0xc59   :  { %v4694_v62 = vpop.f32.mrf.mxu1 }
 0xd16   :  { %v1279_v63 = vpop.f32.mrf.mxu0 }
 0xd17   :  { %v1286_v2 = vadd.f32 %v1279_v63, %v1014_v22 }
 0xd18   :  { %v4699_v3 = vpop.f32.mrf.mxu0 }
 0xd19   :  { %v5648_v5 = vadd.f32 %v1286_v2, %v5364_v0 }
 0xd1a   :  { %v1282_v8 = vpop.f32.mrf.mxu0 }
 0xd1b   :  { %v1287_v45 = vadd.f32 %v1282_v8, %v5617_v26  ;;  %v1290_v10 = vmul.f32 %v5648_v5, %v5648_v5  ;;  %v5038_v26 = vld [vmem:[%s6303_s11 + $0x10] sm:$0xff]  }
 0xd1c   :  { %v4700_v12 = vpop.f32.mrf.mxu0  ;;  %4712 = vmatpush3.bf16.msra.mxu0 %v5038_v26  ;;  %v4347_v26 = vld.sshfl [vmem:[%s6337_s24] sm:$0x11 pattern:$0x75316420]  ;;  %s6340_s24 = smov 72  }
 0xd1d   :  { %v5659_v14 = vadd.f32 %v1287_v45, %v5369_v1  ;;  %v1292_v18 = vsel %vm75_vm0, %v1290_v10, 0.0  ;;  %v5033_v1 = vld [vmem:[%s6302_s10 + $0x8] sm:$0xff]   ;;  %4713 = vmatprep.subr.bf16.mxu0 %v5233_v7  ;;  %s6341_s10 = smov 104  }
 0xd1e   :  { %1293 = vadd.xlane.f32.xlu1 %v1292_v18  ;;  %4702 = vmatpush3.bf16.msra.mxu1 %v5033_v1 }
 0xd1f   :  { %v1291_v0 = vmul.f32 %v5659_v14, %v5659_v14  ;;  %4703 = vmatprep.subr.bf16.mxu1 %v5233_v7 }
 0xd20   :  { %4714 = vmatpush3.bf16.msra.mxu0 %v5039_v58 }
 0xd21   :  { %v1295_v22 = vsel %vm75_vm0, %v1291_v0, 0.0  ;;  %4715 = vmatprep.subr.bf16.mxu0 %v5233_v7 }
 0xd22   :  { %1296 = vadd.xlane.f32.xlu0 %v1295_v22  ;;  %1486 = vadd.xlane.f32.xlu1 %v1485_v20 }
 0xd23   :  { %4704 = vmatpush3.bf16.msra.mxu1 %v5034_v24 }
 0xd24   :  { %4721 = vmatprep.subr.bf16.mxu1 %v5233_v7  ;;  %4716 = vmatpush3.bf16.msra.mxu0 %v5040_v59 }
 0xd25   :  { %4735 = vmatprep.subr.bf16.mxu0 %v5233_v7 }
 0xd26   :  { %1483 = vadd.xlane.f32.xlu0 %v1482_v23 }
 0xda7   :  { %v1294_v27 = vpop.xlane.xlu1 %1293 }
 0xda8   :  { %v1298_v29 = vmul.f32 0.03125, %v1294_v27  ;;  %v1588_v27 = vrot.slane %v4347_v26, %v5430_v40 }
 0xdaa   :  { %v1300_v30 = vadd.f32 1e-06, %v1298_v29  ;;  %v1581_v29 = vcombine.high %v4347_v26, %v4347_v26 }
 0xdab   :  { %v1297_v32 = vpop.xlane.xlu0 %1296  ;;  %v1487_v33 = vpop.xlane.xlu1 %1486 }
 0xdac   :  { %5089 = vrsqrt.f32 %v1300_v30  ;;  %v1299_v34 = vmul.f32 0.03125, %v1297_v32  ;;  %v1489_v36 = vmul.f32 0.03125, %v1487_v33  ;;  %v1564_v30 = vld [vmem:[%s6338_s30] sm:$0xff]  ;;  %v5751_v32 = vrot.slane %v1588_v27, %v5395_v17 }
 0xdad   :  { %v1595_v33 = vrot.slane %v1581_v29, %v5430_v40 }
 0xdae   :  { %v1301_v49 = vadd.f32 1e-06, %v1299_v34  ;;  %v1491_v6 = vadd.f32 1e-06, %v1489_v36 }
 0xdaf   :  { %v1484_v53 = vpop.xlane.xlu0 %1483 }
 0xdb0   :  { %5091 = vrsqrt.f32 %v1301_v49  ;;  %v1488_v9 = vmul.f32 0.03125, %v1484_v53  ;;  %v5756_v53 = vrot.slane %v1595_v33, %v5395_v17 }
 0xdb1   :  { %5093 = vrsqrt.f32 %v1491_v6 }
 0xdb2   :  { %v1490_v35 = vadd.f32 1e-06, %v1488_v9 }
 0xdb4   :  { %5095 = vrsqrt.f32 %v1490_v35 }
 0xdb9   :  { %v5090_v51 = vpop.eup %5089 }
 0xdba   :  { %v1304_v38 = vmul.f32 %v5090_v51, %v5648_v5 }
 0xdbc   :  { %v1310_v46 = vmul.f32 %v1309_v39, %v1304_v38 }
 0xdbd   :  { %v5092_v41 = vpop.eup %5091 }
 0xdbe   :  { %v5094_v42 = vpop.eup %5093  ;;  %v1305_v43 = vmul.f32 %v5092_v41, %v5659_v14 }
 0xdbf   :  { %v1495_v44 = vmul.f32 %v5094_v42, %v1479_v4 }
 0xdc0   :  { %v1311_v47 = vmul.f32 %v1309_v39, %v1305_v43 }
 0xdc1   :  { %v5096_v48 = vpop.eup %5095  ;;  %v1501_v56 = vmul.f32 %v1499_v28, %v1495_v44 }
 0xdc2   :  { %v1494_v52 = vmul.f32 %v5096_v48, %v5656_v13  ;;  %v1312_v54 = vpack.c.bf16 %v1311_v47, %v1310_v46 }
 0xdc4   :  { %4706 = vmatmul.mubr.msk.bf16.vlgmr.msra.gmra.mxu1 %vm75_vm0, %v1312_v54  ;;  %v1500_v55 = vmul.f32 %v1499_v28, %v1494_v52 }
 0xdc5   :  { %4722 = vmatpush3.bf16.msra.mxu1 %v5035_v50  ;;  %4725 = vmatprep.mubr.msk.bf16.mxu1 %vm5234_vm1, %v5233_v7 }
 0xdc6   :  { %4723 = vmatprep.subr.bf16.mxu1 %v5233_v7  ;;  %v1502_v19 = vpack.c.bf16 %v1501_v56, %v1500_v55 }
 0xdc9   :  { %4724 = vmatpush3.bf16.msra.mxu1 %v5036_v57 }
 0xdca   :  { %4729 = vmatprep.subr.bf16.mxu1 %v5233_v7 }
 0xdcc   :  { %4726 = vmatmul.mubr.msk.bf16.vlgmr.msra.gmra.mxu1 %vm75_vm0, %v1502_v19 }
 0xdcd   :  { %4731 = vmatprep.mubr.msk.bf16.mxu1 %vm5234_vm1, %v5233_v7 }
 0xe84   :  { %v1366_v60 = vpop.f32.mrf.mxu1 }
 0xe85   :  { %v1373_v63 = vmax.f32 %v1366_v60, 0.0 }
 0xe86   :  { %v4707_v61 = vpop.f32.mrf.mxu1 }
 0xe88   :  { %v1369_v62 = vpop.f32.mrf.mxu1 }
 0xe89   :  { %v1374_v2 = vmax.f32 %v1369_v62, 0.0 }
 0xe8a   :  { %v4708_v3 = vpop.f32.mrf.mxu1 }
 0xe8b   :  { %v1375_v4 = vpack.c.bf16 %v1374_v2, %v1373_v63 }
 0xe8c   :  { %v1556_v8 = vpop.f32.mrf.mxu1 }
 0xe8d   :  { %v5716_v45 = vpack.c.bf16 %v1556_v8, %v1556_v8  ;;  %4718 = vmatmul.mubr.msk.bf16.vlgmr.msra.gmra.mxu0 %vm1408_vm4, %v1375_v4 }
 0xe8e   :  { %v4727_v10 = vpop.f32.mrf.mxu1  ;;  %4737 = vmatprep.mubr.msk.bf16.mxu0 %vm5234_vm1, %v5233_v7 }
 0xe8f   :  { %1601 = vrot.lane.b32.xlu0 %v5716_v45, %s5235_s5 }
 0xe90   :  { %v1559_v11 = vpop.f32.mrf.mxu1 }
 0xe91   :  { %v5723_v12 = vpack.c.bf16 %v1559_v11, %v1559_v11 }
 0xe92   :  { %v4728_v18 = vpop.f32.mrf.mxu1 }
 0xe93   :  { %1649 = vrot.lane.b32.xlu1 %v5723_v12, %s5235_s5 }
 0xf01   :  { %v1602_v0 = vpop.permute.xlu0 %1601 }
 0xf02   :  { %v1607_v20 = vsel %vm198_vm2, %v1602_v0, 0 }
 0xf03   :  { %4730 = vmatpush3.bf16.xpose.msra.mxu1 %v1607_v20 }
 0xf04   :  { %4741 = vmatprep.subr.bf16.mxu1 %v5233_v7 }
 0xf05   :  { %v1650_v21 = vpop.permute.xlu1 %1649 }
 0xf06   :  { %v1655_v22 = vsel %vm198_vm2, %v1650_v21, 0 }
 0xf07   :  { %4736 = vmatpush3.bf16.xpose.msra.mxu0 %v1655_v22 }
 0xf08   :  { %4747 = vmatprep.subr.bf16.mxu0 %v5233_v7 }
 0xf0a   :  { %4732 = vmatmul.mubr.msk.bf16.vlgmr.msra.gmra.mxu1 %vm198_vm2, %v5716_v45 }
 0xf0b   :  { %4743 = vmatprep.mubr.msk.bf16.mxu1 %vm5234_vm1, %v5233_v7 }
 0xf0e   :  { %4738 = vmatmul.mubr.msk.bf16.vlgmr.msra.gmra.mxu0 %vm198_vm2, %v5723_v12 }
 0xf0f   :  { %4749 = vmatprep.mubr.msk.bf16.mxu0 %vm5234_vm1, %v5233_v7 }
 0xf4d   :  { %v5739_v23 = vpop.f32.mrf.mxu0 }
 0xf4f   :  { %v4719_v1 = vpop.f32.mrf.mxu0 }
 0xf51   :  { %v5741_v24 = vpop.f32.mrf.mxu0 }
 0xf53   :  { %v4720_v25 = vpop.f32.mrf.mxu0 }
 0xfca   :  { %v1643_v34 = vpop.f32.mrf.mxu1 }
 0xfcb   :  { %v1644_v36 = vadd.f32 %v1643_v34, %v1564_v30  ;;  %v1565_v34 = vld [vmem:[%s6338_s30 + $0x8] sm:$0xff] }
 0xfcc   :  { %v4733_v49 = vpop.f32.mrf.mxu1 }
 0xfcd   :  { %v1707_v6 = vadd.f32 %v5751_v32, %v1644_v36 }
 0xfce   :  { %v1646_v9 = vpop.f32.mrf.mxu1  ;;  %v1691_v35 = vpop.f32.mrf.mxu0 }
 0xfcf   :  { %v1692_v51 = vadd.f32 %v1691_v35, %v1564_v30  ;;  %v1709_v38 = vsel %vm198_vm2, %v1707_v6, -inf }
 0xfd0   :  { %1710 = vmax.xlane.f32.xlu1 %v1709_v38  ;;  %v4734_v39 = vpop.f32.mrf.mxu1  ;;  %v4739_v31 = vpop.f32.mrf.mxu0 }
 0xfd1   :  { %v1708_v41 = vadd.f32 %v5756_v53, %v1692_v51 }
 0xfd2   :  { %v1694_v42 = vpop.f32.mrf.mxu0 }
 0xfd3   :  { %v1712_v43 = vsel %vm198_vm2, %v1708_v41, -inf }
 0xfd4   :  { %1713 = vmax.xlane.f32.xlu0 %v1712_v43  ;;  %v4740_v44 = vpop.f32.mrf.mxu0 }
 0xfe1   :  { %1781 = vrot.lane.b32.xlu1 %v5723_v12, %s5238_s27 }
 0xfe5   :  { %1832 = vrot.lane.b32.xlu1 %v5716_v45, %s5237_s26 }
0x1059   :  { %v1711_v46 = vpop.xlane.xlu1 %1710 }
0x105a   :  { %v1715_v47 = vsub.f32 %v1707_v6, %v1711_v46 }
0x105c   :  { %v1717_v28 = vmul.f32 1.442695, %v1715_v47 }
0x105d   :  { %v1782_v48 = vpop.permute.xlu1 %1781  ;;  %v1714_v50 = vpop.xlane.xlu0 %1713 }
0x105e   :  { %5097 = vpow2.f32 %v1717_v28  ;;  %v1787_v52 = vsel %vm334_vm3, %v1782_v48, 0  ;;  %v1716_v54 = vsub.f32 %v1708_v41, %v1714_v50 }
0x105f   :  { %4748 = vmatpush3.bf16.msra.mxu0 %v1787_v52 }
0x1060   :  { %v1719_v55 = vmul.f32 1.442695, %v1716_v54  ;;  %4759 = vmatprep.subr.bf16.mxu0 %v5233_v7 }
0x1061   :  { %v1833_v59 = vpop.permute.xlu1 %1832 }
0x1062   :  { %5099 = vpow2.f32 %v1719_v55  ;;  %v1838_v10 = vsel %vm198_vm2, %v1833_v59, 0 }
0x106b   :  { %v5098_v56 = vpop.eup %5097 }
0x106c   :  { %v1721_v57 = vsel %vm198_vm2, %v5098_v56, 0.0 }
0x106d   :  { %1722 = vadd.xlane.f32.xlu0 %v1721_v57 }
0x106f   :  { %v5100_v19 = vpop.eup %5099 }
0x1070   :  { %v1724_v58 = vsel %vm198_vm2, %v5100_v19, 0.0 }
0x1071   :  { %1725 = vadd.xlane.f32.xlu1 %v1724_v58 }
0x1082   :  { %1882 = vrot.lane.b32.xlu1 %v5723_v12, %s5237_s26 }
0x1083   :  { %1733 = vrot.lane.b32.xlu0 %v5716_v45, %s5238_s27 }
0x1086   :  { %1880 = vrot.lane.b32.xlu1 %v5723_v12, %s5239_s3 }
0x1087   :  { %1830 = vrot.lane.b32.xlu0 %v5716_v45, %s5239_s3 }
0x10f6   :  { %v1723_v60 = vpop.xlane.xlu0 %1722 }
0x10f7   :  { %5101 = vrcp.f32 %v1723_v60 }
0x10fa   :  { %v1726_v61 = vpop.xlane.xlu1 %1725  ;;  %v1734_v62 = vpop.permute.xlu0 %1733 }
0x10fb   :  { %5103 = vrcp.f32 %v1726_v61  ;;  %v1739_v63 = vsel %vm334_vm3, %v1734_v62, 0 }
0x10fc   :  { %4742 = vmatpush3.bf16.msra.mxu1 %v1739_v63 }
0x10fd   :  { %4753 = vmatprep.subr.bf16.mxu1 %v5233_v7 }
0x10fe   :  { %v1883_v18 = vpop.permute.xlu1 %1882  ;;  %v1831_v21 = vpop.permute.xlu0 %1830 }
0x10ff   :  { %v1888_v20 = vsel %vm198_vm2, %v1883_v18, 0  ;;  %v1568_v18 = vld [vmem:[%s6305_s13] sm:$0xf] }
0x1102   :  { %v1881_v22 = vpop.permute.xlu1 %1880 }
0x1104   :  { %v5102_v2 = vpop.eup %5101 }
0x1105   :  { %v1729_v3 = vmul.f32 %v5102_v2, %v5098_v56 }
0x1107   :  { %v1731_v4 = vpack.c.bf16 %v1729_v3, %v1729_v3 }
0x1108   :  { %v5104_v8 = vpop.eup %5103 }
0x1109   :  { %4744 = vmatmul.mubr.msk.bf16.vlgmr.msra.gmra.mxu1 %vm198_vm2, %v1731_v4  ;;  %v1730_v11 = vmul.f32 %v5104_v8, %v5100_v19 }
0x110a   :  { %4754 = vmatpush3.bf16.xpose.msra.mxu1 %v1838_v10  ;;  %4755 = vmatprep.mubr.msk.bf16.mxu1 %vm5234_vm1, %v5233_v7 }
0x110b   :  { %v1732_v0 = vpack.c.bf16 %v1730_v11, %v1730_v11  ;;  %4765 = vmatprep.subr.bf16.mxu1 %v5233_v7 }
0x110d   :  { %4750 = vmatmul.mubr.msk.bf16.vlgmr.msra.gmra.mxu0 %vm198_vm2, %v1732_v0 }
0x110e   :  { %4760 = vmatpush3.bf16.xpose.msra.mxu0 %v1888_v20  ;;  %4761 = vmatprep.mubr.msk.bf16.mxu0 %vm5234_vm1, %v5233_v7 }
0x110f   :  { %4771 = vmatprep.subr.bf16.mxu0 %v5233_v7 }
0x1111   :  { %4756 = vmatmul.mubr.msk.bf16.vlgmr.msra.gmra.mxu1 %vm198_vm2, %v1831_v21  ;;  %v2104_v21 = vsel %vm334_vm3, %v1568_v18, 0 }
0x1112   :  { %4767 = vmatprep.mubr.msk.bf16.mxu1 %vm5234_vm1, %v5233_v7 }
0x1115   :  { %4762 = vmatmul.mubr.msk.bf16.vlgmr.msra.gmra.mxu0 %vm198_vm2, %v1881_v22 }
0x1116   :  { %4773 = vmatprep.mubr.msk.bf16.mxu0 %vm5234_vm1, %v5233_v7 }
0x11c9   :  { %v5795_v1 = vpop.f32.mrf.mxu1 }
0x11cb   :  { %v4745_v25 = vpop.f32.mrf.mxu1 }
0x11cd   :  { %v1778_v26 = vpop.f32.mrf.mxu1  ;;  %v5797_v27 = vpop.f32.mrf.mxu0 }
0x11ce   :  { %v1829_v29 = vpack.c.bf16 %v5797_v27, %v5795_v1 }
0x11cf   :  { %v4746_v30 = vpop.f32.mrf.mxu1  ;;  %v4751_v33 = vpop.f32.mrf.mxu0 }
0x11d0   :  { %v1569_v33 = vld [vmem:[%s6305_s13 + $0x4] sm:$0xf] }
0x11d1   :  { %v1826_v36 = vpop.f32.mrf.mxu0  ;;  %v1874_v49 = vpop.f32.mrf.mxu1  ;;  %v2057_v1 = vsel %vm334_vm3, %v1569_v33, 0 }
0x11d2   :  { %v1875_v6 = vadd.f32 %v1874_v49, %v1565_v34 }
0x11d3   :  { %v4752_v9 = vpop.f32.mrf.mxu0  ;;  %v4757_v35 = vpop.f32.mrf.mxu1 }
0x11d4   :  { %v1930_v51 = vadd.f32 %v1875_v6, %v5751_v32 }
0x11d5   :  { %v1877_v38 = vpop.f32.mrf.mxu1  ;;  %v1924_v39 = vpop.f32.mrf.mxu0 }
0x11d6   :  { %v1925_v31 = vadd.f32 %v1924_v39, %v1565_v34  ;;  %v1932_v41 = vsel %vm198_vm2, %v1930_v51, -inf }
0x11d7   :  { %1933 = vmax.xlane.f32.xlu0 %v1932_v41  ;;  %v4758_v42 = vpop.f32.mrf.mxu1  ;;  %v4763_v43 = vpop.f32.mrf.mxu0 }
0x11d8   :  { %v1931_v44 = vadd.f32 %v1925_v31, %v5756_v53 }
0x11d9   :  { %v1927_v46 = vpop.f32.mrf.mxu0 }
0x11da   :  { %v1935_v47 = vsel %vm198_vm2, %v1931_v44, -inf }
0x11db   :  { %1936 = vmax.xlane.f32.xlu1 %v1935_v47  ;;  %v4764_v28 = vpop.f32.mrf.mxu0 }
0x11ec   :  { %2004 = vrot.lane.b32.xlu1 %v5723_v12, %s5240_s0 }
0x11f0   :  { %2149 = vrot.lane.b32.xlu1 %v5716_v45, %s5241_s4 }
0x11f4   :  { %2199 = vrot.lane.b32.xlu1 %v5723_v12, %s5241_s4 }
0x11f8   :  { %2197 = vrot.lane.b32.xlu1 %v5723_v12, %s5242_s8 }
0x1260   :  { %v1934_v48 = vpop.xlane.xlu0 %1933 }
0x1261   :  { %v1938_v50 = vsub.f32 %v1930_v51, %v1934_v48 }
0x1263   :  { %v1940_v52 = vmul.f32 1.442695, %v1938_v50 }
0x1264   :  { %v1937_v54 = vpop.xlane.xlu1 %1936 }
0x1265   :  { %5105 = vpow2.f32 %v1940_v52  ;;  %v1939_v55 = vsub.f32 %v1931_v44, %v1937_v54  ;;  %v1566_v44 = vld [vmem:[%s6338_s30 + $0x10] sm:$0xff] }
0x1267   :  { %v1942_v56 = vmul.f32 1.442695, %v1939_v55 }
0x1268   :  { %v2005_v57 = vpop.permute.xlu1 %2004 }
0x1269   :  { %5107 = vpow2.f32 %v1942_v56  ;;  %v2010_v19 = vsel %vm334_vm3, %v2005_v57, 0 }
0x126a   :  { %4772 = vmatpush3.bf16.msra.mxu0 %v2010_v19 }
0x126b   :  { %4783 = vmatprep.subr.bf16.mxu0 %v5233_v7 }
0x126c   :  { %v2150_v22 = vpop.permute.xlu1 %2149 }
0x126d   :  { %v2155_v35 = vsel %vm198_vm2, %v2150_v22, 0 }
0x1270   :  { %v2200_v25 = vpop.permute.xlu1 %2199 }
0x1271   :  { %v2205_v26 = vsel %vm198_vm2, %v2200_v25, 0 }
0x1272   :  { %v5106_v58 = vpop.eup %5105 }
0x1273   :  { %v1944_v59 = vsel %vm198_vm2, %v5106_v58, 0.0 }
0x1274   :  { %1945 = vadd.xlane.f32.xlu0 %v1944_v59  ;;  %v2198_v30 = vpop.permute.xlu1 %2197 }
0x1276   :  { %v5108_v60 = vpop.eup %5107 }
0x1277   :  { %v1947_v61 = vsel %vm198_vm2, %v5108_v60, 0.0 }
0x1278   :  { %1948 = vadd.xlane.f32.xlu0 %v1947_v61 }
0x128e   :  { %1956 = vrot.lane.b32.xlu0 %v5716_v45, %s5240_s0 }
0x1292   :  { %2147 = vrot.lane.b32.xlu0 %v5716_v45, %s5242_s8 }
0x12fd   :  { %v1946_v62 = vpop.xlane.xlu0 %1945 }
0x12fe   :  { %5109 = vrcp.f32 %v1946_v62 }
0x1301   :  { %v1949_v63 = vpop.xlane.xlu0 %1948 }
0x1302   :  { %5111 = vrcp.f32 %v1949_v63 }
0x1305   :  { %v1957_v2 = vpop.permute.xlu0 %1956 }
0x1306   :  { %v1962_v3 = vsel %vm334_vm3, %v1957_v2, 0 }
0x1307   :  { %4766 = vmatpush3.bf16.msra.mxu1 %v1962_v3 }
0x1308   :  { %4777 = vmatprep.subr.bf16.mxu1 %v5233_v7 }
0x1309   :  { %v2148_v31 = vpop.permute.xlu0 %2147 }
0x130b   :  { %v5110_v4 = vpop.eup %5109 }
0x130c   :  { %v1952_v8 = vmul.f32 %v5110_v4, %v5106_v58 }
0x130e   :  { %v1954_v10 = vpack.c.bf16 %v1952_v8, %v1952_v8 }
0x130f   :  { %v5112_v11 = vpop.eup %5111 }
0x1310   :  { %4768 = vmatmul.mubr.msk.bf16.vlgmr.msra.gmra.mxu1 %vm198_vm2, %v1954_v10  ;;  %v1953_v0 = vmul.f32 %v5112_v11, %v5108_v60 }
0x1311   :  { %4779 = vmatprep.mubr.msk.bf16.mxu1 %vm5234_vm1, %v5233_v7  ;;  %4778 = vmatpush3.bf16.msra.mxu1 %v2057_v1 }
0x1312   :  { %v1955_v20 = vpack.c.bf16 %v1953_v0, %v1953_v0  ;;  %4789 = vmatprep.subr.bf16.mxu1 %v5233_v7 }
0x1314   :  { %4774 = vmatmul.mubr.msk.bf16.vlgmr.msra.gmra.mxu0 %vm198_vm2, %v1955_v20 }
0x1315   :  { %4784 = vmatpush3.bf16.msra.mxu0 %v2104_v21  ;;  %4785 = vmatprep.mubr.msk.bf16.mxu0 %vm5234_vm1, %v5233_v7 }
0x1316   :  { %4795 = vmatprep.subr.bf16.mxu0 %v5233_v7 }
0x131c   :  { %4786 = vmatmul.mubr.msk.bf16.vlgmr.msra.gmra.mxu0 %vm198_vm2, %v1829_v29 }
0x131d   :  { %4796 = vmatpush3.bf16.xpose.msra.mxu0 %v2205_v26  ;;  %4797 = vmatprep.mubr.msk.bf16.mxu0 %vm5234_vm1, %v5233_v7 }
0x131e   :  { %4807 = vmatprep.subr.bf16.mxu0 %v5233_v7 }
0x1324   :  { %4798 = vmatmul.mubr.msk.bf16.vlgmr.msra.gmra.mxu0 %vm198_vm2, %v2198_v30 }
0x1325   :  { %4809 = vmatprep.mubr.msk.bf16.mxu0 %vm5234_vm1, %v5233_v7 }
0x13d0   :  { %v1998_v27 = vpop.f32.mrf.mxu1 }
0x13d2   :  { %v4769_v29 = vpop.f32.mrf.mxu1 }
0x13d4   :  { %v2001_v34 = vpop.f32.mrf.mxu1  ;;  %v2046_v36 = vpop.f32.mrf.mxu0 }
0x13d5   :  { %v2052_v49 = vpack.c.bf16 %v2046_v36, %v1998_v27 }
0x13d6   :  { %v4770_v6 = vpop.f32.mrf.mxu1  ;;  %v4775_v9 = vpop.f32.mrf.mxu0 }
0x13d7   :  { %4780 = vmatmul.mubr.msk.bf16.vlgmr.msra.gmra.mxu1 %vm198_vm2, %v2052_v49 }
0x13d8   :  { %4790 = vmatpush3.bf16.xpose.msra.mxu1 %v2155_v35  ;;  %v2049_v51 = vpop.f32.mrf.mxu0  ;;  %4791 = vmatprep.mubr.msk.bf16.mxu1 %vm5234_vm1, %v5233_v7 }
0x13d9   :  { %4801 = vmatprep.subr.bf16.mxu1 %v5233_v7 }
0x13da   :  { %v4776_v38 = vpop.f32.mrf.mxu0 }
0x13dc   :  { %v5858_v39 = vpop.f32.mrf.mxu0 }
0x13de   :  { %v4787_v41 = vpop.f32.mrf.mxu0 }
0x13df   :  { %4792 = vmatmul.mubr.msk.bf16.vlgmr.msra.gmra.mxu1 %vm198_vm2, %v2148_v31 }
0x13e0   :  { %v5861_v42 = vpop.f32.mrf.mxu0  ;;  %4803 = vmatprep.mubr.msk.bf16.mxu1 %vm5234_vm1, %v5233_v7 }
0x13e2   :  { %v4788_v43 = vpop.f32.mrf.mxu0 }
0x13e4   :  { %v2241_v46 = vpop.f32.mrf.mxu0 }
0x13e5   :  { %v2242_v47 = vadd.f32 %v2241_v46, %v1566_v44  ;;  %v1570_v46 = vld [vmem:[%s6305_s13 + $0x8] sm:$0xf] }
0x13e6   :  { %v4799_v28 = vpop.f32.mrf.mxu0 }
0x13e7   :  { %v2248_v48 = vadd.f32 %v2242_v47, %v5756_v53  ;;  %v2374_v47 = vsel %vm334_vm3, %v1570_v46, 0  ;;  %v1567_v28 = vld [vmem:[%s6338_s30 + $0x18] sm:$0xff]  ;;  %s6342_s30 = smov 40  }
0x13e8   :  { %v2244_v50 = vpop.f32.mrf.mxu0 }
0x13e9   :  { %v2252_v52 = vsel %vm198_vm2, %v2248_v48, -inf }
0x13ea   :  { %2253 = vmax.xlane.f32.xlu1 %v2252_v52  ;;  %v4800_v54 = vpop.f32.mrf.mxu0 }
0x13fb   :  { %2321 = vrot.lane.b32.xlu1 %v5723_v12, %s6339_s23 }
0x13ff   :  { %2421 = vrot.lane.b32.xlu1 %v5716_v45, %s6340_s24 }
0x1403   :  { %2471 = vrot.lane.b32.xlu1 %v5723_v12, %s6340_s24 }
0x1407   :  { %2469 = vrot.lane.b32.xlu1 %v5723_v12, %s6341_s10 }
0x1473   :  { %v2254_v55 = vpop.xlane.xlu1 %2253 }
0x1474   :  { %v2256_v19 = vsub.f32 %v2248_v48, %v2254_v55 }
0x1476   :  { %v2259_v58 = vmul.f32 1.442695, %v2256_v19 }
0x1477   :  { %v2322_v56 = vpop.permute.xlu1 %2321 }
0x1478   :  { %v2327_v57 = vsel %vm334_vm3, %v2322_v56, 0  ;;  %5113 = vpow2.f32 %v2259_v58 }
0x1479   :  { %4808 = vmatpush3.bf16.msra.mxu0 %v2327_v57 }
0x147a   :  { %4819 = vmatprep.subr.bf16.mxu0 %v5233_v7 }
0x147b   :  { %v2422_v27 = vpop.permute.xlu1 %2421 }
0x147c   :  { %v2427_v34 = vsel %vm198_vm2, %v2422_v27, 0 }
0x147f   :  { %v2472_v19 = vpop.permute.xlu1 %2471 }
0x1485   :  { %v5114_v11 = vpop.eup %5113 }
0x1486   :  { %v2264_v0 = vsel %vm198_vm2, %v5114_v11, 0.0 }
0x1497   :  { %v5880_v59 = vpop.f32.mrf.mxu1 }
0x1499   :  { %v4781_v60 = vpop.f32.mrf.mxu1 }
0x149b   :  { %v5882_v61 = vpop.f32.mrf.mxu1 }
0x149d   :  { %v4782_v62 = vpop.f32.mrf.mxu1 }
0x149f   :  { %v2191_v63 = vpop.f32.mrf.mxu1 }
0x14a0   :  { %v2192_v2 = vadd.f32 %v2191_v63, %v1566_v44  ;;  %v2477_v63 = vsel %vm198_vm2, %v2472_v19, 0 }
0x14a1   :  { %v4793_v3 = vpop.f32.mrf.mxu1 }
0x14a2   :  { %v2247_v4 = vadd.f32 %v2192_v2, %v5751_v32  ;;  %v2470_v3 = vpop.permute.xlu1 %2469 }
0x14a3   :  { %v2194_v8 = vpop.f32.mrf.mxu1 }
0x14a4   :  { %v2249_v10 = vsel %vm198_vm2, %v2247_v4, -inf }
0x14a5   :  { %2250 = vmax.xlane.f32.xlu0 %v2249_v10  ;;  %v4794_v18 = vpop.f32.mrf.mxu1 }
0x14a9   :  { %2265 = vadd.xlane.f32.xlu0 %v2264_v0  ;;  %v2141_v0 = vadd.f32 %v5858_v39, %v5880_v59 }
0x152e   :  { %v2251_v20 = vpop.xlane.xlu0 %2250 }
0x152f   :  { %v2255_v21 = vsub.f32 %v2247_v4, %v2251_v20 }
0x1531   :  { %v2257_v22 = vmul.f32 1.442695, %v2255_v21 }
0x1532   :  { %v2266_v25 = vpop.xlane.xlu0 %2265 }
0x1533   :  { %5115 = vpow2.f32 %v2257_v22 }
0x1534   :  { %5117 = vrcp.f32 %v2266_v25  ;;  %v2144_v25 = vadd.f32 %v5861_v42, %v5882_v61  ;;  %v1453_v42 = vadd.f32 %v5739_v23, %v5648_v5  ;;  %v1454_v5 = vadd.f32 %v5741_v24, %v5659_v14 }
0x1536   :  { %v1455_v59 = vmul.f32 %v1453_v42, %v1453_v42  ;;  %v1456_v23 = vmul.f32 %v1454_v5, %v1454_v5 }
0x1538   :  { %v1457_v61 = vsel %vm75_vm0, %v1455_v59, 0.0 }
0x1540   :  { %v5116_v26 = vpop.eup %5115 }
0x1541   :  { %v5118_v30 = vpop.eup %5117  ;;  %v2261_v33 = vsel %vm198_vm2, %v5116_v26, 0.0 }
0x1542   :  { %2262 = vadd.xlane.f32.xlu0 %v2261_v33  ;;  %v2270_v1 = vmul.f32 %v5118_v30, %v5114_v11 }
0x1544   :  { %v2272_v29 = vpack.c.bf16 %v2270_v1, %v2270_v1 }
0x1546   :  { %4810 = vmatmul.mubr.msk.bf16.vlgmr.msra.gmra.mxu0 %vm198_vm2, %v2272_v29 }
0x1547   :  { %4820 = vmatpush3.bf16.xpose.msra.mxu0 %v2427_v34  ;;  %4821 = vmatprep.mubr.msk.bf16.mxu0 %vm5234_vm1, %v5233_v7 }
0x1548   :  { %4831 = vmatprep.subr.bf16.mxu0 %v5233_v7 }
0x1558   :  { %2273 = vrot.lane.b32.xlu0 %v5716_v45, %s6339_s23 }
0x155c   :  { %2419 = vrot.lane.b32.xlu0 %v5716_v45, %s6341_s10 }
0x15cb   :  { %v2263_v36 = vpop.xlane.xlu0 %2262 }
0x15cc   :  { %5119 = vrcp.f32 %v2263_v36 }
0x15cf   :  { %v2274_v49 = vpop.permute.xlu0 %2273 }
0x15d0   :  { %v2279_v6 = vsel %vm334_vm3, %v2274_v49, 0 }
0x15d1   :  { %4802 = vmatpush3.bf16.msra.mxu1 %v2279_v6 }
0x15d2   :  { %4813 = vmatprep.subr.bf16.mxu1 %v5233_v7 }
0x15d3   :  { %v2420_v9 = vpop.permute.xlu0 %2419 }
0x15d4   :  { %4822 = vmatmul.mubr.msk.bf16.vlgmr.msra.gmra.mxu0 %vm198_vm2, %v2420_v9 }
0x15d5   :  { %4833 = vmatprep.mubr.msk.bf16.mxu0 %vm5234_vm1, %v5233_v7 }
0x15d9   :  { %v5120_v35 = vpop.eup %5119 }
0x15da   :  { %v2269_v51 = vmul.f32 %v5120_v35, %v5116_v26 }
0x15dc   :  { %v2271_v38 = vpack.c.bf16 %v2269_v51, %v2269_v51 }
0x15de   :  { %4804 = vmatmul.mubr.msk.bf16.vlgmr.msra.gmra.mxu1 %vm198_vm2, %v2271_v38 }
0x15df   :  { %4815 = vmatprep.mubr.msk.bf16.mxu1 %vm5234_vm1, %v5233_v7  ;;  %4814 = vmatpush3.bf16.msra.mxu1 %v2374_v47 }
0x15e0   :  { %4825 = vmatprep.subr.bf16.mxu1 %v5233_v7 }
0x1606   :  { %v2363_v31 = vpop.f32.mrf.mxu0 }
0x1608   :  { %v4811_v41 = vpop.f32.mrf.mxu0 }
0x160a   :  { %v2366_v43 = vpop.f32.mrf.mxu0 }
0x160c   :  { %v4812_v44 = vpop.f32.mrf.mxu0 }
0x1694   :  { %v2463_v48 = vpop.f32.mrf.mxu0 }
0x1695   :  { %v2464_v50 = vadd.f32 %v2463_v48, %v1567_v28 }
0x1696   :  { %v4823_v52 = vpop.f32.mrf.mxu0 }
0x1697   :  { %v2519_v54 = vadd.f32 %v2464_v50, %v5751_v32  ;;  %v1571_v50 = vld [vmem:[%s6305_s13 + $0xc] sm:$0xf] }
0x1698   :  { %v2466_v55 = vpop.f32.mrf.mxu0  ;;  %v2646_v52 = vsel %vm334_vm3, %v1571_v50, 0 }
0x1699   :  { %v2521_v56 = vsel %vm198_vm2, %v2519_v54, -inf }
0x169a   :  { %2522 = vmax.xlane.f32.xlu0 %v2521_v56  ;;  %v4824_v57 = vpop.f32.mrf.mxu0 }
0x169e   :  { %v2315_v58 = vpop.f32.mrf.mxu1 }
0x169f   :  { %v2369_v60 = vpack.c.bf16 %v2363_v31, %v2315_v58  ;;  %v1460_v31 = vsel %vm75_vm0, %v1456_v23, 0.0 }
0x16a0   :  { %v4805_v62 = vpop.f32.mrf.mxu1 }
0x16a1   :  { %4816 = vmatmul.mubr.msk.bf16.vlgmr.msra.gmra.mxu1 %vm198_vm2, %v2369_v60 }
0x16a2   :  { %4826 = vmatpush3.bf16.xpose.msra.mxu1 %v2477_v63  ;;  %v2318_v2 = vpop.f32.mrf.mxu1  ;;  %4827 = vmatprep.mubr.msk.bf16.mxu1 %vm5234_vm1, %v5233_v7 }
0x16a3   :  { %4837 = vmatprep.subr.bf16.mxu1 %v5233_v7 }
0x16a4   :  { %v4806_v32 = vpop.f32.mrf.mxu1 }
0x16a9   :  { %4828 = vmatmul.mubr.msk.bf16.vlgmr.msra.gmra.mxu1 %vm198_vm2, %v2470_v3  ;;  %v1473_v3 = vsub.s32 2, %v5392_v16 }
0x16aa   :  { %4839 = vmatprep.mubr.msk.bf16.mxu1 %vm5234_vm1, %v5233_v7 }
0x1723   :  { %v2523_v4 = vpop.xlane.xlu0 %2522 }
0x1724   :  { %v2527_v8 = vsub.f32 %v2519_v54, %v2523_v4 }
0x1726   :  { %v2529_v10 = vmul.f32 1.442695, %v2527_v8 }
0x1728   :  { %5121 = vpow2.f32 %v2529_v10  ;;  %v5041_v10 = vld [vmem:[%s6307_s15 + $0x8] sm:$0xff]  }
0x1735   :  { %v5122_v11 = vpop.eup %5121 }
0x1736   :  { %v2533_v18 = vsel %vm198_vm2, %v5122_v11, 0.0 }
0x1737   :  { %2534 = vadd.xlane.f32.xlu0 %v2533_v18 }
0x1761   :  { %v2410_v20 = vpop.f32.mrf.mxu1 }
0x1762   :  { %v5926_v21 = vadd.f32 %v2410_v20, %v2141_v0 }
0x1763   :  { %v4817_v22 = vpop.f32.mrf.mxu1 }
0x1764   :  { %v5968_v22 = vld [vmem:[%s6299_s7] sm:$0xff] }
0x1765   :  { %v2413_v26 = vpop.f32.mrf.mxu1 }
0x1766   :  { %v5930_v30 = vadd.f32 %v2413_v26, %v2144_v25  ;;  %v1474_v25 = vrot.slane %v5968_v22, %v1473_v3 }
0x1767   :  { %v4818_v33 = vpop.f32.mrf.mxu1 }
0x1768   :  { %v5042_v33 = vld [vmem:[%s6307_s15] sm:$0xff]  }
0x1769   :  { %v2513_v1 = vpop.f32.mrf.mxu1 }
0x176a   :  { %v2514_v27 = vadd.f32 %v2513_v1, %v1567_v28 }
0x176b   :  { %v4829_v29 = vpop.f32.mrf.mxu1 }
0x176c   :  { %v2520_v34 = vadd.f32 %v2514_v27, %v5756_v53 }
0x176d   :  { %v2516_v36 = vpop.f32.mrf.mxu1 }
0x176e   :  { %v2524_v49 = vsel %vm198_vm2, %v2520_v34, -inf }
0x176f   :  { %2525 = vmax.xlane.f32.xlu1 %v2524_v49  ;;  %v4830_v39 = vpop.f32.mrf.mxu1 }
0x1780   :  { %2593 = vrot.lane.b32.xlu1 %v5723_v12, %s6342_s30 }
0x17a4   :  { %1458 = vadd.xlane.f32.xlu1 %v1457_v61 }
0x17c0   :  { %v2535_v41 = vpop.xlane.xlu0 %2534 }
0x17f8   :  { %v2526_v6 = vpop.xlane.xlu1 %2525 }
0x17f9   :  { %v2528_v9 = vsub.f32 %v2520_v34, %v2526_v6 }
0x17fb   :  { %v2531_v35 = vmul.f32 1.442695, %v2528_v9 }
0x17fc   :  { %v2594_v51 = vpop.permute.xlu1 %2593 }
0x17fd   :  { %5123 = vpow2.f32 %v2531_v35  ;;  %v2599_v53 = vsel %vm334_vm3, %v2594_v51, 0  ;;  %v5188_v35 = vld [vmem:[%s6336_s28 + $0x8] sm:$0xff] }
0x17fe   :  { %4838 = vmatpush3.bf16.msra.mxu1 %v2599_v53  ;;  %5125 = vrcp.f32 %v2535_v41  ;;  %v5043_v41 = vld [vmem:[%s6306_s14 + $0x8] sm:$0xff]  }
0x17ff   :  { %4849 = vmatprep.subr.bf16.mxu1 %v5233_v7 }
0x180a   :  { %v5124_v38 = vpop.eup %5123 }
0x180b   :  { %v2536_v12 = vsel %vm198_vm2, %v5124_v38, 0.0  ;;  %v5126_v43 = vpop.eup %5125 }
0x180c   :  { %2537 = vadd.xlane.f32.xlu0 %v2536_v12  ;;  %v2541_v46 = vmul.f32 %v5126_v43, %v5122_v11  ;;  %v5044_v43 = vld [vmem:[%s6306_s14] sm:$0xff]  }
0x180e   :  { %v2543_v48 = vpack.c.bf16 %v2541_v46, %v2541_v46 }
0x1822   :  { %2545 = vrot.lane.b32.xlu0 %v5716_v45, %s6342_s30 }
0x182d   :  { %v1459_v55 = vpop.xlane.xlu1 %1458 }
0x182e   :  { %v1463_v57 = vmul.f32 0.03125, %v1459_v55 }
0x1830   :  { %v1465_v58 = vadd.f32 1e-06, %v1463_v57 }
0x1841   :  { %1461 = vadd.xlane.f32.xlu0 %v1460_v31 }
0x1895   :  { %v2538_v44 = vpop.xlane.xlu0 %2537 }
0x1896   :  { %5127 = vrcp.f32 %v2538_v44 }
0x1899   :  { %v2546_v47 = vpop.permute.xlu0 %2545 }
0x189a   :  { %v2551_v28 = vsel %vm334_vm3, %v2546_v47, 0 }
0x189b   :  { %4832 = vmatpush3.bf16.msra.mxu0 %v2551_v28 }
0x189c   :  { %4843 = vmatprep.subr.bf16.mxu0 %v5233_v7 }
0x189e   :  { %4834 = vmatmul.mubr.msk.bf16.vlgmr.msra.gmra.mxu0 %vm198_vm2, %v2543_v48 }
0x189f   :  { %4845 = vmatprep.mubr.msk.bf16.mxu0 %vm5234_vm1, %v5233_v7  ;;  %4844 = vmatpush3.bf16.msra.mxu0 %v2646_v52 }
0x18a0   :  { %4857 = vmatprep.subr.bf16.mxu0 %v5233_v7 }
0x18a3   :  { %v5128_v14 = vpop.eup %5127 }
0x18a4   :  { %v2542_v45 = vmul.f32 %v5128_v14, %v5124_v38 }
0x18a6   :  { %v2544_v24 = vpack.c.bf16 %v2542_v45, %v2542_v45  ;;  %v2711_v45 = vsub.s32 4, %v5392_v16 }
0x18a8   :  { %4840 = vmatmul.mubr.msk.bf16.vlgmr.msra.gmra.mxu1 %vm198_vm2, %v2544_v24  ;;  %v2712_v52 = vrot.slane %v5968_v22, %v2711_v45 }
0x18a9   :  { %4853 = vmatprep.mubr.msk.bf16.mxu1 %vm5234_vm1, %v5233_v7  ;;  %4850 = vmatpush3.bf16.msra.mxu1 %v5043_v41 }
0x18aa   :  { %4851 = vmatprep.subr.bf16.mxu1 %v5233_v7 }
0x18ad   :  { %4852 = vmatpush3.bf16.msra.mxu1 %v5044_v43 }
0x18ae   :  { %4865 = vmatprep.subr.bf16.mxu1 %v5233_v7 }
0x18ca   :  { %v1462_v54 = vpop.xlane.xlu0 %1461 }
0x18cb   :  { %v1464_v56 = vmul.f32 0.03125, %v1462_v54 }
0x18cd   :  { %v1466_v19 = vadd.f32 1e-06, %v1464_v56 }
0x18cf   :  { %5129 = vrsqrt.f32 %v1466_v19 }
0x18d0   :  { %5131 = vrsqrt.f32 %v1465_v58 }
0x18dc   :  { %v5130_v32 = vpop.eup %5129 }
0x18dd   :  { %v5132_v4 = vpop.eup %5131  ;;  %v1470_v11 = vmul.f32 %v5130_v32, %v1454_v5 }
0x18de   :  { %v1469_v20 = vmul.f32 %v5132_v4, %v1453_v42 }
0x18df   :  { %v1476_v1 = vmul.f32 %v1474_v25, %v1470_v11 }
0x18e0   :  { %v1475_v29 = vmul.f32 %v1474_v25, %v1469_v20 }
0x18e2   :  { %v1477_v34 = vpack.c.bf16 %v1476_v1, %v1475_v29 }
0x195e   :  { %v2587_v60 = vpop.f32.mrf.mxu0 }
0x1960   :  { %v4835_v62 = vpop.f32.mrf.mxu0 }
0x1962   :  { %v2590_v63 = vpop.f32.mrf.mxu0 }
0x1964   :  { %v4836_v2 = vpop.f32.mrf.mxu0 }
0x1968   :  { %v2635_v8 = vpop.f32.mrf.mxu1 }
0x1969   :  { %v2641_v18 = vpack.c.bf16 %v2635_v8, %v2587_v60  ;;  %v4376_v8 = vld.sshfl [vmem:[%s6334_s1] sm:$0x11 pattern:$0x75316420] }
0x196a   :  { %v4841_v0 = vpop.f32.mrf.mxu1  ;;  %v2851_v11 = vcombine.high %v4376_v8, %v4376_v8 }
0x196b   :  { %4846 = vmatmul.mubr.msk.bf16.vlgmr.msra.gmra.mxu0 %vm198_vm2, %v2641_v18 }
0x196c   :  { %v2638_v26 = vpop.f32.mrf.mxu1  ;;  %4858 = vmatpush3.bf16.msra.mxu0 %v5041_v10  ;;  %4861 = vmatprep.mubr.msk.bf16.mxu0 %vm5234_vm1, %v5233_v7  ;;  %v2858_v10 = vrot.slane %v4376_v8, %v5430_v40  ;;  %v2865_v0 = vrot.slane %v2851_v11, %v5430_v40 }
0x196d   :  { %4859 = vmatprep.subr.bf16.mxu0 %v5233_v7 }
0x196e   :  { %v4842_v27 = vpop.f32.mrf.mxu1  ;;  %v6039_v18 = vrot.slane %v2858_v10, %v5395_v17  ;;  %v6044_v26 = vrot.slane %v2865_v0, %v5395_v17 }
0x1970   :  { %4860 = vmatpush3.bf16.msra.mxu0 %v5042_v33 }
0x1971   :  { %4871 = vmatprep.subr.bf16.mxu0 %v5233_v7 }
0x1973   :  { %4862 = vmatmul.mubr.msk.bf16.vlgmr.msra.gmra.mxu0 %vm75_vm0, %v1477_v34 }
0x1974   :  { %4873 = vmatprep.mubr.msk.bf16.mxu0 %vm5234_vm1, %v5233_v7 }
0x1a2b   :  { %v2682_v36 = vpop.f32.mrf.mxu0 }
0x1a2c   :  { %v2689_v49 = vadd.f32 %v2682_v36, %v5926_v21 }
0x1a2d   :  { %v4847_v39 = vpop.f32.mrf.mxu0 }
0x1a2e   :  { %v5983_v42 = vadd.f32 %v2689_v49, %v5656_v13 }
0x1a2f   :  { %v2685_v59 = vpop.f32.mrf.mxu0 }
0x1a30   :  { %v2690_v61 = vadd.f32 %v2685_v59, %v5930_v30  ;;  %v2693_v6 = vmul.f32 %v5983_v42, %v5983_v42 }
0x1a31   :  { %v4848_v9 = vpop.f32.mrf.mxu0 }
0x1a32   :  { %v5991_v51 = vadd.f32 %v5188_v35, %v2690_v61  ;;  %v2695_v53 = vsel %vm75_vm0, %v2693_v6, 0.0 }
0x1a33   :  { %2696 = vadd.xlane.f32.xlu0 %v2695_v53  ;;  %v2829_v21 = vpop.f32.mrf.mxu0 }
0x1a34   :  { %v2694_v13 = vmul.f32 %v5991_v51, %v5991_v51  ;;  %v6014_v56 = vpack.c.bf16 %v2829_v21, %v2829_v21 }
0x1a35   :  { %v4863_v38 = vpop.f32.mrf.mxu0 }
0x1a36   :  { %v2698_v30 = vsel %vm75_vm0, %v2694_v13, 0.0  ;;  %v2890_v60 = vsel %vm198_vm2, %v6014_v56, 0 }
0x1a37   :  { %2699 = vadd.xlane.f32.xlu1 %v2698_v30  ;;  %v2832_v12 = vpop.f32.mrf.mxu0 }
0x1a38   :  { %v5997_v5 = vpack.c.bf16 %v2832_v12, %v2832_v12 }
0x1a39   :  { %v4864_v23 = vpop.f32.mrf.mxu0 }
0x1a3a   :  { %v2936_v31 = vsel %vm198_vm2, %v5997_v5, 0 }
0x1a3b   :  { %4872 = vmatpush3.bf16.xpose.msra.mxu0 %v2936_v31 }
0x1a3c   :  { %4883 = vmatprep.subr.bf16.mxu0 %v5233_v7 }
0x1abc   :  { %v2697_v44 = vpop.xlane.xlu0 %2696 }
0x1abd   :  { %v2701_v46 = vmul.f32 0.03125, %v2697_v44 }
0x1abf   :  { %v2703_v47 = vadd.f32 1e-06, %v2701_v46 }
0x1ac0   :  { %v2700_v28 = vpop.xlane.xlu1 %2699 }
0x1ac1   :  { %5133 = vrsqrt.f32 %v2703_v47  ;;  %v2702_v48 = vmul.f32 0.03125, %v2700_v28 }
0x1ac3   :  { %v2704_v14 = vadd.f32 1e-06, %v2702_v48 }
0x1ac5   :  { %5135 = vrsqrt.f32 %v2704_v14 }
0x1ace   :  { %v5134_v24 = vpop.eup %5133 }
0x1acf   :  { %v2707_v50 = vmul.f32 %v5134_v24, %v5983_v42 }
0x1ad1   :  { %v2713_v57 = vmul.f32 %v2712_v52, %v2707_v50 }
0x1ad2   :  { %v5136_v54 = vpop.eup %5135 }
0x1ad3   :  { %v2708_v55 = vmul.f32 %v5136_v54, %v5991_v51 }
0x1ad5   :  { %v2714_v19 = vmul.f32 %v2712_v52, %v2708_v55 }
0x1ad7   :  { %v2715_v58 = vpack.c.bf16 %v2714_v19, %v2713_v57 }
0x1ad9   :  { %4854 = vmatmul.mubr.msk.bf16.vlgmr.msra.gmra.mxu1 %vm75_vm0, %v2715_v58 }
0x1ada   :  { %4866 = vmatpush3.bf16.xpose.msra.mxu1 %v2890_v60  ;;  %4867 = vmatprep.mubr.msk.bf16.mxu1 %vm5234_vm1, %v5233_v7 }
0x1adb   :  { %4877 = vmatprep.subr.bf16.mxu1 %v5233_v7 }
0x1b99   :  { %v2769_v62 = vpop.f32.mrf.mxu1 }
0x1b9a   :  { %v6022_v63 = vpack.c.bf16 %v2769_v62, %v2769_v62 }
0x1b9b   :  { %v4855_v2 = vpop.f32.mrf.mxu1 }
0x1b9c   :  { %4868 = vmatmul.mubr.msk.bf16.vlgmr.msra.gmra.mxu1 %vm198_vm2, %v6022_v63 }
0x1b9d   :  { %v2772_v32 = vpop.f32.mrf.mxu1  ;;  %4879 = vmatprep.mubr.msk.bf16.mxu1 %vm5234_vm1, %v5233_v7 }
0x1b9e   :  { %v6028_v3 = vpack.c.bf16 %v2772_v32, %v2772_v32 }
0x1b9f   :  { %v4856_v4 = vpop.f32.mrf.mxu1 }
0x1ba0   :  { %4874 = vmatmul.mubr.msk.bf16.vlgmr.msra.gmra.mxu0 %vm198_vm2, %v6028_v3 }
0x1ba1   :  { %4885 = vmatprep.mubr.msk.bf16.mxu0 %vm5234_vm1, %v5233_v7 }
0x1c5c   :  { %v2926_v20 = vpop.f32.mrf.mxu1 }
0x1c5d   :  { %v2927_v25 = vadd.f32 %v2926_v20, %v6039_v18 }
0x1c5e   :  { %v4869_v33 = vpop.f32.mrf.mxu1 }
0x1c5f   :  { %v2978_v1 = vsel %vm198_vm2, %v2927_v25, -inf }
0x1c60   :  { %2979 = vmax.xlane.f32.xlu0 %v2978_v1  ;;  %v2929_v27 = vpop.f32.mrf.mxu1  ;;  %v2972_v29 = vpop.f32.mrf.mxu0 }
0x1c61   :  { %v2973_v34 = vadd.f32 %v2972_v29, %v6044_v26 }
0x1c62   :  { %v4870_v36 = vpop.f32.mrf.mxu1  ;;  %v4875_v49 = vpop.f32.mrf.mxu0 }
0x1c63   :  { %v2981_v39 = vsel %vm198_vm2, %v2973_v34, -inf }
0x1c64   :  { %2982 = vmax.xlane.f32.xlu1 %v2981_v39  ;;  %v2975_v40 = vpop.f32.mrf.mxu0 }
0x1c66   :  { %v4876_v59 = vpop.f32.mrf.mxu0 }
0x1c75   :  { %3050 = vrot.lane.b32.xlu1 %v5997_v5, %s5235_s5 }
0x1c79   :  { %3101 = vrot.lane.b32.xlu1 %v6014_v56, %s5239_s3 }
0x1ce9   :  { %v2980_v61 = vpop.xlane.xlu0 %2979 }
0x1cea   :  { %v2984_v6 = vsub.f32 %v2927_v25, %v2980_v61 }
0x1cec   :  { %v2986_v9 = vmul.f32 1.442695, %v2984_v6 }
0x1ced   :  { %v2983_v35 = vpop.xlane.xlu1 %2982 }
0x1cee   :  { %5137 = vpow2.f32 %v2986_v9  ;;  %v2985_v53 = vsub.f32 %v2973_v34, %v2983_v35 }
0x1cf0   :  { %v2988_v21 = vmul.f32 1.442695, %v2985_v53 }
0x1cf1   :  { %v3051_v13 = vpop.permute.xlu1 %3050 }
0x1cf2   :  { %5139 = vpow2.f32 %v2988_v21  ;;  %v3056_v38 = vsel %vm334_vm3, %v3051_v13, 0 }
0x1cf3   :  { %4884 = vmatpush3.bf16.msra.mxu0 %v3056_v38 }
0x1cf4   :  { %4895 = vmatprep.subr.bf16.mxu0 %v5233_v7 }
0x1cf5   :  { %v3102_v41 = vpop.permute.xlu1 %3101 }
0x1cf6   :  { %v3107_v24 = vsel %vm198_vm2, %v3102_v41, 0 }
0x1cfb   :  { %v5138_v30 = vpop.eup %5137 }
0x1cfc   :  { %v2990_v12 = vsel %vm198_vm2, %v5138_v30, 0.0 }
0x1cfd   :  { %2991 = vadd.xlane.f32.xlu0 %v2990_v12 }
0x1cff   :  { %v5140_v23 = vpop.eup %5139 }
0x1d00   :  { %v2993_v31 = vsel %vm198_vm2, %v5140_v23, 0.0 }
0x1d01   :  { %2994 = vadd.xlane.f32.xlu1 %v2993_v31 }
0x1d12   :  { %3151 = vrot.lane.b32.xlu1 %v5997_v5, %s5239_s3 }
0x1d13   :  { %3002 = vrot.lane.b32.xlu0 %v6014_v56, %s5235_s5 }
0x1d16   :  { %3149 = vrot.lane.b32.xlu1 %v6028_v3, %s5239_s3 }
0x1d17   :  { %3099 = vrot.lane.b32.xlu0 %v6022_v63, %s5239_s3 }
0x1d86   :  { %v2992_v43 = vpop.xlane.xlu0 %2991 }
0x1d87   :  { %5141 = vrcp.f32 %v2992_v43 }
0x1d8a   :  { %v3003_v44 = vpop.permute.xlu0 %3002  ;;  %v2995_v46 = vpop.xlane.xlu1 %2994 }
0x1d8b   :  { %v3008_v47 = vsel %vm334_vm3, %v3003_v44, 0  ;;  %5143 = vrcp.f32 %v2995_v46 }
0x1d8c   :  { %4878 = vmatpush3.bf16.msra.mxu1 %v3008_v47 }
0x1d8d   :  { %4889 = vmatprep.subr.bf16.mxu1 %v5233_v7 }
0x1d8e   :  { %v3152_v52 = vpop.permute.xlu1 %3151  ;;  %v3100_v57 = vpop.permute.xlu0 %3099 }
0x1d8f   :  { %v3157_v55 = vsel %vm198_vm2, %v3152_v52, 0 }
0x1d92   :  { %v3150_v19 = vpop.permute.xlu1 %3149 }
0x1d94   :  { %v5142_v28 = vpop.eup %5141 }
0x1d95   :  { %v2998_v48 = vmul.f32 %v5142_v28, %v5138_v30 }
0x1d97   :  { %v3000_v14 = vpack.c.bf16 %v2998_v48, %v2998_v48 }
0x1d98   :  { %v5144_v45 = vpop.eup %5143 }
0x1d99   :  { %4880 = vmatmul.mubr.msk.bf16.vlgmr.msra.gmra.mxu1 %vm198_vm2, %v3000_v14  ;;  %v2999_v50 = vmul.f32 %v5144_v45, %v5140_v23  ;;  %v2837_v14 = vld [vmem:[%s6308_s16] sm:$0xf] }
0x1d9a   :  { %4890 = vmatpush3.bf16.xpose.msra.mxu1 %v3107_v24  ;;  %4891 = vmatprep.mubr.msk.bf16.mxu1 %vm5234_vm1, %v5233_v7 }
0x1d9b   :  { %v3001_v54 = vpack.c.bf16 %v2999_v50, %v2999_v50  ;;  %4901 = vmatprep.subr.bf16.mxu1 %v5233_v7  ;;  %v3371_v50 = vsel %vm334_vm3, %v2837_v14, 0 }
0x1d9d   :  { %4886 = vmatmul.mubr.msk.bf16.vlgmr.msra.gmra.mxu0 %vm198_vm2, %v3001_v54 }
0x1d9e   :  { %4896 = vmatpush3.bf16.xpose.msra.mxu0 %v3157_v55  ;;  %4897 = vmatprep.mubr.msk.bf16.mxu0 %vm5234_vm1, %v5233_v7 }
0x1d9f   :  { %4907 = vmatprep.subr.bf16.mxu0 %v5233_v7 }
0x1da1   :  { %4892 = vmatmul.mubr.msk.bf16.vlgmr.msra.gmra.mxu1 %vm198_vm2, %v3100_v57 }
0x1da2   :  { %4903 = vmatprep.mubr.msk.bf16.mxu1 %vm5234_vm1, %v5233_v7 }
0x1da5   :  { %4898 = vmatmul.mubr.msk.bf16.vlgmr.msra.gmra.mxu0 %vm198_vm2, %v3150_v19  ;;  %v2838_v19 = vld [vmem:[%s6308_s16 + $0x4] sm:$0xf] }
0x1da6   :  { %4909 = vmatprep.mubr.msk.bf16.mxu0 %vm5234_vm1, %v5233_v7 }
0x1e59   :  { %v6083_v58 = vpop.f32.mrf.mxu1 }
0x1e5b   :  { %v4881_v60 = vpop.f32.mrf.mxu1 }
0x1e5d   :  { %v3047_v62 = vpop.f32.mrf.mxu1  ;;  %v6085_v2 = vpop.f32.mrf.mxu0 }
0x1e5e   :  { %v3098_v32 = vpack.c.bf16 %v6085_v2, %v6083_v58  ;;  %v3324_v58 = vsel %vm334_vm3, %v2838_v19, 0 }
0x1e5f   :  { %v4882_v4 = vpop.f32.mrf.mxu1  ;;  %v4887_v8 = vpop.f32.mrf.mxu0 }
0x1e61   :  { %v3095_v10 = vpop.f32.mrf.mxu0  ;;  %v3143_v11 = vpop.f32.mrf.mxu1 }
0x1e62   :  { %v3144_v0 = vadd.f32 %v3143_v11, %v6039_v18 }
0x1e63   :  { %v4888_v20 = vpop.f32.mrf.mxu0  ;;  %v4893_v25 = vpop.f32.mrf.mxu1 }
0x1e64   :  { %v3199_v33 = vsel %vm198_vm2, %v3144_v0, -inf }
0x1e65   :  { %3200 = vmax.xlane.f32.xlu0 %v3199_v33  ;;  %v3146_v1 = vpop.f32.mrf.mxu1  ;;  %v3193_v27 = vpop.f32.mrf.mxu0 }
0x1e66   :  { %v3194_v29 = vadd.f32 %v3193_v27, %v6044_v26 }
0x1e67   :  { %v4894_v34 = vpop.f32.mrf.mxu1  ;;  %v4899_v36 = vpop.f32.mrf.mxu0 }
0x1e68   :  { %v3202_v49 = vsel %vm198_vm2, %v3194_v29, -inf }
0x1e69   :  { %3203 = vmax.xlane.f32.xlu1 %v3202_v49  ;;  %v3196_v39 = vpop.f32.mrf.mxu0 }
0x1e6b   :  { %v4900_v40 = vpop.f32.mrf.mxu0 }
0x1e7a   :  { %3271 = vrot.lane.b32.xlu1 %v5997_v5, %s5237_s26 }
0x1e7e   :  { %3416 = vrot.lane.b32.xlu1 %v6014_v56, %s5242_s8 }
0x1e82   :  { %3466 = vrot.lane.b32.xlu1 %v5997_v5, %s5242_s8 }
0x1e86   :  { %3464 = vrot.lane.b32.xlu1 %v6028_v3, %s5242_s8 }
0x1eee   :  { %v3201_v59 = vpop.xlane.xlu0 %3200 }
0x1eef   :  { %v3205_v61 = vsub.f32 %v3144_v0, %v3201_v59 }
0x1ef1   :  { %v3207_v6 = vmul.f32 1.442695, %v3205_v61 }
0x1ef2   :  { %v3204_v9 = vpop.xlane.xlu1 %3203 }
0x1ef3   :  { %5145 = vpow2.f32 %v3207_v6  ;;  %v3206_v35 = vsub.f32 %v3194_v29, %v3204_v9 }
0x1ef5   :  { %v3209_v53 = vmul.f32 1.442695, %v3206_v35 }
0x1ef6   :  { %v3272_v21 = vpop.permute.xlu1 %3271 }
0x1ef7   :  { %5147 = vpow2.f32 %v3209_v53  ;;  %v3277_v13 = vsel %vm334_vm3, %v3272_v21, 0 }
0x1ef8   :  { %4908 = vmatpush3.bf16.msra.mxu0 %v3277_v13 }
0x1ef9   :  { %4919 = vmatprep.subr.bf16.mxu0 %v5233_v7 }
0x1efa   :  { %v3417_v52 = vpop.permute.xlu1 %3416 }
0x1efb   :  { %v3422_v11 = vsel %vm198_vm2, %v3417_v52, 0 }
0x1efe   :  { %v3467_v54 = vpop.permute.xlu1 %3466 }
0x1eff   :  { %v3472_v55 = vsel %vm198_vm2, %v3467_v54, 0 }
0x1f00   :  { %v5146_v38 = vpop.eup %5145 }
0x1f01   :  { %v3211_v30 = vsel %vm198_vm2, %v5146_v38, 0.0 }
0x1f02   :  { %3212 = vadd.xlane.f32.xlu0 %v3211_v30  ;;  %v3465_v57 = vpop.permute.xlu1 %3464 }
0x1f04   :  { %v5148_v12 = vpop.eup %5147 }
0x1f05   :  { %v3214_v23 = vsel %vm198_vm2, %v5148_v12, 0.0 }
0x1f06   :  { %3215 = vadd.xlane.f32.xlu0 %v3214_v23 }
0x1f1c   :  { %3223 = vrot.lane.b32.xlu0 %v6014_v56, %s5237_s26 }
0x1f20   :  { %3414 = vrot.lane.b32.xlu0 %v6022_v63, %s5242_s8 }
0x1f8b   :  { %v3213_v31 = vpop.xlane.xlu0 %3212 }
0x1f8c   :  { %5149 = vrcp.f32 %v3213_v31 }
0x1f8f   :  { %v3216_v41 = vpop.xlane.xlu0 %3215 }
0x1f90   :  { %5151 = vrcp.f32 %v3216_v41 }
0x1f93   :  { %v3224_v43 = vpop.permute.xlu0 %3223 }
0x1f94   :  { %v3229_v44 = vsel %vm334_vm3, %v3224_v43, 0 }
0x1f95   :  { %4902 = vmatpush3.bf16.msra.mxu1 %v3229_v44 }
0x1f96   :  { %4913 = vmatprep.subr.bf16.mxu1 %v5233_v7 }
0x1f97   :  { %v3415_v33 = vpop.permute.xlu0 %3414 }
0x1f99   :  { %v5150_v46 = vpop.eup %5149 }
0x1f9a   :  { %v3219_v47 = vmul.f32 %v5150_v46, %v5146_v38 }
0x1f9c   :  { %v3221_v28 = vpack.c.bf16 %v3219_v47, %v3219_v47 }
0x1f9d   :  { %v5152_v48 = vpop.eup %5151 }
0x1f9e   :  { %4904 = vmatmul.mubr.msk.bf16.vlgmr.msra.gmra.mxu1 %vm198_vm2, %v3221_v28  ;;  %v3220_v45 = vmul.f32 %v5152_v48, %v5148_v12 }
0x1f9f   :  { %4915 = vmatprep.mubr.msk.bf16.mxu1 %vm5234_vm1, %v5233_v7  ;;  %4914 = vmatpush3.bf16.msra.mxu1 %v3324_v58 }
0x1fa0   :  { %v3222_v24 = vpack.c.bf16 %v3220_v45, %v3220_v45  ;;  %4925 = vmatprep.subr.bf16.mxu1 %v5233_v7 }
0x1fa2   :  { %4910 = vmatmul.mubr.msk.bf16.vlgmr.msra.gmra.mxu0 %vm198_vm2, %v3222_v24 }
0x1fa3   :  { %4920 = vmatpush3.bf16.msra.mxu0 %v3371_v50  ;;  %4921 = vmatprep.mubr.msk.bf16.mxu0 %vm5234_vm1, %v5233_v7 }
0x1fa4   :  { %4931 = vmatprep.subr.bf16.mxu0 %v5233_v7 }
0x1faa   :  { %4922 = vmatmul.mubr.msk.bf16.vlgmr.msra.gmra.mxu0 %vm198_vm2, %v3098_v32 }
0x1fab   :  { %4932 = vmatpush3.bf16.xpose.msra.mxu0 %v3472_v55  ;;  %4933 = vmatprep.mubr.msk.bf16.mxu0 %vm5234_vm1, %v5233_v7 }
0x1fac   :  { %4943 = vmatprep.subr.bf16.mxu0 %v5233_v7 }
0x1fb2   :  { %4934 = vmatmul.mubr.msk.bf16.vlgmr.msra.gmra.mxu0 %vm198_vm2, %v3465_v57 }
0x1fb3   :  { %4945 = vmatprep.mubr.msk.bf16.mxu0 %vm5234_vm1, %v5233_v7 }
0x205e   :  { %v3265_v60 = vpop.f32.mrf.mxu1 }
0x2060   :  { %v4905_v62 = vpop.f32.mrf.mxu1 }
0x2062   :  { %v3268_v2 = vpop.f32.mrf.mxu1  ;;  %v3313_v32 = vpop.f32.mrf.mxu0 }
0x2063   :  { %v3319_v4 = vpack.c.bf16 %v3313_v32, %v3265_v60 }
0x2064   :  { %v4906_v8 = vpop.f32.mrf.mxu1  ;;  %v4911_v10 = vpop.f32.mrf.mxu0 }
0x2065   :  { %4916 = vmatmul.mubr.msk.bf16.vlgmr.msra.gmra.mxu1 %vm198_vm2, %v3319_v4 }
0x2066   :  { %4926 = vmatpush3.bf16.xpose.msra.mxu1 %v3422_v11  ;;  %v3316_v0 = vpop.f32.mrf.mxu0  ;;  %4927 = vmatprep.mubr.msk.bf16.mxu1 %vm5234_vm1, %v5233_v7 }
0x2067   :  { %4937 = vmatprep.subr.bf16.mxu1 %v5233_v7  ;;  %v2839_v0 = vld [vmem:[%s6308_s16 + $0x8] sm:$0xf] }
0x2068   :  { %v4912_v20 = vpop.f32.mrf.mxu0 }
0x2069   :  { %v3639_v20 = vsel %vm334_vm3, %v2839_v0, 0 }
0x206a   :  { %v6143_v25 = vpop.f32.mrf.mxu0 }
0x206c   :  { %v4923_v1 = vpop.f32.mrf.mxu0 }
0x206d   :  { %4928 = vmatmul.mubr.msk.bf16.vlgmr.msra.gmra.mxu1 %vm198_vm2, %v3415_v33 }
0x206e   :  { %v6146_v27 = vpop.f32.mrf.mxu0  ;;  %4939 = vmatprep.mubr.msk.bf16.mxu1 %vm5234_vm1, %v5233_v7 }
0x2070   :  { %v4924_v29 = vpop.f32.mrf.mxu0 }
0x2072   :  { %v3508_v34 = vpop.f32.mrf.mxu0 }
0x2073   :  { %v3509_v36 = vadd.f32 %v3508_v34, %v6044_v26 }
0x2074   :  { %v4935_v49 = vpop.f32.mrf.mxu0 }
0x2075   :  { %v3517_v39 = vsel %vm198_vm2, %v3509_v36, -inf }
0x2076   :  { %3518 = vmax.xlane.f32.xlu1 %v3517_v39  ;;  %v3511_v40 = vpop.f32.mrf.mxu0 }
0x2078   :  { %v4936_v59 = vpop.f32.mrf.mxu0 }
0x2087   :  { %3586 = vrot.lane.b32.xlu1 %v5997_v5, %s5241_s4 }
0x208b   :  { %3686 = vrot.lane.b32.xlu1 %v6014_v56, %s6341_s10 }
0x208f   :  { %3736 = vrot.lane.b32.xlu1 %v5997_v5, %s6341_s10 }
0x2093   :  { %3734 = vrot.lane.b32.xlu1 %v6028_v3, %s6341_s10 }
0x20ff   :  { %v3519_v61 = vpop.xlane.xlu1 %3518 }
0x2100   :  { %v3521_v35 = vsub.f32 %v3509_v36, %v3519_v61 }
0x2102   :  { %v3524_v53 = vmul.f32 1.442695, %v3521_v35 }
0x2103   :  { %v3587_v6 = vpop.permute.xlu1 %3586 }
0x2104   :  { %v3592_v9 = vsel %vm334_vm3, %v3587_v6, 0  ;;  %5153 = vpow2.f32 %v3524_v53 }
0x2105   :  { %4944 = vmatpush3.bf16.msra.mxu0 %v3592_v9 }
0x2106   :  { %4955 = vmatprep.subr.bf16.mxu0 %v5233_v7 }
0x2107   :  { %v3687_v54 = vpop.permute.xlu1 %3686 }
0x2108   :  { %v3692_v57 = vsel %vm198_vm2, %v3687_v54, 0 }
0x210b   :  { %v3737_v39 = vpop.permute.xlu1 %3736 }
0x210c   :  { %v3742_v6 = vsel %vm198_vm2, %v3737_v39, 0 }
0x210f   :  { %v3735_v35 = vpop.permute.xlu1 %3734 }
0x2111   :  { %v5154_v41 = vpop.eup %5153 }
0x2112   :  { %v3529_v46 = vsel %vm198_vm2, %v5154_v41, 0.0 }
0x2125   :  { %v6162_v21 = vpop.f32.mrf.mxu1 }
0x2127   :  { %v4917_v13 = vpop.f32.mrf.mxu1 }
0x2129   :  { %v6164_v38 = vpop.f32.mrf.mxu1 }
0x212b   :  { %v4918_v30 = vpop.f32.mrf.mxu1 }
0x212d   :  { %v3458_v12 = vpop.f32.mrf.mxu1 }
0x212e   :  { %v3459_v23 = vadd.f32 %v3458_v12, %v6039_v18 }
0x212f   :  { %v4929_v3 = vpop.f32.mrf.mxu1 }
0x2130   :  { %v3514_v31 = vsel %vm198_vm2, %v3459_v23, -inf  ;;  %v3408_v3 = vadd.f32 %v6143_v25, %v6162_v21 }
0x2131   :  { %3515 = vmax.xlane.f32.xlu0 %v3514_v31  ;;  %v3461_v43 = vpop.f32.mrf.mxu1 }
0x2133   :  { %v4930_v44 = vpop.f32.mrf.mxu1 }
0x2134   :  { %v3411_v44 = vadd.f32 %v6146_v27, %v6164_v38 }
0x2135   :  { %3530 = vadd.xlane.f32.xlu0 %v3529_v46 }
0x21ba   :  { %v3516_v47 = vpop.xlane.xlu0 %3515 }
0x21bb   :  { %v3520_v28 = vsub.f32 %v3459_v23, %v3516_v47 }
0x21bd   :  { %v3522_v48 = vmul.f32 1.442695, %v3520_v28 }
0x21be   :  { %v3531_v14 = vpop.xlane.xlu0 %3530 }
0x21bf   :  { %5155 = vpow2.f32 %v3522_v48 }
0x21c0   :  { %5157 = vrcp.f32 %v3531_v14 }
0x21cc   :  { %v5156_v45 = vpop.eup %5155 }
0x21cd   :  { %v5158_v24 = vpop.eup %5157  ;;  %v3526_v50 = vsel %vm198_vm2, %v5156_v45, 0.0 }
0x21ce   :  { %v3535_v52 = vmul.f32 %v5158_v24, %v5154_v41  ;;  %3527 = vadd.xlane.f32.xlu0 %v3526_v50 }
0x21d0   :  { %v3537_v55 = vpack.c.bf16 %v3535_v52, %v3535_v52 }
0x21d2   :  { %4946 = vmatmul.mubr.msk.bf16.vlgmr.msra.gmra.mxu0 %vm198_vm2, %v3537_v55 }
0x21d3   :  { %4956 = vmatpush3.bf16.xpose.msra.mxu0 %v3692_v57  ;;  %4957 = vmatprep.mubr.msk.bf16.mxu0 %vm5234_vm1, %v5233_v7 }
0x21d4   :  { %4967 = vmatprep.subr.bf16.mxu0 %v5233_v7 }
0x21e4   :  { %3538 = vrot.lane.b32.xlu0 %v6014_v56, %s5241_s4 }
0x21e8   :  { %3684 = vrot.lane.b32.xlu0 %v6022_v63, %s6341_s10 }
0x2257   :  { %v3528_v19 = vpop.xlane.xlu0 %3527 }
0x2258   :  { %5159 = vrcp.f32 %v3528_v19 }
0x225b   :  { %v3539_v58 = vpop.permute.xlu0 %3538 }
0x225c   :  { %v3544_v60 = vsel %vm334_vm3, %v3539_v58, 0 }
0x225d   :  { %4938 = vmatpush3.bf16.msra.mxu1 %v3544_v60 }
0x225e   :  { %4949 = vmatprep.subr.bf16.mxu1 %v5233_v7 }
0x225f   :  { %v3685_v62 = vpop.permute.xlu0 %3684 }
0x2260   :  { %4958 = vmatmul.mubr.msk.bf16.vlgmr.msra.gmra.mxu0 %vm198_vm2, %v3685_v62 }
0x2261   :  { %4969 = vmatprep.mubr.msk.bf16.mxu0 %vm5234_vm1, %v5233_v7 }
0x2265   :  { %v5160_v2 = vpop.eup %5159 }
0x2266   :  { %v3534_v32 = vmul.f32 %v5160_v2, %v5156_v45 }
0x2268   :  { %v3536_v4 = vpack.c.bf16 %v3534_v32, %v3534_v32 }
0x226a   :  { %4940 = vmatmul.mubr.msk.bf16.vlgmr.msra.gmra.mxu1 %vm198_vm2, %v3536_v4 }
0x226b   :  { %4951 = vmatprep.mubr.msk.bf16.mxu1 %vm5234_vm1, %v5233_v7  ;;  %4950 = vmatpush3.bf16.msra.mxu1 %v3639_v20 }
0x226c   :  { %4961 = vmatprep.subr.bf16.mxu1 %v5233_v7 }
0x2292   :  { %v3628_v63 = vpop.f32.mrf.mxu0 }
0x2294   :  { %v4947_v8 = vpop.f32.mrf.mxu0 }
0x2296   :  { %v3631_v10 = vpop.f32.mrf.mxu0 }
0x2298   :  { %v4948_v11 = vpop.f32.mrf.mxu0 }
0x2320   :  { %v3728_v33 = vpop.f32.mrf.mxu0 }
0x2321   :  { %v3729_v1 = vadd.f32 %v3728_v33, %v6039_v18 }
0x2322   :  { %v4959_v29 = vpop.f32.mrf.mxu0 }
0x2323   :  { %v3784_v34 = vsel %vm198_vm2, %v3729_v1, -inf }
0x2324   :  { %3785 = vmax.xlane.f32.xlu0 %v3784_v34  ;;  %v3731_v36 = vpop.f32.mrf.mxu0 }
0x2326   :  { %v4960_v49 = vpop.f32.mrf.mxu0 }
0x232a   :  { %v3580_v40 = vpop.f32.mrf.mxu1 }
0x232b   :  { %v3634_v59 = vpack.c.bf16 %v3628_v63, %v3580_v40  ;;  %v2840_v63 = vld [vmem:[%s6308_s16 + $0xc] sm:$0xf] }
0x232c   :  { %v4941_v61 = vpop.f32.mrf.mxu1  ;;  %v3909_v8 = vsel %vm334_vm3, %v2840_v63, 0 }
0x232d   :  { %4952 = vmatmul.mubr.msk.bf16.vlgmr.msra.gmra.mxu1 %vm198_vm2, %v3634_v59 }
0x232e   :  { %4962 = vmatpush3.bf16.xpose.msra.mxu1 %v3742_v6  ;;  %v3583_v9 = vpop.f32.mrf.mxu1  ;;  %4963 = vmatprep.mubr.msk.bf16.mxu1 %vm5234_vm1, %v5233_v7 }
0x232f   :  { %4973 = vmatprep.subr.bf16.mxu1 %v5233_v7 }
0x2330   :  { %v4942_v18 = vpop.f32.mrf.mxu1 }
0x2335   :  { %4964 = vmatmul.mubr.msk.bf16.vlgmr.msra.gmra.mxu1 %vm198_vm2, %v3735_v35 }
0x2336   :  { %4975 = vmatprep.mubr.msk.bf16.mxu1 %vm5234_vm1, %v5233_v7 }
0x23ad   :  { %v3786_v53 = vpop.xlane.xlu0 %3785 }
0x23ae   :  { %v3790_v13 = vsub.f32 %v3729_v1, %v3786_v53 }
0x23b0   :  { %v3792_v30 = vmul.f32 1.442695, %v3790_v13 }
0x23b2   :  { %5161 = vpow2.f32 %v3792_v30 }
0x23bf   :  { %v5162_v12 = vpop.eup %5161 }
0x23c0   :  { %v3796_v23 = vsel %vm198_vm2, %v5162_v12, 0.0 }
0x23c1   :  { %3797 = vadd.xlane.f32.xlu0 %v3796_v23  ;;  %v5048_v23 = vld [vmem:[%s6310_s18 + $0x10] sm:$0xff]  }
0x23ed   :  { %v3675_v31 = vpop.f32.mrf.mxu1 }
0x23ee   :  { %v3682_v41 = vadd.f32 %v3675_v31, %v3408_v3 }
0x23ef   :  { %v4953_v43 = vpop.f32.mrf.mxu1 }
0x23f1   :  { %v3678_v46 = vpop.f32.mrf.mxu1 }
0x23f2   :  { %v3683_v47 = vadd.f32 %v3678_v46, %v3411_v44 }
0x23f3   :  { %v4954_v28 = vpop.f32.mrf.mxu1 }
0x23f5   :  { %v3778_v48 = vpop.f32.mrf.mxu1 }
0x23f6   :  { %v3779_v14 = vadd.f32 %v3778_v48, %v6044_v26 }
0x23f7   :  { %v4965_v45 = vpop.f32.mrf.mxu1 }
0x23f8   :  { %v3787_v24 = vsel %vm198_vm2, %v3779_v14, -inf }
0x23f9   :  { %3788 = vmax.xlane.f32.xlu1 %v3787_v24  ;;  %v3781_v50 = vpop.f32.mrf.mxu1 }
0x23fb   :  { %v4966_v52 = vpop.f32.mrf.mxu1 }
0x240a   :  { %3856 = vrot.lane.b32.xlu1 %v5997_v5, %s6340_s24 }
0x244a   :  { %v3798_v57 = vpop.xlane.xlu0 %3797 }
0x2482   :  { %v3789_v25 = vpop.xlane.xlu1 %3788 }
0x2483   :  { %v3791_v21 = vsub.f32 %v3779_v14, %v3789_v25 }
0x2485   :  { %v3794_v54 = vmul.f32 1.442695, %v3791_v21  ;;  %v5049_v21 = vld [vmem:[%s6310_s18 + $0x8] sm:$0xff]  }
0x2486   :  { %v3857_v55 = vpop.permute.xlu1 %3856 }
0x2487   :  { %5163 = vpow2.f32 %v3794_v54  ;;  %v3862_v27 = vsel %vm334_vm3, %v3857_v55, 0  ;;  %v5050_v54 = vld [vmem:[%s6310_s18] sm:$0xff]  }
0x2488   :  { %4974 = vmatpush3.bf16.msra.mxu1 %v3862_v27  ;;  %5165 = vrcp.f32 %v3798_v57 }
0x2489   :  { %4985 = vmatprep.subr.bf16.mxu1 %v5233_v7 }
0x2494   :  { %v5164_v26 = vpop.eup %5163 }
0x2495   :  { %v3799_v38 = vsel %vm198_vm2, %v5164_v26, 0.0  ;;  %v5166_v5 = vpop.eup %5165 }
0x2496   :  { %3800 = vadd.xlane.f32.xlu0 %v3799_v38  ;;  %v3804_v58 = vmul.f32 %v5166_v5, %v5162_v12  ;;  %v5045_v12 = vld [vmem:[%s6309_s17 + $0x8] sm:$0xff]  }
0x2498   :  { %v3806_v2 = vpack.c.bf16 %v3804_v58, %v3804_v58 }
0x24ac   :  { %3808 = vrot.lane.b32.xlu0 %v6014_v56, %s6340_s24 }
0x251f   :  { %v3801_v19 = vpop.xlane.xlu0 %3800 }
0x2520   :  { %5167 = vrcp.f32 %v3801_v19 }
0x2523   :  { %v3809_v60 = vpop.permute.xlu0 %3808 }
0x2524   :  { %v3814_v62 = vsel %vm334_vm3, %v3809_v60, 0 }
0x2525   :  { %4968 = vmatpush3.bf16.msra.mxu0 %v3814_v62 }
0x2526   :  { %4979 = vmatprep.subr.bf16.mxu0 %v5233_v7 }
0x2528   :  { %4970 = vmatmul.mubr.msk.bf16.vlgmr.msra.gmra.mxu0 %vm198_vm2, %v3806_v2 }
0x2529   :  { %4981 = vmatprep.mubr.msk.bf16.mxu0 %vm5234_vm1, %v5233_v7  ;;  %4980 = vmatpush3.bf16.msra.mxu0 %v3909_v8 }
0x252a   :  { %4993 = vmatprep.subr.bf16.mxu0 %v5233_v7 }
0x252d   :  { %v5168_v32 = vpop.eup %5167 }
0x252e   :  { %v3805_v56 = vmul.f32 %v5168_v32, %v5164_v26 }
0x2530   :  { %v3807_v4 = vpack.c.bf16 %v3805_v56, %v3805_v56 }
0x2532   :  { %4976 = vmatmul.mubr.msk.bf16.vlgmr.msra.gmra.mxu1 %vm198_vm2, %v3807_v4 }
0x2533   :  { %4989 = vmatprep.mubr.msk.bf16.mxu1 %vm5234_vm1, %v5233_v7  ;;  %4986 = vmatpush3.bf16.msra.mxu1 %v5045_v12 }
0x2534   :  { %4987 = vmatprep.subr.bf16.mxu1 %v5233_v7 }
0x25e8   :  { %v3850_v10 = vpop.f32.mrf.mxu0 }
0x25ea   :  { %v4971_v11 = vpop.f32.mrf.mxu0 }
0x25eb   :  { %v5051_v11 = vld [vmem:[%s6311_s19 + $0x8] sm:$0xff]  }
0x25ec   :  { %v3853_v0 = vpop.f32.mrf.mxu0 }
0x25ed   :  { %v5052_v0 = vld [vmem:[%s6311_s19] sm:$0xff]  }
0x25ee   :  { %v4972_v20 = vpop.f32.mrf.mxu0 }
0x25f2   :  { %v3898_v33 = vpop.f32.mrf.mxu1 }
0x25f3   :  { %v3904_v1 = vpack.c.bf16 %v3898_v33, %v3850_v10 }
0x25f4   :  { %v4977_v29 = vpop.f32.mrf.mxu1 }
0x25f5   :  { %4982 = vmatmul.mubr.msk.bf16.vlgmr.msra.gmra.mxu0 %vm198_vm2, %v3904_v1 }
0x25f6   :  { %v3901_v34 = vpop.f32.mrf.mxu1  ;;  %5001 = vmatprep.mubr.msk.bf16.mxu0 %vm5234_vm1, %v5233_v7 }
0x25f8   :  { %v4978_v36 = vpop.f32.mrf.mxu1 }
0x26b5   :  { %v3945_v49 = vpop.f32.mrf.mxu0 }
0x26b6   :  { %v3952_v39 = vadd.f32 %v3945_v49, %v3682_v41  ;;  %v4138_v49 = vsub.s32 6, %v5392_v16 }
0x26b7   :  { %v4983_v40 = vpop.f32.mrf.mxu0 }
0x26b8   :  { %v3954_v59 = vadd.f32 %v3952_v39, %v5983_v42  ;;  %v5046_v42 = vld [vmem:[%s6309_s17] sm:$0xff]   ;;  %v4139_v40 = vrot.slane %v5968_v22, %v4138_v49 }
0x26b9   :  { %v3948_v61 = vpop.f32.mrf.mxu0  ;;  %4988 = vmatpush3.bf16.msra.mxu1 %v5046_v42 }
0x26ba   :  { %v3953_v6 = vadd.f32 %v3948_v61, %v3683_v47  ;;  %v3956_v9 = vmul.f32 %v3954_v59, %v3954_v59  ;;  %5005 = vmatprep.subr.bf16.mxu1 %v5233_v7  ;;  %v3974_v47 = vsub.s32 5, %v5392_v16 }
0x26bb   :  { %v4984_v18 = vpop.f32.mrf.mxu0 }
0x26bc   :  { %v3955_v35 = vadd.f32 %v3953_v6, %v5991_v51  ;;  %v3958_v53 = vsel %vm75_vm0, %v3956_v9, 0.0  ;;  %v5047_v51 = vld [vmem:[%s6310_s18 + $0x18] sm:$0xff]   ;;  %v3975_v48 = vrot.slane %v5968_v22, %v3974_v47  ;;  %v4207_v22 = vld [vmem:[%s6298_s6] sm:$0x3]  ;;  %s5247_s6 = smov [#allocation2]  }
0x26bd   :  { %3959 = vadd.xlane.f32.xlu1 %v3958_v53  ;;  %4994 = vmatpush3.bf16.msra.mxu0 %v5047_v51  ;;  %s4285_s14 = sshll.u32 %s5247_s6, 4  ;;  %s4286_s14 = int_to_ptr.vmem [resolvable:$true] %s4285_s14 }
0x26be   :  { %v3957_v13 = vmul.f32 %v3955_v35, %v3955_v35  ;;  %4995 = vmatprep.subr.bf16.mxu0 %v5233_v7  ;;  %s5189_s30 = scalar_lea.vmem %s4286_s14, 256  ;;  %p5194_p1 = scmp.lt.s32.totalorder %s4286_s14, %s4286_s14 }
0x26bf   :  { %p5190_p0 = scmp.ne.s32.totalorder %s4286_s14, %s5189_s30  ;;  %p5195_p2 = scmp.lt.s32.totalorder %s5189_s30, %s5189_s30 }
0x26c0   :  { %v3961_v30 = vsel %vm75_vm0, %v3957_v13, 0.0 }
0x26c1   :  { %3962 = vadd.xlane.f32.xlu0 %v3961_v30  ;;  %4996 = vmatpush3.bf16.msra.mxu0 %v5048_v23  ;;  %v4218_v23 = vrot.slane %v4207_v22, %v1308_v37  ;;  %p5196_p3 = por %p5195_p2, %p5194_p1 }
0x26c2   :  { %4997 = vmatprep.subr.bf16.mxu0 %v5233_v7 }
0x26c3   :  { %p5197_p4 = pnand %p5196_p3, %p5190_p0 }
0x26c5   :  { %4998 = vmatpush3.bf16.msra.mxu0 %v5049_v21 }
0x26c6   :  { %4999 = vmatprep.subr.bf16.mxu0 %v5233_v7 }
0x26c9   :  { %5000 = vmatpush3.bf16.msra.mxu0 %v5050_v54 }
0x2746   :  { %v3960_v3 = vpop.xlane.xlu1 %3959 }
0x2747   :  { %v3964_v31 = vmul.f32 0.03125, %v3960_v3  ;;  %v4211_v3 = vrot.slane %v4207_v22, %v5395_v17 }
0x2749   :  { %v3966_v41 = vadd.f32 1e-06, %v3964_v31 }
0x274a   :  { %v3963_v43 = vpop.xlane.xlu0 %3962 }
0x274b   :  { %5169 = vrsqrt.f32 %v3966_v41  ;;  %v3965_v44 = vmul.f32 0.03125, %v3963_v43 }
0x274d   :  { %v3967_v46 = vadd.f32 1e-06, %v3965_v44 }
0x274f   :  { %5171 = vrsqrt.f32 %v3967_v46 }
0x2758   :  { %v5170_v28 = vpop.eup %5169 }
0x2759   :  { %v3970_v14 = vmul.f32 %v5170_v28, %v3954_v59 }
0x275b   :  { %v3976_v50 = vmul.f32 %v3975_v48, %v3970_v14 }
0x275c   :  { %v5172_v45 = vpop.eup %5171 }
0x275d   :  { %v3971_v24 = vmul.f32 %v5172_v45, %v3955_v35 }
0x275f   :  { %v3977_v52 = vmul.f32 %v3975_v48, %v3971_v24  ;;  %v4243_v48 = vand.u32 127, %v91_v15 }
0x2761   :  { %v3978_v25 = vpack.c.bf16 %v3977_v52, %v3976_v50 }
0x2763   :  { %4990 = vmatmul.mubr.msk.bf16.vlgmr.msra.gmra.mxu1 %vm75_vm0, %v3978_v25 }
0x2764   :  { %5009 = vmatprep.mubr.msk.bf16.mxu1 %vm5234_vm1, %v5233_v7  ;;  %5006 = vmatpush3.bf16.msra.mxu1 %v5051_v11 }
0x2765   :  { %5007 = vmatprep.subr.bf16.mxu1 %v5233_v7 }
0x2768   :  { %5008 = vmatpush3.bf16.msra.mxu1 %v5052_v0 }
0x2823   :  { %v4032_v55 = vpop.f32.mrf.mxu1 }
0x2824   :  { %v4039_v38 = vmax.f32 %v4032_v55, 0.0 }
0x2825   :  { %v4991_v27 = vpop.f32.mrf.mxu1 }
0x2827   :  { %v4035_v26 = vpop.f32.mrf.mxu1 }
0x2828   :  { %v4040_v57 = vmax.f32 %v4035_v26, 0.0 }
0x2829   :  { %v4992_v5 = vpop.f32.mrf.mxu1 }
0x282a   :  { %v4041_v19 = vpack.c.bf16 %v4040_v57, %v4039_v38 }
0x282c   :  { %5002 = vmatmul.mubr.msk.bf16.vlgmr.msra.gmra.mxu0 %vm1408_vm4, %v4041_v19 }
0x28ec   :  { %v4111_v58 = vpop.f32.mrf.mxu0 }
0x28ed   :  { %v4118_v60 = vadd.f32 %v4111_v58, %v3954_v59 }
0x28ee   :  { %v5003_v62 = vpop.f32.mrf.mxu0 }
0x28ef   :  { %v4120_v2 = vmul.f32 %v4118_v60, %v4118_v60 }
0x28f0   :  { %v4114_v32 = vpop.f32.mrf.mxu0 }
0x28f1   :  { %v4119_v56 = vadd.f32 %v4114_v32, %v3955_v35  ;;  %v4122_v4 = vsel %vm75_vm0, %v4120_v2, 0.0 }
0x28f2   :  { %4123 = vadd.xlane.f32.xlu0 %v4122_v4  ;;  %v5004_v63 = vpop.f32.mrf.mxu0 }
0x28f3   :  { %v4121_v8 = vmul.f32 %v4119_v56, %v4119_v56 }
0x28f5   :  { %v4125_v10 = vsel %vm75_vm0, %v4121_v8, 0.0 }
0x28f6   :  { %4126 = vadd.xlane.f32.xlu1 %v4125_v10 }
0x297b   :  { %v4124_v20 = vpop.xlane.xlu0 %4123 }
0x297c   :  { %v4128_v33 = vmul.f32 0.03125, %v4124_v20 }
0x297e   :  { %v4130_v1 = vadd.f32 1e-06, %v4128_v33 }
0x297f   :  { %v4127_v29 = vpop.xlane.xlu1 %4126 }
0x2980   :  { %5173 = vrsqrt.f32 %v4130_v1  ;;  %v4129_v34 = vmul.f32 0.03125, %v4127_v29 }
0x2982   :  { %v4131_v36 = vadd.f32 1e-06, %v4129_v34 }
0x2984   :  { %5175 = vrsqrt.f32 %v4131_v36 }
0x298d   :  { %v5174_v39 = vpop.eup %5173 }
0x298e   :  { %v4134_v59 = vmul.f32 %v5174_v39, %v4118_v60 }
0x2990   :  { %v4140_v6 = vmul.f32 %v4139_v40, %v4134_v59 }
0x2991   :  { %v5176_v61 = vpop.eup %5175 }
0x2992   :  { %v4135_v9 = vmul.f32 %v5176_v61, %v4119_v56  ;;  %v4142_v35 = vmul.f32 0.17677669, %v4140_v6 }
0x2994   :  { %v4141_v18 = vmul.f32 %v4139_v40, %v4135_v9 }
0x2996   :  { %v4143_v53 = vmul.f32 0.17677669, %v4141_v18 }
0x2998   :  { %v4144_v13 = vpack.c.bf16 %v4143_v53, %v4142_v35 }
0x299a   :  { %5010 = vmatmul.mubr.msk.bf16.vlgmr.msra.gmra.mxu1 %vm75_vm0, %v4144_v13 }
0x2a5a   :  { %v4198_v30 = vpop.f32.mrf.mxu1 }
0x2a5b   :  { %4205 = vst [vmem:[#allocation2] sm:$0xff] %v4198_v30  ;;  %4222 = vmax.xlane.f32.xlu0 %v4198_v30 }
0x2a5c   :  { %v5011_v12 = vpop.f32.mrf.mxu1 }
0x2a5e   :  { %v4201_v42 = vpop.f32.mrf.mxu1 }
0x2a5f   :  { %4206 = vst [vmem:[#allocation2 + $0x8] sm:$0xff] %v4201_v42  ;;  %4224 = vmax.xlane.f32.xlu1 %v4201_v42 }
0x2a60   :  { %v5012_v51 = vpop.f32.mrf.mxu1 }
0x2a70   :  { %4220 = vbcast.lane.b32.xlu1 %v4218_v23, 256 }
0x2a71   :  { %4213 = vbcast.lane.b32.xlu0 %v4211_v3, 256 }
0x2ae4   :  { %v4223_v31 = vpop.xlane.xlu0 %4222 }
0x2ae5   :  { %v4226_v41 = vsub.f32 %v4198_v30, %v4223_v31 }
0x2ae7   :  { %v4228_v43 = vmul.f32 1.442695, %v4226_v41 }
0x2ae8   :  { %v4225_v44 = vpop.xlane.xlu1 %4224  ;;  %v4214_v16 = vpop.permute.xlu0 %4213 }
0x2ae9   :  { %5177 = vpow2.f32 %v4228_v43  ;;  %v4227_v46 = vsub.f32 %v4201_v42, %v4225_v44  ;;  %vm4244_vm6 = vcmp.eq.s32.totalorder %v4243_v48, %v4214_v16 }
0x2aea   :  { %v4246_v17 = vsel %vm4244_vm6, %v4198_v30, 0.0 }
0x2aeb   :  { %v4230_v47 = vmul.f32 1.442695, %v4227_v46 }
0x2aec   :  { %v4221_v28 = vpop.permute.xlu1 %4220 }
0x2aed   :  { %5179 = vpow2.f32 %v4230_v47  ;;  %vm4245_vm5 = vcmp.eq.s32.totalorder %v4243_v48, %v4221_v28 }
0x2aee   :  { %v4247_v45 = vsel %vm4245_vm5, %v4201_v42, 0.0 }
0x2af6   :  { %v5178_v14 = vpop.eup %5177 }
0x2af7   :  { %4232 = vadd.xlane.f32.xlu1 %v5178_v14 }
0x2afa   :  { %v5180_v37 = vpop.eup %5179 }
0x2afb   :  { %4234 = vadd.xlane.f32.xlu0 %v5180_v37  ;;  %4250 = vadd.xlane.f32.xlu1 %v4247_v45 }
0x2aff   :  { %4248 = vadd.xlane.f32.xlu0 %v4246_v17 }
0x2b00   :  { %5200 = shalt.err (!%p5197_p4)
}
0x2b01   :  { %s5248_s5 = smov 128   ;;  %s5249_s1 = smov 8   ;;  %vm4252_vm7 = vcmp.ne.s32.totalorder %v4214_v16, 4294967196  ;;  %vm4253_vm8 = vcmp.ne.s32.totalorder %v4221_v28, 4294967196  ;;  %vm4278_vm9 = vcmask 0  }
0x2b02   :  { %4291 = dma.vmem_to_hbm [thread:$0]  %s4286_s14, 256, %s6312_s20, [#allocation3], %s5248_s5, %s5248_s5, %s5249_s1   ;;  %v4412_v15 = vsel %vm4252_vm7, 1.0, %v5233_v7  ;;  %v4413_v24 = vsel %vm4253_vm8, 1.0, %v5233_v7 }
0x2b03   :  { %v4269_v50 = vadd.f32 %v4413_v24, %v4412_v15  ;;  %s5250_s20 = smov [#allocation4]  }
0x2b04   :  { %s4298_s4 = sshll.u32 %s5250_s20, 4  ;;  %s4299_s4 = int_to_ptr.vmem [resolvable:$true] %s4298_s4 }
0x2b05   :  { %v4270_v25 = vrot.slane %v4269_v50, 4  ;;  %s5209_s8 = scalar_lea.vmem %s4299_s4, 16  ;;  %s5213_s24 = scalar_lea.vmem %s4299_s4, 32 }
0x2b06   :  { %p5210_p5 = scmp.ne.s32.totalorder %s4299_s4, %s5209_s8  ;;  %p5214_p6 = scmp.lt.s32.totalorder %s4299_s4, %s4299_s4 }
0x2b07   :  { %v4271_v54 = vadd.f32 %v4270_v25, %v4269_v50  ;;  %p5215_p7 = scmp.lt.s32.totalorder %s5213_s24, %s5209_s8 }
0x2b09   :  { %v4272_v55 = vrot.slane %v4271_v54, 2  ;;  %p5216_p8 = por %p5215_p7, %p5214_p6 }
0x2b0b   :  { %v4273_v26 = vadd.f32 %v4272_v55, %v4271_v54  ;;  %p5217_p9 = pnand %p5216_p8, %p5210_p5 }
0x2b0d   :  { %v4274_v19 = vrot.slane %v4273_v26, 1 }
0x2b0f   :  { %v4275_v7 = vadd.f32 %v4274_v19, %v4273_v26 }
0x2b80   :  { %v4233_v52 = vpop.xlane.xlu1 %4232 }
0x2b81   :  { %5181 = vlog2.f32 %v4233_v52 }
0x2b84   :  { %v4235_v21 = vpop.xlane.xlu0 %4234  ;;  %v4251_v32 = vpop.xlane.xlu1 %4250 }
0x2b85   :  { %5183 = vlog2.f32 %v4235_v21 }
0x2b86   :  { %5185 = vrcp.f32 %v4275_v7 }
0x2b88   :  { %v4249_v60 = vpop.xlane.xlu0 %4248 }
0x2b8e   :  { %v5182_v27 = vpop.eup %5181 }
0x2b8f   :  { %v4237_v38 = vmul.f32 0.6931472, %v5182_v27 }
0x2b91   :  { %v4240_v57 = vadd.f32 %v4237_v38, %v4223_v31 }
0x2b92   :  { %v5184_v5 = vpop.eup %5183 }
0x2b93   :  { %v4239_v58 = vmul.f32 0.6931472, %v5184_v5  ;;  %v4258_v2 = vsub.f32 %v4240_v57, %v4249_v60  ;;  %v5186_v29 = vpop.eup %5185 }
0x2b95   :  { %v4241_v62 = vadd.f32 %v4239_v58, %v4225_v44  ;;  %v4260_v63 = vmul.f32 %v4412_v15, %v4258_v2 }
0x2b97   :  { %v4259_v56 = vsub.f32 %v4241_v62, %v4251_v32 }
0x2b99   :  { %v4261_v4 = vmul.f32 %v4413_v24, %v4259_v56 }
0x2b9b   :  { %v4262_v8 = vadd.f32 %v4261_v4, %v4260_v63 }
0x2b9d   :  { %v4263_v10 = vrot.slane %v4262_v8, 4 }
0x2b9f   :  { %v4264_v11 = vadd.f32 %v4263_v10, %v4262_v8 }
0x2ba1   :  { %v4265_v0 = vrot.slane %v4264_v11, 2 }
0x2ba3   :  { %v4266_v20 = vadd.f32 %v4265_v0, %v4264_v11 }
0x2ba5   :  { %v4267_v33 = vrot.slane %v4266_v20, 1 }
0x2ba7   :  { %v4268_v1 = vadd.f32 %v4267_v33, %v4266_v20 }
0x2ba9   :  { %v4277_v34 = vmul.f32 %v5186_v29, %v4268_v1 }
0x2bab   :  { %4279 = vst.msk [vmem:[#allocation4] sm:$0x1] %vm4278_vm9, %v4277_v34 }
0x2bac   :  { %5220 = shalt.err (!%p5217_p9)
}
0x2bad   :  { %4301 = dma.vmem_to_hbm [thread:$0]  %s4299_s4, 16, %s6313_s21, [#allocation5]  }
0x2bae   :  { %5229 = dma.done.wait [#allocation3], 256  }
0x2baf   :  { %5230 = vsyncadd [#allocation3], 4294967040 }
0x2bb0   :  { %5231 = dma.done.wait [#allocation5], 16  }
0x2bb1   :  { %5232 = vsyncadd [#allocation5], 4294967280 }
0x2bb2   :  { %4308 = vsyncpa [#allocation3], 1 }
0x2bb3   :  { %4309 = vsyncpa [#allocation5], 1 }

</bundles_post_ra>
